<compile_context>
chip_gen: v7x
topology: tpu7x:2x2x1
jax: 0.10.0
libtpu: 0.0.40
codegen_flags: <defaults>
</compile_context>

<pallas_src>
import jax
import jax.numpy as jnp
from jax.experimental import pallas as pl
from jax.experimental.pallas import tpu as pltpu

SEQ = 384
D_IN = 256
D_FF = 1024
FF_CHUNK = 256            # 4 chunks of the hidden FF dimension
EPS = 1e-12


def _pick_tile():
    """Row tile so every TensorCore gets >= 2 grid steps (pipelining)."""
    try:
        kind = jax.devices()[0].device_kind.lower()
    except Exception:
        kind = ""
    if "v7" in kind:
        return 96          # grid=(4,): 2 TCs x 2 steps each
    return 128             # grid=(3,): single-TC chips (v5e/v6e/...)


def _fused_kernel(x_ref, w1_ref, b1_ref, w2_ref, b2_ref,
                  gamma_ref, beta_ref, w3_ref, b3_ref, o_ref):
    x_f32 = x_ref[...].astype(jnp.float32)        # residual / LN path (f32)
    x_bf = x_ref[...].astype(jnp.bfloat16)        # MXU operand
    tm = x_f32.shape[0]

    # ---- linear47 (256->1024) + GELU + linear48 (1024->256), FF-chunked ----
    y = jnp.zeros((tm, D_IN), jnp.float32)
    sqrt_half = jnp.float32(0.7071067811865476)
    for c in range(D_FF // FF_CHUNK):              # static, unrolled
        lo = c * FF_CHUNK
        hi = lo + FF_CHUNK
        h = jnp.dot(x_bf, w1_ref[:, lo:hi],
                    preferred_element_type=jnp.float32)
        h = h + b1_ref[:, lo:hi]
        # exact (erf-based) GELU, matching torch._C._nn.gelu default
        h = 0.5 * h * (1.0 + jax.lax.erf(h * sqrt_half))
        y = y + jnp.dot(h.astype(jnp.bfloat16), w2_ref[lo:hi, :],
                        preferred_element_type=jnp.float32)
    y = y + b2_ref[...]

    # dropout24 (p=0.1): identity at inference time
    # TODO(synk): training-mode dropout (stochastic mask) not implemented.
    r = y + x_f32                                  # residual add (f32)

    # ---- layernorm16 over last dim: two-pass stats, affine folded in ----
    inv_n = jnp.float32(1.0 / D_IN)
    mean = jnp.sum(r, axis=-1, keepdims=True) * inv_n
    centered = r - mean
    var = jnp.sum(centered * centered, axis=-1, keepdims=True) * inv_n
    scale = gamma_ref[...] * jax.lax.rsqrt(var + EPS)   # (TM,1)*(1,256)
    ln = centered * scale + beta_ref[...]

    # ---- linear49 (256->256) ----
    out = jnp.dot(ln.astype(jnp.bfloat16), w3_ref[...],
                  preferred_element_type=jnp.float32)
    out = out + b3_ref[...]
    o_ref[...] = out.astype(o_ref.dtype)


def fused_forward(x, w1b, b1, w2b, b2, gamma, beta, w3b, b3, tm=None):
    """x: (1, SEQ, D_IN) f32. w1b/w2b/w3b must already be bf16 ([in, out])."""
    xt = x.reshape(SEQ, D_IN)
    if tm is None:
        tm = _pick_tile()
    assert SEQ % tm == 0
    grid = (SEQ // tm,)

    full = lambda shape: pl.BlockSpec(shape, lambda i: (0, 0))

    cost = pl.CostEstimate(
        flops=453_000_000,          # 2*(384*256*1024)*2 + 2*384*256*256
        transcendentals=SEQ * D_FF, # erf per FF element
        bytes_accessed=2_000_000,   # x + out (f32) + bf16 weights + biases
    )

    out = pl.pallas_call(
        _fused_kernel,
        out_shape=jax.ShapeDtypeStruct((SEQ, D_IN), x.dtype),
        grid_spec=pltpu.PrefetchScalarGridSpec(
            num_scalar_prefetch=0,
            grid=grid,
            in_specs=[
                pl.BlockSpec((tm, D_IN), lambda i: (i, 0)),   # x tile
                full((D_IN, D_FF)),                            # w1 (bf16)
                full((1, D_FF)),                               # b1 (f32)
                full((D_FF, D_IN)),                            # w2 (bf16)
                full((1, D_IN)),                               # b2 (f32)
                full((1, D_IN)),                               # gamma
                full((1, D_IN)),                               # beta
                full((D_IN, D_IN)),                            # w3 (bf16)
                full((1, D_IN)),                               # b3 (f32)
            ],
            out_specs=pl.BlockSpec((tm, D_IN), lambda i: (i, 0)),
        ),
        compiler_params=pltpu.CompilerParams(
            dimension_semantics=("parallel",)),
        cost_estimate=cost,
    )(xt, w1b, b1, w2b, b2, gamma, beta, w3b, b3)
    return out.reshape(1, SEQ, D_IN)


def init_params(key):
    ks = jax.random.split(key, 6)
    # deterministic, small-magnitude weights; stored as [in, out]
    w1 = jax.random.normal(ks[0], (D_IN, D_FF), jnp.float32) * 0.02
    b1 = jnp.zeros((1, D_FF), jnp.float32) + 0.01
    w2 = jax.random.normal(ks[1], (D_FF, D_IN), jnp.float32) * 0.02
    b2 = jnp.zeros((1, D_IN), jnp.float32) + 0.01
    gamma = jnp.ones((1, D_IN), jnp.float32)
    beta = jnp.zeros((1, D_IN), jnp.float32)
    w3 = jax.random.normal(ks[2], (D_IN, D_IN), jnp.float32) * 0.02
    b3 = jnp.zeros((1, D_IN), jnp.float32) + 0.01
    return w1, b1, w2, b2, gamma, beta, w3, b3


def prepare_weights(params):
    """One-time f32->bf16 cast of matmul weights (kept out of the call path)."""
    w1, b1, w2, b2, gamma, beta, w3, b3 = params
    w1b = jax.device_put(w1.astype(jnp.bfloat16))
    w2b = jax.device_put(w2.astype(jnp.bfloat16))
    w3b = jax.device_put(w3.astype(jnp.bfloat16))
    return w1b, b1, w2b, b2, gamma, beta, w3b, b3


def reference(x, w1, b1, w2, b2, gamma, beta, w3, b3):
    """Pure f32 JAX reference matching the PyTorch module's forward."""
    h = x @ w1 + b1[0]
    h = 0.5 * h * (1.0 + jax.lax.erf(h / jnp.sqrt(2.0)))
    y = h @ w2 + b2[0]
    r = y + x
    mean = jnp.mean(r, axis=-1, keepdims=True)
    var = jnp.mean((r - mean) ** 2, axis=-1, keepdims=True)
    ln = (r - mean) / jnp.sqrt(var + EPS) * gamma[0] + beta[0]
    return ln @ w3 + b3[0]


if __name__ == "__main__":
    key = jax.random.PRNGKey(0)
    kx, kp = jax.random.split(key)
    x = jax.random.normal(kx, (1, SEQ, D_IN), jnp.float32)
    params = init_params(kp)
    kernel_params = prepare_weights(params)   # bf16 weights cached once

    out = fused_forward(x, *kernel_params)
    out = jax.block_until_ready(out)

    ref = reference(x.reshape(SEQ, D_IN), *params).reshape(1, SEQ, D_IN)
    assert out.shape == (1, SEQ, D_IN)
    # bf16 matmul path vs f32 reference: relaxed tolerance.
    assert jnp.allclose(out, ref, atol=3e-2, rtol=3e-2), "mismatch vs reference"
    print("KERNEL_OK")
</pallas_src>

<mosaic_0001>
module attributes {stable_mosaic.version = 11 : i64} {
  func.func @_fused_kernel(%arg0: i32, %arg1: memref<128x256xf32, #tpu.memory_space<vmem>>, %arg2: memref<256x1024xbf16, #tpu.memory_space<vmem>>, %arg3: memref<1x1024xf32, #tpu.memory_space<vmem>>, %arg4: memref<1024x256xbf16, #tpu.memory_space<vmem>>, %arg5: memref<1x256xf32, #tpu.memory_space<vmem>>, %arg6: memref<1x256xf32, #tpu.memory_space<vmem>>, %arg7: memref<1x256xf32, #tpu.memory_space<vmem>>, %arg8: memref<256x256xbf16, #tpu.memory_space<vmem>>, %arg9: memref<1x256xf32, #tpu.memory_space<vmem>>, %arg10: memref<128x256xf32, #tpu.memory_space<vmem>>) attributes {dimension_semantics = [#tpu.dimension_semantics<parallel>], iteration_bounds = array<i64: 3>, scalar_prefetch = 0 : i64, scratch_operands = 0 : i64, tpu.core_type = #tpu.core_type<tc>, window_params = [{transform_indices = @transform_0, window_bounds = array<i64: 128, 256>}, {pipeline_mode = #tpu.pipeline_mode<synchronous>, transform_indices = @transform_1, window_bounds = array<i64: 256, 1024>}, {pipeline_mode = #tpu.pipeline_mode<synchronous>, transform_indices = @transform_2, window_bounds = array<i64: 1, 1024>}, {pipeline_mode = #tpu.pipeline_mode<synchronous>, transform_indices = @transform_3, window_bounds = array<i64: 1024, 256>}, {pipeline_mode = #tpu.pipeline_mode<synchronous>, transform_indices = @transform_4, window_bounds = array<i64: 1, 256>}, {pipeline_mode = #tpu.pipeline_mode<synchronous>, transform_indices = @transform_5, window_bounds = array<i64: 1, 256>}, {pipeline_mode = #tpu.pipeline_mode<synchronous>, transform_indices = @transform_6, window_bounds = array<i64: 1, 256>}, {pipeline_mode = #tpu.pipeline_mode<synchronous>, transform_indices = @transform_7, window_bounds = array<i64: 256, 256>}, {pipeline_mode = #tpu.pipeline_mode<synchronous>, transform_indices = @transform_8, window_bounds = array<i64: 1, 256>}, {transform_indices = @transform_9, window_bounds = array<i64: 128, 256>}]} {
    %c0 = arith.constant 0 : index
    %c0_0 = arith.constant 0 : index
    %0 = vector.load %arg1[%c0, %c0_0] : memref<128x256xf32, #tpu.memory_space<vmem>>, vector<128x256xf32>
    %c0_1 = arith.constant 0 : index
    %c0_2 = arith.constant 0 : index
    %1 = vector.load %arg1[%c0_1, %c0_2] : memref<128x256xf32, #tpu.memory_space<vmem>>, vector<128x256xf32>
    %2 = arith.truncf %1 : vector<128x256xf32> to vector<128x256xbf16>
    %cst = arith.constant 0.000000e+00 : f32
    %3 = vector.broadcast %cst : f32 to vector<128x256xf32>
    %c0_3 = arith.constant 0 : index
    %c0_4 = arith.constant 0 : index
    %4 = vector.load %arg2[%c0_3, %c0_4] : memref<256x1024xbf16, #tpu.memory_space<vmem>>, vector<256x256xbf16>
    %cst_5 = arith.constant dense<0.000000e+00> : vector<128x256xf32>
    %5 = tpu.matmul %2, %4, %cst_5 {dimension_numbers = #tpu.dot_dimension_numbers<[1], [0], [0], [1], [0, 0, 1, 1], [], []>} : vector<128x256xbf16>, vector<256x256xbf16>, vector<128x256xf32> -> vector<128x256xf32>
    %c0_6 = arith.constant 0 : index
    %c0_7 = arith.constant 0 : index
    %6 = vector.load %arg3[%c0_6, %c0_7] : memref<1x1024xf32, #tpu.memory_space<vmem>>, vector<1x256xf32>
    %7 = vector.broadcast %6 : vector<1x256xf32> to vector<128x256xf32>
    %8 = arith.addf %5, %7 : vector<128x256xf32>
    %cst_8 = arith.constant 5.000000e-01 : f32
    %9 = vector.broadcast %cst_8 : f32 to vector<128x256xf32>
    %10 = arith.mulf %9, %8 : vector<128x256xf32>
    %cst_9 = arith.constant 0.707106769 : f32
    %11 = vector.broadcast %cst_9 : f32 to vector<128x256xf32>
    %12 = arith.mulf %8, %11 : vector<128x256xf32>
    %13 = math.erf %12 : vector<128x256xf32>
    %cst_10 = arith.constant 1.000000e+00 : f32
    %14 = vector.broadcast %cst_10 : f32 to vector<128x256xf32>
    %15 = arith.addf %14, %13 : vector<128x256xf32>
    %16 = arith.mulf %10, %15 : vector<128x256xf32>
    %17 = arith.truncf %16 : vector<128x256xf32> to vector<128x256xbf16>
    %c0_11 = arith.constant 0 : index
    %c0_12 = arith.constant 0 : index
    %18 = vector.load %arg4[%c0_11, %c0_12] : memref<1024x256xbf16, #tpu.memory_space<vmem>>, vector<256x256xbf16>
    %cst_13 = arith.constant dense<0.000000e+00> : vector<128x256xf32>
    %19 = tpu.matmul %17, %18, %cst_13 {dimension_numbers = #tpu.dot_dimension_numbers<[1], [0], [0], [1], [0, 0, 1, 1], [], []>} : vector<128x256xbf16>, vector<256x256xbf16>, vector<128x256xf32> -> vector<128x256xf32>
    %20 = arith.addf %3, %19 : vector<128x256xf32>
    %c0_14 = arith.constant 0 : index
    %c256 = arith.constant 256 : index
    %21 = vector.load %arg2[%c0_14, %c256] : memref<256x1024xbf16, #tpu.memory_space<vmem>>, vector<256x256xbf16>
    %cst_15 = arith.constant dense<0.000000e+00> : vector<128x256xf32>
    %22 = tpu.matmul %2, %21, %cst_15 {dimension_numbers = #tpu.dot_dimension_numbers<[1], [0], [0], [1], [0, 0, 1, 1], [], []>} : vector<128x256xbf16>, vector<256x256xbf16>, vector<128x256xf32> -> vector<128x256xf32>
    %c0_16 = arith.constant 0 : index
    %c256_17 = arith.constant 256 : index
    %23 = vector.load %arg3[%c0_16, %c256_17] : memref<1x1024xf32, #tpu.memory_space<vmem>>, vector<1x256xf32>
    %24 = vector.broadcast %23 : vector<1x256xf32> to vector<128x256xf32>
    %25 = arith.addf %22, %24 : vector<128x256xf32>
    %cst_18 = arith.constant 5.000000e-01 : f32
    %26 = vector.broadcast %cst_18 : f32 to vector<128x256xf32>
    %27 = arith.mulf %26, %25 : vector<128x256xf32>
    %cst_19 = arith.constant 0.707106769 : f32
    %28 = vector.broadcast %cst_19 : f32 to vector<128x256xf32>
    %29 = arith.mulf %25, %28 : vector<128x256xf32>
    %30 = math.erf %29 : vector<128x256xf32>
    %cst_20 = arith.constant 1.000000e+00 : f32
    %31 = vector.broadcast %cst_20 : f32 to vector<128x256xf32>
    %32 = arith.addf %31, %30 : vector<128x256xf32>
    %33 = arith.mulf %27, %32 : vector<128x256xf32>
    %34 = arith.truncf %33 : vector<128x256xf32> to vector<128x256xbf16>
    %c256_21 = arith.constant 256 : index
    %c0_22 = arith.constant 0 : index
    %35 = vector.load %arg4[%c256_21, %c0_22] : memref<1024x256xbf16, #tpu.memory_space<vmem>>, vector<256x256xbf16>
    %cst_23 = arith.constant dense<0.000000e+00> : vector<128x256xf32>
    %36 = tpu.matmul %34, %35, %cst_23 {dimension_numbers = #tpu.dot_dimension_numbers<[1], [0], [0], [1], [0, 0, 1, 1], [], []>} : vector<128x256xbf16>, vector<256x256xbf16>, vector<128x256xf32> -> vector<128x256xf32>
    %37 = arith.addf %20, %36 : vector<128x256xf32>
    %c0_24 = arith.constant 0 : index
    %c512 = arith.constant 512 : index
    %38 = vector.load %arg2[%c0_24, %c512] : memref<256x1024xbf16, #tpu.memory_space<vmem>>, vector<256x256xbf16>
    %cst_25 = arith.constant dense<0.000000e+00> : vector<128x256xf32>
    %39 = tpu.matmul %2, %38, %cst_25 {dimension_numbers = #tpu.dot_dimension_numbers<[1], [0], [0], [1], [0, 0, 1, 1], [], []>} : vector<128x256xbf16>, vector<256x256xbf16>, vector<128x256xf32> -> vector<128x256xf32>
    %c0_26 = arith.constant 0 : index
    %c512_27 = arith.constant 512 : index
    %40 = vector.load %arg3[%c0_26, %c512_27] : memref<1x1024xf32, #tpu.memory_space<vmem>>, vector<1x256xf32>
    %41 = vector.broadcast %40 : vector<1x256xf32> to vector<128x256xf32>
    %42 = arith.addf %39, %41 : vector<128x256xf32>
    %cst_28 = arith.constant 5.000000e-01 : f32
    %43 = vector.broadcast %cst_28 : f32 to vector<128x256xf32>
    %44 = arith.mulf %43, %42 : vector<128x256xf32>
    %cst_29 = arith.constant 0.707106769 : f32
    %45 = vector.broadcast %cst_29 : f32 to vector<128x256xf32>
    %46 = arith.mulf %42, %45 : vector<128x256xf32>
    %47 = math.erf %46 : vector<128x256xf32>
    %cst_30 = arith.constant 1.000000e+00 : f32
    %48 = vector.broadcast %cst_30 : f32 to vector<128x256xf32>
    %49 = arith.addf %48, %47 : vector<128x256xf32>
    %50 = arith.mulf %44, %49 : vector<128x256xf32>
    %51 = arith.truncf %50 : vector<128x256xf32> to vector<128x256xbf16>
    %c512_31 = arith.constant 512 : index
    %c0_32 = arith.constant 0 : index
    %52 = vector.load %arg4[%c512_31, %c0_32] : memref<1024x256xbf16, #tpu.memory_space<vmem>>, vector<256x256xbf16>
    %cst_33 = arith.constant dense<0.000000e+00> : vector<128x256xf32>
    %53 = tpu.matmul %51, %52, %cst_33 {dimension_numbers = #tpu.dot_dimension_numbers<[1], [0], [0], [1], [0, 0, 1, 1], [], []>} : vector<128x256xbf16>, vector<256x256xbf16>, vector<128x256xf32> -> vector<128x256xf32>
    %54 = arith.addf %37, %53 : vector<128x256xf32>
    %c0_34 = arith.constant 0 : index
    %c768 = arith.constant 768 : index
    %55 = vector.load %arg2[%c0_34, %c768] : memref<256x1024xbf16, #tpu.memory_space<vmem>>, vector<256x256xbf16>
    %cst_35 = arith.constant dense<0.000000e+00> : vector<128x256xf32>
    %56 = tpu.matmul %2, %55, %cst_35 {dimension_numbers = #tpu.dot_dimension_numbers<[1], [0], [0], [1], [0, 0, 1, 1], [], []>} : vector<128x256xbf16>, vector<256x256xbf16>, vector<128x256xf32> -> vector<128x256xf32>
    %c0_36 = arith.constant 0 : index
    %c768_37 = arith.constant 768 : index
    %57 = vector.load %arg3[%c0_36, %c768_37] : memref<1x1024xf32, #tpu.memory_space<vmem>>, vector<1x256xf32>
    %58 = vector.broadcast %57 : vector<1x256xf32> to vector<128x256xf32>
    %59 = arith.addf %56, %58 : vector<128x256xf32>
    %cst_38 = arith.constant 5.000000e-01 : f32
    %60 = vector.broadcast %cst_38 : f32 to vector<128x256xf32>
    %61 = arith.mulf %60, %59 : vector<128x256xf32>
    %cst_39 = arith.constant 0.707106769 : f32
    %62 = vector.broadcast %cst_39 : f32 to vector<128x256xf32>
    %63 = arith.mulf %59, %62 : vector<128x256xf32>
    %64 = math.erf %63 : vector<128x256xf32>
    %cst_40 = arith.constant 1.000000e+00 : f32
    %65 = vector.broadcast %cst_40 : f32 to vector<128x256xf32>
    %66 = arith.addf %65, %64 : vector<128x256xf32>
    %67 = arith.mulf %61, %66 : vector<128x256xf32>
    %68 = arith.truncf %67 : vector<128x256xf32> to vector<128x256xbf16>
    %c768_41 = arith.constant 768 : index
    %c0_42 = arith.constant 0 : index
    %69 = vector.load %arg4[%c768_41, %c0_42] : memref<1024x256xbf16, #tpu.memory_space<vmem>>, vector<256x256xbf16>
    %cst_43 = arith.constant dense<0.000000e+00> : vector<128x256xf32>
    %70 = tpu.matmul %68, %69, %cst_43 {dimension_numbers = #tpu.dot_dimension_numbers<[1], [0], [0], [1], [0, 0, 1, 1], [], []>} : vector<128x256xbf16>, vector<256x256xbf16>, vector<128x256xf32> -> vector<128x256xf32>
    %71 = arith.addf %54, %70 : vector<128x256xf32>
    %c0_44 = arith.constant 0 : index
    %c0_45 = arith.constant 0 : index
    %72 = vector.load %arg5[%c0_44, %c0_45] : memref<1x256xf32, #tpu.memory_space<vmem>>, vector<1x256xf32>
    %73 = vector.broadcast %72 : vector<1x256xf32> to vector<128x256xf32>
    %74 = arith.addf %71, %73 : vector<128x256xf32>
    %75 = arith.addf %74, %0 : vector<128x256xf32>
    %cst_46 = arith.constant dense<0.000000e+00> : vector<128xf32>
    %76 = vector.multi_reduction <add>, %75, %cst_46 [1] : vector<128x256xf32> to vector<128xf32>
    %77 = vector.shape_cast %76 : vector<128xf32> to vector<128x1xf32>
    %cst_47 = arith.constant 3.906250e-03 : f32
    %78 = vector.broadcast %cst_47 : f32 to vector<128x1xf32>
    %79 = arith.mulf %77, %78 : vector<128x1xf32>
    %80 = vector.broadcast %79 : vector<128x1xf32> to vector<128x256xf32>
    %81 = arith.subf %75, %80 : vector<128x256xf32>
    %82 = arith.mulf %81, %81 : vector<128x256xf32>
    %cst_48 = arith.constant dense<0.000000e+00> : vector<128xf32>
    %83 = vector.multi_reduction <add>, %82, %cst_48 [1] : vector<128x256xf32> to vector<128xf32>
    %84 = vector.shape_cast %83 : vector<128xf32> to vector<128x1xf32>
    %cst_49 = arith.constant 3.906250e-03 : f32
    %85 = vector.broadcast %cst_49 : f32 to vector<128x1xf32>
    %86 = arith.mulf %84, %85 : vector<128x1xf32>
    %c0_50 = arith.constant 0 : index
    %c0_51 = arith.constant 0 : index
    %87 = vector.load %arg6[%c0_50, %c0_51] : memref<1x256xf32, #tpu.memory_space<vmem>>, vector<1x256xf32>
    %cst_52 = arith.constant 9.99999996E-13 : f32
    %88 = vector.broadcast %cst_52 : f32 to vector<128x1xf32>
    %89 = arith.addf %86, %88 : vector<128x1xf32>
    %90 = math.rsqrt %89 : vector<128x1xf32>
    %91 = vector.broadcast %87 : vector<1x256xf32> to vector<128x256xf32>
    %92 = vector.broadcast %90 : vector<128x1xf32> to vector<128x256xf32>
    %93 = arith.mulf %91, %92 : vector<128x256xf32>
    %94 = arith.mulf %81, %93 : vector<128x256xf32>
    %c0_53 = arith.constant 0 : index
    %c0_54 = arith.constant 0 : index
    %95 = vector.load %arg7[%c0_53, %c0_54] : memref<1x256xf32, #tpu.memory_space<vmem>>, vector<1x256xf32>
    %96 = vector.broadcast %95 : vector<1x256xf32> to vector<128x256xf32>
    %97 = arith.addf %94, %96 : vector<128x256xf32>
    %98 = arith.truncf %97 : vector<128x256xf32> to vector<128x256xbf16>
    %c0_55 = arith.constant 0 : index
    %c0_56 = arith.constant 0 : index
    %99 = vector.load %arg8[%c0_55, %c0_56] : memref<256x256xbf16, #tpu.memory_space<vmem>>, vector<256x256xbf16>
    %cst_57 = arith.constant dense<0.000000e+00> : vector<128x256xf32>
    %100 = tpu.matmul %98, %99, %cst_57 {dimension_numbers = #tpu.dot_dimension_numbers<[1], [0], [0], [1], [0, 0, 1, 1], [], []>} : vector<128x256xbf16>, vector<256x256xbf16>, vector<128x256xf32> -> vector<128x256xf32>
    %c0_58 = arith.constant 0 : index
    %c0_59 = arith.constant 0 : index
    %101 = vector.load %arg9[%c0_58, %c0_59] : memref<1x256xf32, #tpu.memory_space<vmem>>, vector<1x256xf32>
    %102 = vector.broadcast %101 : vector<1x256xf32> to vector<128x256xf32>
    %103 = arith.addf %100, %102 : vector<128x256xf32>
    %c0_60 = arith.constant 0 : index
    %c0_61 = arith.constant 0 : index
    %104 = vector.load %arg10[%c0_60, %c0_61] : memref<128x256xf32, #tpu.memory_space<vmem>>, vector<128x256xf32>
    tpu.vector_store %arg10[%c0_60, %c0_61], %103 {strides = array<i32>} : memref<128x256xf32, #tpu.memory_space<vmem>>, vector<128x256xf32>,
    return
  }
  func.func @transform_0(%arg0: i32) -> (i32, i32) {
    %c0_i32 = arith.constant 0 : i32
    %c0_i32_0 = arith.constant 0 : i32
    return %arg0, %c0_i32 : i32, i32
  }
  func.func @transform_1(%arg0: i32) -> (i32, i32) {
    %c0_i32 = arith.constant 0 : i32
    %c0_i32_0 = arith.constant 0 : i32
    %c0_i32_1 = arith.constant 0 : i32
    return %c0_i32, %c0_i32_0 : i32, i32
  }
  func.func @transform_2(%arg0: i32) -> (i32, i32) {
    %c0_i32 = arith.constant 0 : i32
    %c0_i32_0 = arith.constant 0 : i32
    %c0_i32_1 = arith.constant 0 : i32
    return %c0_i32, %c0_i32_0 : i32, i32
  }
  func.func @transform_3(%arg0: i32) -> (i32, i32) {
    %c0_i32 = arith.constant 0 : i32
    %c0_i32_0 = arith.constant 0 : i32
    %c0_i32_1 = arith.constant 0 : i32
    return %c0_i32, %c0_i32_0 : i32, i32
  }
  func.func @transform_4(%arg0: i32) -> (i32, i32) {
    %c0_i32 = arith.constant 0 : i32
    %c0_i32_0 = arith.constant 0 : i32
    %c0_i32_1 = arith.constant 0 : i32
    return %c0_i32, %c0_i32_0 : i32, i32
  }
  func.func @transform_5(%arg0: i32) -> (i32, i32) {
    %c0_i32 = arith.constant 0 : i32
    %c0_i32_0 = arith.constant 0 : i32
    %c0_i32_1 = arith.constant 0 : i32
    return %c0_i32, %c0_i32_0 : i32, i32
  }
  func.func @transform_6(%arg0: i32) -> (i32, i32) {
    %c0_i32 = arith.constant 0 : i32
    %c0_i32_0 = arith.constant 0 : i32
    %c0_i32_1 = arith.constant 0 : i32
    return %c0_i32, %c0_i32_0 : i32, i32
  }
  func.func @transform_7(%arg0: i32) -> (i32, i32) {
    %c0_i32 = arith.constant 0 : i32
    %c0_i32_0 = arith.constant 0 : i32
    %c0_i32_1 = arith.constant 0 : i32
    return %c0_i32, %c0_i32_0 : i32, i32
  }
  func.func @transform_8(%arg0: i32) -> (i32, i32) {
    %c0_i32 = arith.constant 0 : i32
    %c0_i32_0 = arith.constant 0 : i32
    %c0_i32_1 = arith.constant 0 : i32
    return %c0_i32, %c0_i32_0 : i32, i32
  }
  func.func @transform_9(%arg0: i32) -> (i32, i32) {
    %c0_i32 = arith.constant 0 : i32
    %c0_i32_0 = arith.constant 0 : i32
    return %arg0, %c0_i32 : i32, i32
  }
}

</mosaic_0001>

<bundles_post_ra>
// kernel: tpu_custom_call.1
= control target key start
LH: loop header
LB: loop body
LE: loop exit
PB: predicated region body
PF: predicated region fallthrough
CT: control target
= control target key end

     0   :  { %s8071_s0 = inlined_call_operand.hbm [shape: f32[384,256], index: 0, kind: input, shape index: {}]   ;;  %s8072_s1 = inlined_call_operand.hbm [shape: bf16[256,1024], index: 1, kind: input, shape index: {}]   ;;  %s8073_s2 = inlined_call_operand.hbm [shape: f32[1,1024], index: 2, kind: input, shape index: {}]   ;;  %s8074_s3 = inlined_call_operand.hbm [shape: bf16[1024,256], index: 3, kind: input, shape index: {}]   ;;  %s8075_s4 = inlined_call_operand.vmem [shape: f32[1,256], index: 4, kind: input, shape index: {}]   ;;  %s8076_s5 = inlined_call_operand.vmem [shape: f32[1,256], index: 5, kind: input, shape index: {}]   ;;  %s8077_s6 = inlined_call_operand.vmem [shape: f32[1,256], index: 6, kind: input, shape index: {}]   ;;  %s8078_s7 = inlined_call_operand.hbm [shape: bf16[256,256], index: 7, kind: input, shape index: {}]   ;;  %s8079_s8 = inlined_call_operand.vmem [shape: f32[1,256], index: 8, kind: input, shape index: {}]   ;;  %s8080_s9 = inlined_call_operand.hbm [shape: f32[384,256], index: 9, kind: output, shape index: {}]  }
   0x1   :  { %8094 = sst [smem:[#allocation25_spill]] %s8072_s1 }
   0x2   :  { %14 = vsyncpa [#allocation3], 0 }
   0x3   :  { %16 = vsyncpa [#allocation3 + $0x1], 0 }
   0x4   :  { %17 = vsyncpa [#allocation6], 0 }
   0x5   :  { %18 = vsyncpa [#allocation9], 0 }
   0x6   :  { %19 = vsyncpa [#allocation4], 0 }
   0x7   :  { %21 = vsyncpa [#allocation4 + $0x1], 0  ;;  %s5974_s30 = smov 0   ;;  %s5976_s10 = smov 0  }
   0x8   :  { %s5978_s11 = smov 0   ;;  %s5980_s12 = smov 0  }
   0x9 LB: > { %8095 = sst [smem:[#allocation16_spill]] %s5896_s30  ;;  %s5995_s13 = sadd.s32 4294967295, %s5908_s12   ;;  %s5908_s12 = sphi %s5980_s12, %s8177_s12   ;;  %s5904_s11 = sphi %s5978_s11, %s8176_s11   ;;  %s5900_s10 = sphi %s5976_s10, %s8175_s10   ;;  %s5896_s30 = sphi %s5974_s30, %s8174_s30  }
   0xa   : > { %s4625_s14 = sadd.s32 4294967294, %s5908_s12   ;;  %p47_p0 = scmp.ne.s32.totalorder %s5900_s10, %s5896_s30 }
   0xb   : > { %p8081_p1 = scmp.eq.s32.totalorder %s5995_s13, 0  ;;  %p245_p3 = scmp.eq.s32.totalorder %s4625_s14, 2 }
   0xc   : > { %p4626_p5 = scmp.ge.s32.totalorder %s5908_s12, 1  ;;  %p252_p7 = scmp.lt.s32.totalorder %s5908_s12, 4 }
   0xd   : > { %p6004_p4 = por %p8081_p1, %p47_p0  ;;  %p6009_p6 = por %p245_p3, %p47_p0 }
   0xe   : > { %p6014_p8 = pnand %p4626_p5, %p252_p7  ;;  %s5910_s18 = smov [#allocation5]  }
   0xf   : > { %s8096_s15 = scalar_select %p6004_p4, 1, 0 }
  0x10   : > { %s8097_s16 = scalar_select %p6009_p6, 1, 0 }
  0x11   : > { %s8099_s17 = scalar_select %p6014_p8, 1, 0 }
  0x12   : > { %8098 = sst [smem:[#allocation17_spill]] %s8097_s16  ;;  %s264_s19 = sshll.u32 %s5910_s18, 4  ;;  %s265_s19 = int_to_ptr.vmem [resolvable:$true] %s264_s19 }
  0x13   : > { %p5057_p9 = pneg %p6014_p8  ;;  %s5911_s21 = smov [#allocation8]  }
  0x14   : > { %s288_s22 = sshll.u32 %s5911_s21, 4  ;;  %s8101_s1 = sld [smem:[#allocation25_spill]]  ;;  %s6026_s22 = int_to_ptr.vmem [resolvable:$true] %s288_s22 }
  0x15   : > { %p6022_p10 = pnand %p5057_p9, %p8081_p1 }
  0x17   : > { %p6036_p12 = pneg %p6022_p10 }
  0x1a   : > { %s5692_s25 = scalar_lea.hbm %s8101_s1, 16384 }
  0x1b   : > { %p5693_p11 = scmp.ne.s32.totalorder %s8101_s1, %s5692_s25  ;;  %p5699_p3 = scmp.lt.u32.totalorder %s5692_s25, %s8101_s1 }
  0x1d   : > { %p5695_p13 = pnand %p6036_p12, %p5693_p11 }
  0x1f   : > { %p5696_p0 = pneg %p5695_p13 }
  0x21   : > { %p5701_p5 = pnand %p5699_p3, %p5696_p0 }
  0x23   : > { %5704 = shalt.err (!%p5701_p5)
}
  0x24   : > { %s5705_s18 = scalar_lea.vmem %s265_s19, 16384  ;;  %p5713_p2 = scmp.lt.s32.totalorder %s265_s19, %s265_s19 }
  0x25   : > { %p5706_p7 = scmp.ne.s32.totalorder %s265_s19, %s5705_s18  ;;  %p5714_p6 = scmp.lt.s32.totalorder %s5705_s18, %s5705_s18 }
  0x27   : > { %p5708_p9 = pnand %p5706_p7, %p6036_p12  ;;  %p5715_p4 = por %p5714_p6, %p5713_p2 }
  0x29   : > { %p5709_p1 = pneg %p5708_p9 }
  0x2b   : > { %p5716_p8 = pnand %p5715_p4, %p5709_p1 }
  0x2d   : > { %5719 = shalt.err (!%p5716_p8)
}
  0x2e   : > { %s5912_s21 = smov 512   ;;  %s5913_s23 = smov 32  }
  0x2f   : > { %5060 = dma.hbm_to_vmem [thread:$0]  (!%p6022_p10), %s8101_s1, 16384, %s265_s19, [#allocation6], %s5912_s21, %s5912_s21, %s5913_s23  }
  0x30   : > { %s5720_s29 = scalar_lea.hbm %s8074_s3, 16384 }
  0x31   : > { %p5721_p11 = scmp.ne.s32.totalorder %s8074_s3, %s5720_s29  ;;  %p5727_p4 = scmp.lt.u32.totalorder %s5720_s29, %s8074_s3 }
  0x33   : > { %p5723_p1 = pnand %p5721_p11, %p6036_p12 }
  0x35   : > { %p5724_p2 = pneg %p5723_p1 }
  0x37   : > { %p5729_p6 = pnand %p5727_p4, %p5724_p2 }
  0x39   : > { %5732 = shalt.err (!%p5729_p6)
}
  0x3a   : > { %s5733_s19 = scalar_lea.vmem %s6026_s22, 16384  ;;  %p5741_p3 = scmp.lt.s32.totalorder %s6026_s22, %s6026_s22 }
  0x3b   : > { %p5734_p8 = scmp.ne.s32.totalorder %s6026_s22, %s5733_s19  ;;  %p5742_p5 = scmp.lt.s32.totalorder %s5733_s19, %s5733_s19 }
  0x3d   : > { %p5736_p13 = pnand %p5734_p8, %p6036_p12  ;;  %p5743_p7 = por %p5742_p5, %p5741_p3 }
  0x3f   : > { %p5737_p0 = pneg %p5736_p13 }
  0x41   : > { %p5744_p9 = pnand %p5743_p7, %p5737_p0 }
  0x43   : > { %5747 = shalt.err (!%p5744_p9)
}
  0x44   : > { %s5914_s16 = smov 128   ;;  %s5915_s30 = smov 8  }
  0x45   : > { %5066 = dma.hbm_to_vmem [thread:$0]  (!%p6022_p10), %s8074_s3, 16384, %s6026_s22, [#allocation9], %s5914_s16, %s5914_s16, %s5915_s30  }
  0x46   : > { %s5916_s24 = smov [#allocation7]   ;;  %s5917_s26 = smov [#allocation10]  }
  0x47   : > { %s278_s25 = sshll.u32 %s5916_s24, 4  ;;  %s310_s27 = sshll.u32 %s5917_s26, 4  ;;  %s279_s25 = int_to_ptr.vmem [resolvable:$true] %s278_s25  ;;  %s6078_s27 = int_to_ptr.vmem [resolvable:$true] %s310_s27 }
  0x48   : > { %s5748_s18 = scalar_lea.hbm %s8073_s2, 128 }
  0x49   : > { %p5749_p11 = scmp.ne.s32.totalorder %s8073_s2, %s5748_s18  ;;  %p5755_p4 = scmp.lt.u32.totalorder %s5748_s18, %s8073_s2 }
  0x4b   : > { %p5751_p1 = pnand %p5749_p11, %p6036_p12 }
  0x4d   : > { %p5752_p2 = pneg %p5751_p1 }
  0x4f   : > { %p5757_p6 = pnand %p5755_p4, %p5752_p2 }
  0x51   : > { %5760 = shalt.err (!%p5757_p6)
}
  0x52   : > { %s5761_s23 = scalar_lea.vmem %s279_s25, 128  ;;  %p5769_p3 = scmp.lt.s32.totalorder %s279_s25, %s279_s25 }
  0x53   : > { %p5762_p8 = scmp.ne.s32.totalorder %s279_s25, %s5761_s23  ;;  %p5770_p5 = scmp.lt.s32.totalorder %s5761_s23, %s5761_s23 }
  0x55   : > { %p5764_p13 = pnand %p5762_p8, %p6036_p12  ;;  %p5771_p7 = por %p5770_p5, %p5769_p3 }
  0x57   : > { %p5765_p0 = pneg %p5764_p13 }
  0x59   : > { %p5772_p9 = pnand %p5771_p7, %p5765_p0 }
  0x5b   : > { %5775 = shalt.err (!%p5772_p9)
}
  0x5c   : > { %5063 = dma.hbm_to_vmem [thread:$0]  (!%p6022_p10), %s8073_s2, 128, %s279_s25, [#allocation6]  }
  0x5d   : > { %s5776_s14 = scalar_lea.hbm %s8078_s7, 4096 }
  0x5e   : > { %p5777_p11 = scmp.ne.s32.totalorder %s8078_s7, %s5776_s14  ;;  %p5783_p4 = scmp.lt.u32.totalorder %s5776_s14, %s8078_s7 }
  0x60   : > { %p5779_p1 = pnand %p5777_p11, %p6036_p12 }
  0x62   : > { %p5780_p2 = pneg %p5779_p1 }
  0x64   : > { %p5785_p6 = pnand %p5783_p4, %p5780_p2 }
  0x66   : > { %5788 = shalt.err (!%p5785_p6)
}
  0x67   : > { %s5789_s25 = scalar_lea.vmem %s6078_s27, 4096  ;;  %p5797_p3 = scmp.lt.s32.totalorder %s6078_s27, %s6078_s27 }
  0x68   : > { %p5790_p8 = scmp.ne.s32.totalorder %s6078_s27, %s5789_s25  ;;  %p5798_p5 = scmp.lt.s32.totalorder %s5789_s25, %s5789_s25 }
  0x6a   : > { %p5792_p13 = pnand %p5790_p8, %p6036_p12  ;;  %p5799_p7 = por %p5798_p5, %p5797_p3 }
  0x6c   : > { %p5793_p0 = pneg %p5792_p13 }
  0x6e   : > { %p5800_p9 = pnand %p5799_p7, %p5793_p0 }
  0x70   : > { %5803 = shalt.err (!%p5800_p9)
}
  0x71   : > { %5069 = dma.hbm_to_vmem [thread:$0]  (!%p6022_p10), %s8078_s7, 4096, %s6078_s27, [#allocation9], %s5914_s16, %s5914_s16, %s5915_s30  }
  0x72   : > { %s6125_s20 = sadd.s32 1, %s5908_s12   ;;  %s34_s24 = sadd.s32 1, %s5904_s11 }
  0x73   : > { %s31_s28 = ssub.s32 %s5908_s12, %s6125_s20  ;;  %p41_p11 = scmp.ne.s32.totalorder %s5904_s11, %s5900_s10 }
  0x74   : > { %p32_p12 = scmp.eq.s32.totalorder %s31_s28, 0  ;;  %p42_p1 = scmp.eq.s32.totalorder %s5908_s12, 0 }
  0x75   : > { %p8103_p4 = scmp.eq.s32.totalorder %s5995_s13, 2  ;;  %p5082_p8 = scmp.lt.s32.totalorder %s5908_s12, 3 }
  0x76   : > { %s6134_s26 = scalar_select %p32_p12, %s5904_s11, %s34_s24  }
  0x77   : > { %p43_p2 = por %p42_p1, %p41_p11  ;;  %p6138_p6 = por %p8103_p4, %p41_p11 }
  0x78   : > { %s327_s14 = sand.u32 1, %s5904_s11   ;;  %s4938_s16 = sshll.u32 %s5908_s12, 12 }
  0x79   : > { %s4632_s18 = sshll.u32 %s327_s14, 8  ;;  %s6148_s19 = scalar_lea.hbm %s8071_s0, %s4938_s16 }
  0x7a   : > { %s331_s21 = scalar_lea.vmem [#allocation2], %s4632_s18  ;;  %p6152_p10 = pnand %p5082_p8, %p43_p2 }
  0x7b   : > { %s339_s22 = sshll.u32 %s331_s21, 4  ;;  %s6156_s23 = scalar_lea.sflag [#allocation3], %s327_s14  ;;  %s6150_s22 = int_to_ptr.vmem [resolvable:$true] %s339_s22 }
  0x7c   : > { %s5804_s1 = scalar_lea.hbm %s6148_s19, 4096  ;;  %p5806_p0 = pneg %p6152_p10 }
  0x7d   : > { %p5805_p13 = scmp.ne.s32.totalorder %s6148_s19, %s5804_s1  ;;  %s5809_s18 = scalar_lea.hbm %s8071_s0, 12288 }
  0x7e   : > { %p5810_p7 = scmp.lt.u32.totalorder %s6148_s19, %s8071_s0  ;;  %p5811_p9 = scmp.lt.u32.totalorder %s5809_s18, %s5804_s1 }
  0x7f   : > { %p5807_p3 = pnand %p5806_p0, %p5805_p13  ;;  %p5813_p11 = scmp.lt.u32.totalorder %s5804_s1, %s6148_s19 }
  0x80   : > { %p5812_p12 = por %p5811_p9, %p5810_p7 }
  0x81   : > { %p5808_p5 = pneg %p5807_p3 }
  0x82   : > { %p5814_p1 = por %p5813_p11, %p5812_p12 }
  0x84   : > { %p5815_p2 = pnand %p5814_p1, %p5808_p5 }
  0x86   : > { %5818 = shalt.err (!%p5815_p2)
}
  0x87   : > { %s5819_s14 = scalar_lea.vmem %s6150_s22, 4096  ;;  %s5918_s27 = smov [#allocation2]  }
  0x88   : > { %p5820_p4 = scmp.ne.s32.totalorder %s6150_s22, %s5819_s14  ;;  %s5824_s21 = sshll.u32 %s5918_s27, 4  ;;  %s5825_s21 = int_to_ptr.vmem [resolvable:$false] %s5824_s21 }
  0x89   : > { %s5826_s28 = scalar_lea.vmem %s5825_s21, 8192  ;;  %p5827_p3 = scmp.lt.s32.totalorder %s6150_s22, %s5825_s21 }
  0x8a   : > { %p5822_p8 = pnand %p5820_p4, %p5806_p0  ;;  %p5828_p7 = scmp.lt.s32.totalorder %s5826_s28, %s5819_s14 }
  0x8c   : > { %p5823_p13 = pneg %p5822_p8  ;;  %p5829_p9 = por %p5828_p7, %p5827_p3 }
  0x8e   : > { %p5830_p12 = pnand %p5829_p9, %p5823_p13 }
  0x90   : > { %5833 = shalt.err (!%p5830_p12)
}
  0x91   : > { %s5919_s1 = smov 256   ;;  %s5920_s24 = smov 16  }
  0x92   : > { %5073 = dma.hbm_to_vmem [thread:$0]  (!%p6152_p10), %s6148_s19, 4096, %s6150_s22, %s6156_s23, %s5919_s1, %s5919_s1, %s5920_s24  }
  0x93   : > { %p8106_p0 = scmp.ne.s32.totalorder %s8099_s17, 0 }
  0x95   : > { %351 = sbr.rel (%p8106_p0) target bundleno = 1495 (0x5d7), region = 56 }
  0x9c   : > { %s6187_s18 = sand.u32 1, %s5900_s10   ;;  %p8107_p5 = scmp.ne.s32.totalorder %s8096_s15, 0 }
  0x9d   : > { %s4637_s16 = sshll.u32 %s6187_s18, 8  ;;  %s354_s30 = scalar_lea.sflag [#allocation3], %s6187_s18 }
  0x9e   : > { %s6193_s14 = scalar_lea.vmem [#allocation2], %s4637_s16 }
  0x9f   : > { %5879 = dma.done.wait (%p8107_p5), %s354_s30, 4096  }
  0xa0   : > { %5881 = vsyncadd (%p8107_p5), %s354_s30, 4294963200  ;;  %p8108_p10 = scmp.eq.s32.totalorder %s5995_s13, 0 }
  0xa2   : > { %5883 = dma.done.wait (%p8108_p10), [#allocation6], 16512   ;;  %p8109_p11 = pmov %p8108_p10 }
  0xa3   : > { %p8110_p1 = pmov %p8108_p10 }
  0xa4   : > { %5885 = vsyncadd (%p8109_p11), [#allocation6], 4294950784 }
  0xa5   : > { %5887 = dma.done.wait (%p8110_p1), [#allocation9], 20480   ;;  %p8111_p2 = pmov %p8110_p1 }
  0xa6   : > { %v983_v0 = vld [vmem:[#allocation5 + $0x8] sm:$0xff]  ;;  %v458_v14 = vld [vmem:[#allocation5] sm:$0xff]  ;;  %v413_v32 = vld [vmem:[%s6193_s14 + $0x18] sm:$0xff]  ;;  %s7957_s28 = scalar_lea.vmem [#allocation11], %s4637_s16  ;;  %s4940_s1 = sshll.u32 %s5995_s13, 12 }
  0xa7   : > { %5889 = vsyncadd (%p8111_p2), [#allocation9], 4294946816  ;;  %v984_v1 = vld [vmem:[#allocation5 + $0x28] sm:$0xff]  ;;  %v459_v15 = vld [vmem:[#allocation5 + $0x20] sm:$0xff]  ;;  %s4514_s24 = sshll.u32 %s7957_s28, 4  ;;  %s4500_s13 = scalar_lea.sflag [#allocation4], %s6187_s18  ;;  %s8024_s24 = int_to_ptr.vmem [resolvable:$true] %s4514_s24 }
  0xa8   : > { %v985_v2 = vld [vmem:[#allocation5 + $0x48] sm:$0xff]  ;;  %v4676_v3 = vcombine.high %v983_v0, %v984_v1  ;;  %v4675_v4 = vcombine.low %v983_v0, %v984_v1  ;;  %v4644_v17 = vcombine.high %v458_v14, %v459_v15  ;;  %v4643_v18 = vcombine.low %v458_v14, %v459_v15  ;;  %v460_v19 = vld [vmem:[#allocation5 + $0x40] sm:$0xff]  ;;  %s5834_s15 = scalar_lea.vmem %s8024_s24, 4096  ;;  %s5921_s17 = smov [#allocation11]  }
  0xa9   : > { %v986_v5 = vld [vmem:[#allocation5 + $0x68] sm:$0xff]  ;;  %v461_v20 = vld [vmem:[#allocation5 + $0x60] sm:$0xff]  ;;  %p5835_p4 = scmp.ne.s32.totalorder %s8024_s24, %s5834_s15  ;;  %s5838_s19 = sshll.u32 %s5921_s17, 4  ;;  %s5839_s19 = int_to_ptr.vmem [resolvable:$false] %s5838_s19 }
  0xaa   : > { %v4678_v6 = vcombine.high %v985_v2, %v986_v5  ;;  %v987_v7 = vld [vmem:[#allocation5 + $0x88] sm:$0xff]  ;;  %1187 = vmatprep.subr.bf16.mxu1 %v4676_v3  ;;  %v4677_v9 = vcombine.low %v985_v2, %v986_v5  ;;  %v4646_v23 = vcombine.high %v460_v19, %v461_v20  ;;  %v462_v24 = vld [vmem:[#allocation5 + $0x80] sm:$0xff]  ;;  %662 = vmatprep.subr.bf16.mxu0 %v4644_v17  ;;  %s5840_s22 = scalar_lea.vmem %s5839_s19, 8192  ;;  %p5841_p3 = scmp.lt.s32.totalorder %s8024_s24, %s5839_s19 }
  0xab   : > { %v988_v8 = vld [vmem:[#allocation5 + $0xa8] sm:$0xff]  ;;  %1188 = vmatpush1.bf16.msra.mxu1 %v4675_v4  ;;  %v463_v25 = vld [vmem:[#allocation5 + $0xa0] sm:$0xff]  ;;  %663 = vmatpush1.bf16.msra.mxu0 %v4643_v18  ;;  %v4645_v27 = vcombine.low %v460_v19, %v461_v20  ;;  %p5836_p8 = pnand %p5835_p4, %p6138_p6  ;;  %p5842_p7 = scmp.lt.s32.totalorder %s5840_s22, %s5834_s15 }
  0xac   : > { %1189 = vmatprep.subr.bf16.mxu1 %v4678_v6  ;;  %v4680_v10 = vcombine.high %v987_v7, %v988_v8  ;;  %v989_v11 = vld [vmem:[#allocation5 + $0xc8] sm:$0xff]  ;;  %v4679_v13 = vcombine.low %v987_v7, %v988_v8  ;;  %664 = vmatprep.subr.bf16.mxu0 %v4646_v23  ;;  %v4648_v30 = vcombine.high %v462_v24, %v463_v25  ;;  %v464_v34 = vld [vmem:[#allocation5 + $0xc0] sm:$0xff] }
  0xad   : > { %v990_v12 = vld [vmem:[#allocation5 + $0xe8] sm:$0xff]  ;;  %v465_v35 = vld [vmem:[#allocation5 + $0xe0] sm:$0xff]  ;;  %v4647_v38 = vcombine.low %v462_v24, %v463_v25  ;;  %p5837_p13 = pneg %p5836_p8  ;;  %p5843_p9 = por %p5842_p7, %p5841_p3 }
  0xae   : > { %v4682_v16 = vcombine.high %v989_v11, %v990_v12  ;;  %v991_v21 = vld [vmem:[#allocation5 + $0x108] sm:$0xff]  ;;  %v4681_v26 = vcombine.low %v989_v11, %v990_v12  ;;  %v4650_v41 = vcombine.high %v464_v34, %v465_v35  ;;  %v466_v43 = vld [vmem:[#allocation5 + $0x100] sm:$0xff]  ;;  %v4649_v46 = vcombine.low %v464_v34, %v465_v35 }
  0xaf   : > { %1190 = vmatpush1.bf16.msra.mxu1 %v4677_v9  ;;  %v992_v22 = vld [vmem:[#allocation5 + $0x128] sm:$0xff]  ;;  %665 = vmatpush1.bf16.msra.mxu0 %v4645_v27  ;;  %v467_v44 = vld [vmem:[#allocation5 + $0x120] sm:$0xff]  ;;  %p5844_p12 = pnand %p5843_p9, %p5837_p13 }
  0xb0   : > { %1191 = vmatprep.subr.bf16.mxu1 %v4680_v10  ;;  %v4684_v28 = vcombine.high %v991_v21, %v992_v22  ;;  %v993_v29 = vld [vmem:[#allocation5 + $0x148] sm:$0xff]  ;;  %v4683_v37 = vcombine.low %v991_v21, %v992_v22  ;;  %666 = vmatprep.subr.bf16.mxu0 %v4648_v30  ;;  %v4652_v49 = vcombine.high %v466_v43, %v467_v44  ;;  %v468_v51 = vld [vmem:[#allocation5 + $0x140] sm:$0xff] }
  0xb1   : > { %v411_v31 = vld [vmem:[%s6193_s14 + $0x8] sm:$0xff]  ;;  %v469_v52 = vld [vmem:[#allocation5 + $0x160] sm:$0xff]  ;;  %v4651_v54 = vcombine.low %v466_v43, %v467_v44 }
  0xb2   : > { %v994_v33 = vld [vmem:[#allocation5 + $0x168] sm:$0xff]  ;;  %v6209_v36 = vpack.c.bf16 %v413_v32, %v411_v31  ;;  %v4654_v57 = vcombine.high %v468_v51, %v469_v52  ;;  %v470_v59 = vld [vmem:[#allocation5 + $0x180] sm:$0xff]  ;;  %v4653_v62 = vcombine.low %v468_v51, %v469_v52 }
  0xb3   : > { %1192 = vmatpush1.bf16.msra.mxu1 %v4679_v13  ;;  %v4686_v39 = vcombine.high %v993_v29, %v994_v33  ;;  %v995_v40 = vld [vmem:[#allocation5 + $0x188] sm:$0xff]  ;;  %v4685_v45 = vcombine.low %v993_v29, %v994_v33  ;;  %667 = vmatpush1.bf16.msra.mxu0 %v4647_v38  ;;  %v471_v60 = vld [vmem:[#allocation5 + $0x1a0] sm:$0xff] }
  0xb4   : > { %1193 = vmatprep.subr.bf16.mxu1 %v4682_v16  ;;  %v996_v42 = vld [vmem:[#allocation5 + $0x1a8] sm:$0xff]  ;;  %1219 = vmatprep.mubr.bf16.mxu1 %v6209_v36  ;;  %v4656_v1 = vcombine.high %v470_v59, %v471_v60  ;;  %v472_v3 = vld [vmem:[#allocation5 + $0x1c0] sm:$0xff]  ;;  %v4655_v6 = vcombine.low %v470_v59, %v471_v60  ;;  %v2055_v59 = vld [vmem:[#allocation5 + $0x30] sm:$0xff] }
  0xb5   : > { %694 = vmatprep.mubr.bf16.mxu0 %v6209_v36  ;;  %v4688_v47 = vcombine.high %v995_v40, %v996_v42  ;;  %v997_v48 = vld [vmem:[#allocation5 + $0x1c8] sm:$0xff]  ;;  %668 = vmatprep.subr.bf16.mxu0 %v4650_v41  ;;  %v4687_v53 = vcombine.low %v995_v40, %v996_v42  ;;  %v473_v4 = vld [vmem:[#allocation5 + $0x1e0] sm:$0xff] }
  0xb6   : > { %v998_v50 = vld [vmem:[#allocation5 + $0x1e8] sm:$0xff]  ;;  %v4658_v9 = vcombine.high %v472_v3, %v473_v4  ;;  %v474_v11 = vld [vmem:[#allocation5 + $0x200] sm:$0xff]  ;;  %v4657_v14 = vcombine.low %v472_v3, %v473_v4 }
  0xb7   : > { %1194 = vmatpush1.bf16.msra.mxu1 %v4681_v26  ;;  %669 = vmatpush1.bf16.msra.mxu0 %v4649_v46  ;;  %v4690_v55 = vcombine.high %v997_v48, %v998_v50  ;;  %v999_v56 = vld [vmem:[#allocation5 + $0x208] sm:$0xff]  ;;  %v4689_v61 = vcombine.low %v997_v48, %v998_v50  ;;  %v475_v12 = vld [vmem:[#allocation5 + $0x220] sm:$0xff] }
  0xb8   : > { %1195 = vmatprep.subr.bf16.mxu1 %v4684_v28  ;;  %670 = vmatprep.subr.bf16.mxu0 %v4652_v49  ;;  %v1000_v58 = vld [vmem:[#allocation5 + $0x228] sm:$0xff]  ;;  %v4660_v17 = vcombine.high %v474_v11, %v475_v12  ;;  %v476_v19 = vld [vmem:[#allocation5 + $0x240] sm:$0xff]  ;;  %v4659_v22 = vcombine.low %v474_v11, %v475_v12 }
  0xb9   : > { %v4692_v63 = vcombine.high %v999_v56, %v1000_v58  ;;  %v1001_v0 = vld [vmem:[#allocation5 + $0x248] sm:$0xff]  ;;  %v4691_v5 = vcombine.low %v999_v56, %v1000_v58  ;;  %v477_v20 = vld [vmem:[#allocation5 + $0x260] sm:$0xff]  ;;  %v2054_v58 = vld [vmem:[#allocation5 + $0x10] sm:$0xff] }
  0xba   : > { %v1002_v2 = vld [vmem:[#allocation5 + $0x268] sm:$0xff]  ;;  %v4662_v25 = vcombine.high %v476_v19, %v477_v20  ;;  %v478_v27 = vld [vmem:[#allocation5 + $0x280] sm:$0xff]  ;;  %v4661_v30 = vcombine.low %v476_v19, %v477_v20 }
  0xbb   : > { %1196 = vmatpush1.bf16.msra.mxu1 %v4683_v37  ;;  %671 = vmatpush1.bf16.msra.mxu0 %v4651_v54  ;;  %v4694_v7 = vcombine.high %v1001_v0, %v1002_v2  ;;  %v1003_v8 = vld [vmem:[#allocation5 + $0x288] sm:$0xff]  ;;  %v4693_v13 = vcombine.low %v1001_v0, %v1002_v2  ;;  %v479_v28 = vld [vmem:[#allocation5 + $0x2a0] sm:$0xff]  ;;  %v417_v2 = vld [vmem:[%s6193_s14 + $0x38] sm:$0xff] }
  0xbc   : > { %1197 = vmatprep.subr.bf16.mxu1 %v4686_v39  ;;  %672 = vmatprep.subr.bf16.mxu0 %v4654_v57  ;;  %v1004_v10 = vld [vmem:[#allocation5 + $0x2a8] sm:$0xff]  ;;  %v4664_v33 = vcombine.high %v478_v27, %v479_v28  ;;  %v480_v35 = vld [vmem:[#allocation5 + $0x2c0] sm:$0xff]  ;;  %v4663_v39 = vcombine.low %v478_v27, %v479_v28 }
  0xbd   : > { %v4696_v15 = vcombine.high %v1003_v8, %v1004_v10  ;;  %v1005_v16 = vld [vmem:[#allocation5 + $0x2c8] sm:$0xff]  ;;  %v4695_v21 = vcombine.low %v1003_v8, %v1004_v10  ;;  %v481_v37 = vld [vmem:[#allocation5 + $0x2e0] sm:$0xff]  ;;  %v2056_v8 = vld [vmem:[#allocation5 + $0x50] sm:$0xff] }
  0xbe   : > { %v1006_v18 = vld [vmem:[#allocation5 + $0x2e8] sm:$0xff]  ;;  %v4666_v43 = vcombine.high %v480_v35, %v481_v37  ;;  %v482_v44 = vld [vmem:[#allocation5 + $0x300] sm:$0xff]  ;;  %v4665_v49 = vcombine.low %v480_v35, %v481_v37  ;;  %v420_v37 = vld [vmem:[%s6193_s14 + $0x50] sm:$0xff] }
  0xbf   : > { %1198 = vmatpush1.bf16.msra.mxu1 %v4685_v45  ;;  %673 = vmatpush1.bf16.msra.mxu0 %v4653_v62  ;;  %v4698_v23 = vcombine.high %v1005_v16, %v1006_v18  ;;  %v1007_v24 = vld [vmem:[#allocation5 + $0x308] sm:$0xff]  ;;  %v4697_v29 = vcombine.low %v1005_v16, %v1006_v18  ;;  %v483_v45 = vld [vmem:[#allocation5 + $0x320] sm:$0xff]  ;;  %v2059_v16 = vld [vmem:[#allocation5 + $0xb0] sm:$0xff] }
  0xc0   : > { %1199 = vmatprep.subr.bf16.mxu1 %v4688_v47  ;;  %674 = vmatprep.subr.bf16.mxu0 %v4656_v1  ;;  %v1008_v26 = vld [vmem:[#allocation5 + $0x328] sm:$0xff]  ;;  %v4668_v51 = vcombine.high %v482_v44, %v483_v45  ;;  %v484_v52 = vld [vmem:[#allocation5 + $0x340] sm:$0xff]  ;;  %v416_v18 = vld [vmem:[%s6193_s14 + $0x30] sm:$0xff] }
  0xc1   : > { %v4700_v31 = vcombine.high %v1007_v24, %v1008_v26  ;;  %v1009_v32 = vld [vmem:[#allocation5 + $0x348] sm:$0xff]  ;;  %v4699_v38 = vcombine.low %v1007_v24, %v1008_v26  ;;  %v486_v56 = vld [vmem:[#allocation5 + $0x380] sm:$0xff]  ;;  %v2060_v24 = vld [vmem:[#allocation5 + $0xd0] sm:$0xff] }
  0xc2   : > { %v1010_v34 = vld [vmem:[#allocation5 + $0x368] sm:$0xff]  ;;  %v487_v57 = vld [vmem:[#allocation5 + $0x3a0] sm:$0xff] }
  0xc3   : > { %1200 = vmatpush1.bf16.msra.mxu1 %v4687_v53  ;;  %675 = vmatpush1.bf16.msra.mxu0 %v4655_v6  ;;  %v4702_v40 = vcombine.high %v1009_v32, %v1010_v34  ;;  %v1011_v41 = vld [vmem:[#allocation5 + $0x388] sm:$0xff]  ;;  %v4701_v46 = vcombine.low %v1009_v32, %v1010_v34  ;;  %v485_v53 = vld [vmem:[#allocation5 + $0x360] sm:$0xff]  ;;  %v4672_v4 = vcombine.high %v486_v56, %v487_v57  ;;  %v2063_v34 = vld [vmem:[#allocation5 + $0x130] sm:$0xff] }
  0xc4   : > { %1201 = vmatprep.subr.bf16.mxu1 %v4690_v55  ;;  %676 = vmatprep.subr.bf16.mxu0 %v4658_v9  ;;  %v1012_v42 = vld [vmem:[#allocation5 + $0x3a8] sm:$0xff]  ;;  %v4667_v55 = vcombine.low %v482_v44, %v483_v45  ;;  %v410_v62 = vld [vmem:[%s6193_s14] sm:$0xff]  ;;  %v4669_v3 = vcombine.low %v484_v52, %v485_v53  ;;  %v2057_v9 = vld [vmem:[#allocation5 + $0x70] sm:$0xff]  ;;  %v4671_v12 = vcombine.low %v486_v56, %v487_v57 }
  0xc5   : > { %v1013_v47 = vld [vmem:[#allocation5 + $0x3c8] sm:$0xff]  ;;  %v4704_v50 = vcombine.high %v1011_v41, %v1012_v42  ;;  %v4703_v54 = vcombine.low %v1011_v41, %v1012_v42  ;;  %v489_v6 = vld [vmem:[#allocation5 + $0x3e0] sm:$0xff]  ;;  %v4774_v19 = vcombine.high %v2056_v8, %v2057_v9  ;;  %v2065_v44 = vld [vmem:[#allocation5 + $0x170] sm:$0xff] }
  0xc6   : > { %v1014_v48 = vld [vmem:[#allocation5 + $0x3e8] sm:$0xff]  ;;  %v418_v35 = vld [vmem:[%s6193_s14 + $0x40] sm:$0xff] }
  0xc7   : > { %1202 = vmatpush1.bf16.msra.mxu1 %v4689_v61  ;;  %677 = vmatpush1.bf16.msra.mxu0 %v4657_v14  ;;  %v4706_v60 = vcombine.high %v1013_v47, %v1014_v48  ;;  %v4670_v61 = vcombine.high %v484_v52, %v485_v53  ;;  %v4705_v0 = vcombine.low %v1013_v47, %v1014_v48  ;;  %v415_v1 = vld [vmem:[%s6193_s14 + $0x28] sm:$0xff]  ;;  %v5135_v41 = vld [vmem:[#allocation8 + $0x110] ss:$8 sps:$4 sm:$0xff]   ;;  %v2066_v52 = vld [vmem:[#allocation5 + $0x190] sm:$0xff] }
  0xc8   : > { %1203 = vmatprep.subr.bf16.mxu1 %v4692_v63  ;;  %678 = vmatprep.subr.bf16.mxu0 %v4660_v17  ;;  %v412_v63 = vld [vmem:[%s6193_s14 + $0x10] sm:$0xff]  ;;  %v6219_v11 = vpack.c.bf16 %v417_v2, %v415_v1  ;;  %v4771_v14 = vcombine.low %v2054_v58, %v2055_v59  ;;  %v414_v17 = vld [vmem:[%s6193_s14 + $0x20] sm:$0xff]  ;;  %v419_v20 = vld [vmem:[%s6193_s14 + $0x48] sm:$0xff]  ;;  %v6239_v47 = vpack.c.bf16 %v420_v37, %v418_v35 }
  0xc9   : > { %v6217_v10 = vpack.c.bf16 %v412_v63, %v410_v62  ;;  %v5134_v26 = vld [vmem:[#allocation8 + $0x104] ss:$8 sps:$4 sm:$0xff]   ;;  %v6227_v28 = vpack.c.bf16 %v416_v18, %v414_v17  ;;  %v5138_v48 = vld [vmem:[#allocation8 + $0x120] ss:$8 sps:$4 sm:$0xff]   ;;  %v5153_v35 = vld [vmem:[#allocation8 + $0x170] ss:$8 sps:$4 sm:$0xff]  }
  0xca   : > { %v5140_v45 = vld [vmem:[#allocation8 + $0x124] ss:$8 sps:$4 sm:$0xff]   ;;  %v5144_v2 = vld [vmem:[#allocation8 + $0x140] ss:$8 sps:$4 sm:$0xff]  }
  0xcb   : > { %1204 = vmatpush1.bf16.msra.mxu1 %v4691_v5  ;;  %679 = vmatpush1.bf16.msra.mxu0 %v4659_v22  ;;  %v488_v5 = vld [vmem:[#allocation5 + $0x3c0] sm:$0xff]  ;;  %v2067_v53 = vld [vmem:[#allocation5 + $0x1b0] sm:$0xff]  ;;  %v427_v57 = vld [vmem:[%s6193_s14 + $0x88] sm:$0xff] }
  0xcc   : > { %1205 = vmatprep.subr.bf16.mxu1 %v4694_v7  ;;  %680 = vmatprep.subr.bf16.mxu0 %v4662_v25  ;;  %v4772_v7 = vcombine.high %v2054_v58, %v2055_v59  ;;  %v4673_v22 = vcombine.low %v488_v5, %v489_v6  ;;  %v2061_v25 = vld [vmem:[#allocation5 + $0xf0] sm:$0xff]  ;;  %v429_v58 = vld [vmem:[%s6193_s14 + $0x98] sm:$0xff] }
  0xcd   : > { %v4777_v42 = vcombine.low %v2060_v24, %v2061_v25  ;;  %v5141_v59 = vld [vmem:[#allocation8 + $0x130] ss:$8 sps:$4 sm:$0xff]   ;;  %v2069_v62 = vld [vmem:[#allocation5 + $0x1f0] sm:$0xff] }
  0xce   : > { %v5146_v63 = vld [vmem:[#allocation8 + $0x144] ss:$8 sps:$4 sm:$0xff]  }
  0xcf   : > { %1206 = vmatpush1.bf16.msra.mxu1 %v4693_v13  ;;  %681 = vmatpush1.bf16.msra.mxu0 %v4661_v30  ;;  %v4674_v13 = vcombine.high %v488_v5, %v489_v6  ;;  %v4783_v5 = vcombine.low %v2066_v52, %v2067_v53  ;;  %v2070_v6 = vld [vmem:[#allocation5 + $0x210] sm:$0xff] }
  0xd0   : > { %1207 = vmatprep.subr.bf16.mxu1 %v4696_v15  ;;  %682 = vmatprep.subr.bf16.mxu0 %v4664_v33  ;;  %v2058_v15 = vld [vmem:[#allocation5 + $0x90] sm:$0xff] }
  0xd1   : > { %v4776_v27 = vcombine.high %v2058_v15, %v2059_v16  ;;  %v4775_v32 = vcombine.low %v2058_v15, %v2059_v16  ;;  %v2062_v33 = vld [vmem:[#allocation5 + $0x110] sm:$0xff]  ;;  %v5147_v15 = vld [vmem:[#allocation8 + $0x150] ss:$8 sps:$4 sm:$0xff]  }
  0xd2   : > { %v2072_v17 = vld [vmem:[#allocation5 + $0x250] sm:$0xff] }
  0xd3   : > { %1208 = vmatpush1.bf16.msra.mxu1 %v4695_v21  ;;  %683 = vmatpush1.bf16.msra.mxu0 %v4663_v39  ;;  %v421_v21 = vld [vmem:[%s6193_s14 + $0x58] sm:$0xff]  ;;  %v423_v39 = vld [vmem:[%s6193_s14 + $0x68] sm:$0xff]  ;;  %v2073_v18 = vld [vmem:[#allocation5 + $0x270] sm:$0xff] }
  0xd4   : > { %1209 = vmatprep.subr.bf16.mxu1 %v4698_v23  ;;  %684 = vmatprep.subr.bf16.mxu0 %v4666_v43  ;;  %v4773_v23 = vcombine.low %v2056_v8, %v2057_v9  ;;  %v6229_v30 = vpack.c.bf16 %v421_v21, %v419_v20  ;;  %v2064_v43 = vld [vmem:[#allocation5 + $0x150] sm:$0xff]  ;;  %v426_v8 = vld [vmem:[%s6193_s14 + $0x80] sm:$0xff] }
  0xd5   : > { %v4782_v56 = vcombine.high %v2064_v43, %v2065_v44  ;;  %v428_v9 = vld [vmem:[%s6193_s14 + $0x90] sm:$0xff] }
  0xd6   : > { %v6263_v21 = vpack.c.bf16 %v428_v9, %v426_v8  ;;  %v5158_v37 = vld [vmem:[#allocation8 + $0x184] ss:$8 sps:$4 sm:$0xff]  }
  0xd7   : > { %1210 = vmatpush1.bf16.msra.mxu1 %v4697_v29  ;;  %685 = vmatpush1.bf16.msra.mxu0 %v4665_v49  ;;  %v5132_v29 = vld [vmem:[#allocation8 + $0x100] ss:$8 sps:$4 sm:$0xff]  }
  0xd8   : > { %1211 = vmatprep.subr.bf16.mxu1 %v4700_v31  ;;  %686 = vmatprep.subr.bf16.mxu0 %v4668_v51  ;;  %v5137_v31 = vld [vmem:[#allocation8 + $0x114] ss:$8 sps:$4 sm:$0xff]   ;;  %v4779_v51 = vcombine.low %v2062_v33, %v2063_v34 }
  0xdb   : > { %1212 = vmatpush1.bf16.msra.mxu1 %v4699_v38  ;;  %687 = vmatpush1.bf16.msra.mxu0 %v4667_v55  ;;  %v4778_v38 = vcombine.high %v2060_v24, %v2061_v25  ;;  %v424_v55 = vld [vmem:[%s6193_s14 + $0x70] sm:$0xff]  ;;  %v5155_v24 = vld [vmem:[#allocation8 + $0x174] ss:$8 sps:$4 sm:$0xff]  }
  0xdc   : > { %1213 = vmatprep.subr.bf16.mxu1 %v4702_v40  ;;  %688 = vmatprep.subr.bf16.mxu0 %v4670_v61  ;;  %v425_v40 = vld [vmem:[%s6193_s14 + $0x78] sm:$0xff]  ;;  %v2068_v61 = vld [vmem:[#allocation5 + $0x1d0] sm:$0xff] }
  0xdd   : > { %v6241_v49 = vpack.c.bf16 %v425_v40, %v423_v39  ;;  %v4785_v16 = vcombine.low %v2068_v61, %v2069_v62  ;;  %v2076_v39 = vld [vmem:[#allocation5 + $0x2d0] sm:$0xff] }
  0xde   : > { %v2077_v40 = vld [vmem:[#allocation5 + $0x2f0] sm:$0xff] }
  0xdf   : > { %1214 = vmatpush1.bf16.msra.mxu1 %v4701_v46  ;;  %689 = vmatpush1.bf16.msra.mxu0 %v4669_v3  ;;  %v4780_v46 = vcombine.high %v2062_v33, %v2063_v34  ;;  %v6253_v3 = vpack.c.bf16 %v429_v58, %v427_v57  ;;  %v435_v33 = vld [vmem:[%s6193_s14 + $0xc8] sm:$0xff]  ;;  %v437_v34 = vld [vmem:[%s6193_s14 + $0xd8] sm:$0xff]  ;;  %v4793_v57 = vcombine.low %v2076_v39, %v2077_v40  ;;  %v2080_v58 = vld [vmem:[#allocation5 + $0x350] sm:$0xff] }
  0xe0   : > { %1215 = vmatprep.subr.bf16.mxu1 %v4704_v50  ;;  %690 = vmatprep.subr.bf16.mxu0 %v4672_v4  ;;  %v5143_v50 = vld [vmem:[#allocation8 + $0x134] ss:$8 sps:$4 sm:$0xff]  }
  0xe1   : > { %v5149_v4 = vld [vmem:[#allocation8 + $0x154] ss:$8 sps:$4 sm:$0xff]  }
  0xe3   : > { %1216 = vmatpush1.bf16.msra.mxu1 %v4703_v54  ;;  %691 = vmatpush1.bf16.msra.mxu0 %v4671_v12  ;;  %v422_v54 = vld [vmem:[%s6193_s14 + $0x60] sm:$0xff]  ;;  %v4786_v12 = vcombine.high %v2068_v61, %v2069_v62 }
  0xe4   : > { %1217 = vmatprep.subr.bf16.mxu1 %v4706_v60  ;;  %692 = vmatprep.subr.bf16.mxu0 %v4674_v13  ;;  %v4781_v60 = vcombine.low %v2064_v43, %v2065_v44  ;;  %v6251_v1 = vpack.c.bf16 %v424_v55, %v422_v54  ;;  %v431_v13 = vld [vmem:[%s6193_s14 + $0xa8] sm:$0xff]  ;;  %v6277_v44 = vpack.c.bf16 %v437_v34, %v435_v33  ;;  %v441_v55 = vld [vmem:[%s6193_s14 + $0xf8] sm:$0xff] }
  0xe5   : > { %v5156_v43 = vld [vmem:[#allocation8 + $0x180] ss:$8 sps:$4 sm:$0xff]   ;;  %v2891_v33 = vld [vmem:[#allocation5 + $0xf8] sm:$0xff] }
  0xe6   : > { %v439_v54 = vld [vmem:[%s6193_s14 + $0xe8] sm:$0xff] }
  0xe7   : > { %1218 = vmatpush1.bf16.msra.mxu1 %v4705_v0  ;;  %693 = vmatpush1.bf16.msra.mxu0 %v4673_v22  ;;  %v4784_v0 = vcombine.high %v2066_v52, %v2067_v53  ;;  %v5150_v22 = vld [vmem:[#allocation8 + $0x160] ss:$8 sps:$4 sm:$0xff]   ;;  %v4794_v53 = vcombine.high %v2076_v39, %v2077_v40  ;;  %v6289_v62 = vpack.c.bf16 %v441_v55, %v439_v54  ;;  %v2898_v54 = vld [vmem:[#allocation5 + $0x1d8] sm:$0xff] }
  0xe8   : > { %2258 = vmatprep.subr.bf16.mxu1 %v4772_v7  ;;  %1668 = vmatprep.subr.bf16.mxu0 %v5134_v26  ;;  %v2071_v7 = vld [vmem:[#allocation5 + $0x230] sm:$0xff]  ;;  %v2899_v55 = vld [vmem:[#allocation5 + $0x1f8] sm:$0xff] }
  0xe9   : > { %v4788_v20 = vcombine.high %v2070_v6, %v2071_v7  ;;  %v4787_v25 = vcombine.low %v2070_v6, %v2071_v7  ;;  %v2074_v26 = vld [vmem:[#allocation5 + $0x290] sm:$0xff] }
  0xea   : > { %1220 = vmatmul.mubr.bf16.vlgmr.msra.gmra.mrb[0].mxu1 %v6217_v10  ;;  %695 = vmatmul.mubr.bf16.vlgmr.msra.gmra.mrb[0].mxu0 %v6217_v10  ;;  %v436_v52 = vld [vmem:[%s6193_s14 + $0xd0] sm:$0xff] }
  0xeb   : > { %1229 = vmatprep.mubr.bf16.mxu1 %v6219_v11  ;;  %2259 = vmatpush1.bf16.msra.mxu1 %v4771_v14  ;;  %v433_v14 = vld [vmem:[%s6193_s14 + $0xb8] sm:$0xff]  ;;  %v440_v6 = vld [vmem:[%s6193_s14 + $0xf0] sm:$0xff] }
  0xec   : > { %2260 = vmatprep.subr.bf16.mxu1 %v4774_v19  ;;  %704 = vmatprep.mubr.bf16.mxu0 %v6219_v11  ;;  %v5152_v19 = vld [vmem:[#allocation8 + $0x164] ss:$8 sps:$4 sm:$0xff]  }
  0xed   : > { %1669 = vmatpush1.bf16.msra.mxu0 %v5132_v29  ;;  %v430_v29 = vld [vmem:[%s6193_s14 + $0xa0] sm:$0xff] }
  0xee   : > { %1670 = vmatprep.subr.bf16.mxu0 %v5137_v31  ;;  %v432_v31 = vld [vmem:[%s6193_s14 + $0xb0] sm:$0xff] }
  0xef   : > { %2261 = vmatpush1.bf16.msra.mxu1 %v4773_v23  ;;  %v6265_v23 = vpack.c.bf16 %v433_v14, %v431_v13  ;;  %v2085_v13 = vld [vmem:[#allocation5 + $0x3f0] sm:$0xff] }
  0xf0   : > { %2262 = vmatprep.subr.bf16.mxu1 %v4776_v27  ;;  %v2075_v27 = vld [vmem:[#allocation5 + $0x2b0] sm:$0xff] }
  0xf1   : > { %1671 = vmatpush1.bf16.msra.mxu0 %v5135_v41  ;;  %v4792_v41 = vcombine.high %v2074_v26, %v2075_v27 }
  0xf2   : > { %1230 = vmatmul.mubr.bf16.gmra.mrb[4].mxu1 %v6227_v28  ;;  %1672 = vmatprep.subr.bf16.mxu0 %v5140_v45  ;;  %v5161_v45 = vld [vmem:[#allocation8 + $0x194] ss:$8 sps:$4 sm:$0xff]  }
  0xf3   : > { %1239 = vmatprep.mubr.bf16.mxu1 %v6229_v30  ;;  %2263 = vmatpush1.bf16.msra.mxu1 %v4775_v32  ;;  %v4790_v32 = vcombine.high %v2072_v17, %v2073_v18 }
  0xf4   : > { %2264 = vmatprep.subr.bf16.mxu1 %v4778_v38  ;;  %705 = vmatmul.mubr.bf16.gmra.mrb[4].mxu0 %v6227_v28  ;;  %v4789_v38 = vcombine.low %v2072_v17, %v2073_v18  ;;  %v2885_v17 = vld [vmem:[#allocation5 + $0x38] sm:$0xff] }
  0xf5   : > { %714 = vmatprep.mubr.bf16.mxu0 %v6229_v30  ;;  %1673 = vmatpush1.bf16.msra.mxu0 %v5138_v48  ;;  %v2078_v48 = vld [vmem:[#allocation5 + $0x310] sm:$0xff] }
  0xf6   : > { %1674 = vmatprep.subr.bf16.mxu0 %v5143_v50  ;;  %v2079_v50 = vld [vmem:[#allocation5 + $0x330] sm:$0xff] }
  0xf7   : > { %2265 = vmatpush1.bf16.msra.mxu1 %v4777_v42  ;;  %v6275_v42 = vpack.c.bf16 %v432_v31, %v430_v29 }
  0xf8   : > { %2266 = vmatprep.subr.bf16.mxu1 %v4780_v46  ;;  %v4791_v46 = vcombine.low %v2074_v26, %v2075_v27  ;;  %v2888_v26 = vld [vmem:[#allocation5 + $0x98] sm:$0xff] }
  0xf9   : > { %1675 = vmatpush1.bf16.msra.mxu0 %v5141_v59  ;;  %v2081_v59 = vld [vmem:[#allocation5 + $0x370] sm:$0xff]  ;;  %v2889_v27 = vld [vmem:[#allocation5 + $0xb8] sm:$0xff] }
  0xfa   : > { %1240 = vmatmul.mubr.bf16.gmra.mrb[8].mxu1 %v6239_v47  ;;  %1676 = vmatprep.subr.bf16.mxu0 %v5146_v63  ;;  %v4795_v63 = vcombine.low %v2078_v48, %v2079_v50  ;;  %v4797_v7 = vcombine.low %v2080_v58, %v2081_v59  ;;  %v4840_v31 = vcombine.high %v2888_v26, %v2889_v27 }
  0xfb   : > { %1249 = vmatprep.mubr.bf16.mxu1 %v6241_v49  ;;  %2267 = vmatpush1.bf16.msra.mxu1 %v4779_v51  ;;  %v434_v51 = vld [vmem:[%s6193_s14 + $0xc0] sm:$0xff]  ;;  %v4839_v34 = vcombine.low %v2888_v26, %v2889_v27 }
  0xfc   : > { %2268 = vmatprep.subr.bf16.mxu1 %v4782_v56  ;;  %715 = vmatmul.mubr.bf16.gmra.mrb[8].mxu0 %v6239_v47  ;;  %v5159_v56 = vld [vmem:[#allocation8 + $0x190] ss:$8 sps:$4 sm:$0xff]   ;;  %v6287_v61 = vpack.c.bf16 %v436_v52, %v434_v51 }
  0xfd   : > { %724 = vmatprep.mubr.bf16.mxu0 %v6241_v49  ;;  %1677 = vmatpush1.bf16.msra.mxu0 %v5144_v2  ;;  %v2082_v2 = vld [vmem:[#allocation5 + $0x390] sm:$0xff] }
  0xfe   : > { %1678 = vmatprep.subr.bf16.mxu0 %v5149_v4  ;;  %v2083_v4 = vld [vmem:[#allocation5 + $0x3b0] sm:$0xff] }
  0xff   : > { %2269 = vmatpush1.bf16.msra.mxu1 %v4781_v60  ;;  %v4796_v60 = vcombine.high %v2078_v48, %v2079_v50  ;;  %v4800_v8 = vcombine.high %v2082_v2, %v2083_v4  ;;  %v4799_v14 = vcombine.low %v2082_v2, %v2083_v4  ;;  %v2896_v48 = vld [vmem:[#allocation5 + $0x198] sm:$0xff]  ;;  %v4849_v2 = vcombine.low %v2898_v54, %v2899_v55 }
 0x100   : > { %2270 = vmatprep.subr.bf16.mxu1 %v4784_v0  ;;  %v4798_v0 = vcombine.high %v2080_v58, %v2081_v59  ;;  %v2897_v50 = vld [vmem:[#allocation5 + $0x1b8] sm:$0xff]  ;;  %v4850_v58 = vcombine.high %v2898_v54, %v2899_v55 }
 0x101   : > { %1679 = vmatpush1.bf16.msra.mxu0 %v5147_v15  ;;  %v4848_v52 = vcombine.high %v2896_v48, %v2897_v50  ;;  %v5167_v59 = vld [vmem:[#allocation8 + $0x1b4] ss:$8 sps:$4 sm:$0xff]  }
 0x102   : > { %1250 = vmatmul.mubr.bf16.gmra.mrb[12].mxu1 %v6251_v1  ;;  %1680 = vmatprep.subr.bf16.mxu0 %v5152_v19 }
 0x103   : > { %1259 = vmatprep.mubr.bf16.mxu1 %v6253_v3  ;;  %2271 = vmatpush1.bf16.msra.mxu1 %v4783_v5  ;;  %v438_v5 = vld [vmem:[%s6193_s14 + $0xe0] sm:$0xff] }
 0x104   : > { %2272 = vmatprep.subr.bf16.mxu1 %v4786_v12  ;;  %725 = vmatmul.mubr.bf16.gmra.mrb[12].mxu0 %v6251_v1  ;;  %v6297_v9 = vpack.c.bf16 %v440_v6, %v438_v5  ;;  %v2084_v12 = vld [vmem:[#allocation5 + $0x3d0] sm:$0xff]  ;;  %v2902_v6 = vld [vmem:[#allocation5 + $0x258] sm:$0xff] }
 0x105   : > { %734 = vmatprep.mubr.bf16.mxu0 %v6253_v3  ;;  %1681 = vmatpush1.bf16.msra.mxu0 %v5150_v22  ;;  %v4802_v15 = vcombine.high %v2084_v12, %v2085_v13  ;;  %v4801_v18 = vcombine.low %v2084_v12, %v2085_v13  ;;  %v2887_v22 = vld [vmem:[#allocation5 + $0x78] sm:$0xff]  ;;  %v5170_v5 = vld [vmem:[#allocation8 + $0x1c4] ss:$8 sps:$4 sm:$0xff]  }
 0x106   : > { %1682 = vmatprep.subr.bf16.mxu0 %v5155_v24 }
 0x107   : > { %2273 = vmatpush1.bf16.msra.mxu1 %v4785_v16  ;;  %v2884_v16 = vld [vmem:[#allocation5 + $0x18] sm:$0xff] }
 0x108   : > { %2274 = vmatprep.subr.bf16.mxu1 %v4788_v20  ;;  %v4836_v19 = vcombine.high %v2884_v16, %v2885_v17  ;;  %v2886_v20 = vld [vmem:[#allocation5 + $0x58] sm:$0xff]  ;;  %v4835_v24 = vcombine.low %v2884_v16, %v2885_v17 }
 0x109   : > { %1683 = vmatpush1.bf16.msra.mxu0 %v5153_v35  ;;  %v4837_v29 = vcombine.low %v2886_v20, %v2887_v22  ;;  %v2905_v16 = vld [vmem:[#allocation5 + $0x2b8] sm:$0xff] }
 0x10a   : > { %1260 = vmatmul.mubr.bf16.gmra.mrb[16].mxu1 %v6263_v21  ;;  %1684 = vmatprep.subr.bf16.mxu0 %v5158_v37  ;;  %v2892_v37 = vld [vmem:[#allocation5 + $0x118] sm:$0xff] }
 0x10b   : > { %1269 = vmatprep.mubr.bf16.mxu1 %v6265_v23  ;;  %2275 = vmatpush1.bf16.msra.mxu1 %v4787_v25  ;;  %v4838_v25 = vcombine.high %v2886_v20, %v2887_v22  ;;  %v5171_v17 = vld [vmem:[#allocation8 + $0x1d0] ss:$8 sps:$4 sm:$0xff]   ;;  %v5176_v20 = vld [vmem:[#allocation8 + $0x1e4] ss:$8 sps:$4 sm:$0xff]  }
 0x10c   : > { %2276 = vmatprep.subr.bf16.mxu1 %v4790_v32  ;;  %735 = vmatmul.mubr.bf16.gmra.mrb[16].mxu0 %v6263_v21  ;;  %v2890_v32 = vld [vmem:[#allocation5 + $0xd8] sm:$0xff] }
 0x10d   : > { %744 = vmatprep.mubr.bf16.mxu0 %v6265_v23  ;;  %1685 = vmatpush1.bf16.msra.mxu0 %v5156_v43  ;;  %v4842_v35 = vcombine.high %v2890_v32, %v2891_v33  ;;  %v4841_v39 = vcombine.low %v2890_v32, %v2891_v33  ;;  %v2895_v43 = vld [vmem:[#allocation5 + $0x178] sm:$0xff] }
 0x10e   : > { %1686 = vmatprep.subr.bf16.mxu0 %v5161_v45  ;;  %v2906_v22 = vld [vmem:[#allocation5 + $0x2d8] sm:$0xff] }
 0x10f   : > { %2277 = vmatpush1.bf16.msra.mxu1 %v4789_v38  ;;  %v2893_v38 = vld [vmem:[#allocation5 + $0x138] sm:$0xff] }
 0x110   : > { %2278 = vmatprep.subr.bf16.mxu1 %v4792_v41  ;;  %v4844_v40 = vcombine.high %v2892_v37, %v2893_v38  ;;  %v2894_v41 = vld [vmem:[#allocation5 + $0x158] sm:$0xff]  ;;  %v4843_v45 = vcombine.low %v2892_v37, %v2893_v38 }
 0x111   : > { %1687 = vmatpush1.bf16.msra.mxu0 %v5159_v56  ;;  %v4845_v51 = vcombine.low %v2894_v41, %v2895_v43  ;;  %v5162_v56 = vld [vmem:[#allocation8 + $0x1a0] ss:$8 sps:$4 sm:$0xff]   ;;  %v5179_v32 = vld [vmem:[#allocation8 + $0x1f4] ss:$8 sps:$4 sm:$0xff]   ;;  %v5177_v33 = vld [vmem:[#allocation8 + $0x1f0] ss:$8 sps:$4 sm:$0xff]  }
 0x112   : > { %1270 = vmatmul.mubr.bf16.gmra.mrb[20].mxu1 %v6275_v42  ;;  %v2910_v37 = vld [vmem:[#allocation5 + $0x358] sm:$0xff] }
 0x113   : > { %1279 = vmatprep.mubr.bf16.mxu1 %v6277_v44  ;;  %2279 = vmatpush1.bf16.msra.mxu1 %v4791_v46  ;;  %v4846_v46 = vcombine.high %v2894_v41, %v2895_v43  ;;  %v2911_v38 = vld [vmem:[#allocation5 + $0x378] sm:$0xff] }
 0x114   : > { %2280 = vmatprep.subr.bf16.mxu1 %v4794_v53  ;;  %745 = vmatmul.mubr.bf16.gmra.mrb[20].mxu0 %v6275_v42  ;;  %v5164_v53 = vld [vmem:[#allocation8 + $0x1a4] ss:$8 sps:$4 sm:$0xff]   ;;  %v4862_v41 = vcombine.high %v2910_v37, %v2911_v38  ;;  %v2912_v43 = vld [vmem:[#allocation5 + $0x398] sm:$0xff] }
 0x115   : > { %754 = vmatprep.mubr.bf16.mxu0 %v6277_v44  ;;  %1688 = vmatprep.subr.bf16.mxu0 %v5164_v53 }
 0x116   : > { %1689 = vmatpush1.bf16.msra.mxu0 %v5162_v56 }
 0x117   : > { %2281 = vmatpush1.bf16.msra.mxu1 %v4793_v57  ;;  %v4847_v57 = vcombine.low %v2896_v48, %v2897_v50  ;;  %1690 = vmatprep.subr.bf16.mxu0 %v5167_v59  ;;  %v2914_v50 = vld [vmem:[#allocation5 + $0x3d8] sm:$0xff] }
 0x118   : > { %2282 = vmatprep.subr.bf16.mxu1 %v4796_v60  ;;  %v2900_v60 = vld [vmem:[#allocation5 + $0x218] sm:$0xff] }
 0x11a   : > { %1280 = vmatmul.mubr.bf16.gmra.mrb[24].mxu1 %v6287_v61 }
 0x11b   : > { %1289 = vmatprep.mubr.bf16.mxu1 %v6289_v62  ;;  %2283 = vmatpush1.bf16.msra.mxu1 %v4795_v63  ;;  %v2901_v63 = vld [vmem:[#allocation5 + $0x238] sm:$0xff] }
 0x11c   : > { %2284 = vmatprep.subr.bf16.mxu1 %v4798_v0  ;;  %755 = vmatmul.mubr.bf16.gmra.mrb[24].mxu0 %v6287_v61  ;;  %v5165_v0 = vld [vmem:[#allocation8 + $0x1b0] ss:$8 sps:$4 sm:$0xff]   ;;  %v4852_v4 = vcombine.high %v2900_v60, %v2901_v63  ;;  %v4851_v12 = vcombine.low %v2900_v60, %v2901_v63 }
 0x11d   : > { %764 = vmatprep.mubr.bf16.mxu0 %v6289_v62  ;;  %1691 = vmatpush1.bf16.msra.mxu0 %v5165_v0 }
 0x11e   : > { %1692 = vmatprep.subr.bf16.mxu0 %v5170_v5 }
 0x11f   : > { %2285 = vmatpush1.bf16.msra.mxu1 %v4797_v7  ;;  %v2903_v7 = vld [vmem:[#allocation5 + $0x278] sm:$0xff] }
 0x120   : > { %2286 = vmatprep.subr.bf16.mxu1 %v4800_v8  ;;  %v5168_v8 = vld [vmem:[#allocation8 + $0x1c0] ss:$8 sps:$4 sm:$0xff]   ;;  %v4854_v13 = vcombine.high %v2902_v6, %v2903_v7 }
 0x121   : > { %1693 = vmatpush1.bf16.msra.mxu0 %v5168_v8 }
 0x122   : > { %1290 = vmatmul.mubr.bf16.gmra.mrb[28].mxu1 %v6297_v9 }
 0x123   : > { %2290 = vmatprep.mubr.bf16.mxu1 %v6209_v36  ;;  %2287 = vmatpush1.bf16.msra.mxu1 %v4799_v14  ;;  %v5173_v14 = vld [vmem:[#allocation8 + $0x1d4] ss:$8 sps:$4 sm:$0xff]  }
 0x124   : > { %2288 = vmatprep.subr.bf16.mxu1 %v4802_v15  ;;  %765 = vmatmul.mubr.bf16.gmra.mrb[28].mxu0 %v6297_v9  ;;  %v2904_v15 = vld [vmem:[#allocation5 + $0x298] sm:$0xff] }
 0x125   : > { %1694 = vmatprep.subr.bf16.mxu0 %v5173_v14  ;;  %v4855_v26 = vcombine.low %v2904_v15, %v2905_v16 }
 0x126   : > { %1695 = vmatpush1.bf16.msra.mxu0 %v5171_v17 }
 0x127   : > { %2289 = vmatpush1.bf16.msra.mxu1 %v4801_v18  ;;  %v4853_v18 = vcombine.low %v2902_v6, %v2903_v7  ;;  %1696 = vmatprep.subr.bf16.mxu0 %v5176_v20 }
 0x128   : > { %3088 = vmatprep.subr.bf16.mxu1 %v4836_v19  ;;  %v4856_v19 = vcombine.high %v2904_v15, %v2905_v16 }
 0x12a   : > { %2291 = vmatmul.mubr.bf16.vlgmr.msra.gmra.mrb[32].mxu1 %v6217_v10 }
 0x12b   : > { %3089 = vmatpush1.bf16.msra.mxu1 %v4835_v24  ;;  %2300 = vmatprep.mubr.bf16.mxu1 %v6219_v11  ;;  %v2907_v24 = vld [vmem:[#allocation5 + $0x2f8] sm:$0xff] }
 0x12c   : > { %3090 = vmatprep.subr.bf16.mxu1 %v4838_v25  ;;  %v5174_v25 = vld [vmem:[#allocation8 + $0x1e0] ss:$8 sps:$4 sm:$0xff]   ;;  %v4858_v27 = vcombine.high %v2906_v22, %v2907_v24 }
 0x12d   : > { %1697 = vmatpush1.bf16.msra.mxu0 %v5174_v25 }
 0x12e   : > { %1698 = vmatprep.subr.bf16.mxu0 %v5179_v32 }
 0x12f   : > { %3091 = vmatpush1.bf16.msra.mxu1 %v4837_v29  ;;  %v2908_v29 = vld [vmem:[#allocation5 + $0x318] sm:$0xff] }
 0x130   : > { %3092 = vmatprep.subr.bf16.mxu1 %v4840_v31  ;;  %v2909_v31 = vld [vmem:[#allocation5 + $0x338] sm:$0xff] }
 0x131   : > { %1699 = vmatpush1.bf16.msra.mxu0 %v5177_v33 }
 0x132   : > { %2301 = vmatmul.mubr.bf16.gmra.mrb[36].mxu1 %v6227_v28 }
 0x133   : > { %3093 = vmatpush1.bf16.msra.mxu1 %v4839_v34  ;;  %2310 = vmatprep.mubr.bf16.mxu1 %v6229_v30  ;;  %v4857_v34 = vcombine.low %v2906_v22, %v2907_v24 }
 0x134   : > { %3094 = vmatprep.subr.bf16.mxu1 %v4842_v35  ;;  %v4860_v35 = vcombine.high %v2908_v29, %v2909_v31 }
 0x137   : > { %3095 = vmatpush1.bf16.msra.mxu1 %v4841_v39  ;;  %v5182_v39 = vld [vmem:[#allocation8 + $0x4] ss:$8 sps:$4 sm:$0xff]  }
 0x138   : > { %3096 = vmatprep.subr.bf16.mxu1 %v4844_v40  ;;  %v4859_v40 = vcombine.low %v2908_v29, %v2909_v31  ;;  %1941 = vmatprep.subr.bf16.mxu0 %v5182_v39 }
 0x13a   : > { %2311 = vmatmul.mubr.bf16.gmra.mrb[40].mxu1 %v6239_v47 }
 0x13b   : > { %3097 = vmatpush1.bf16.msra.mxu1 %v4843_v45  ;;  %2320 = vmatprep.mubr.bf16.mxu1 %v6241_v49  ;;  %v2913_v45 = vld [vmem:[#allocation5 + $0x3b8] sm:$0xff] }
 0x13c   : > { %3098 = vmatprep.subr.bf16.mxu1 %v4846_v46  ;;  %v4861_v46 = vcombine.low %v2910_v37, %v2911_v38  ;;  %v4864_v48 = vcombine.high %v2912_v43, %v2913_v45 }
 0x13f   : > { %3099 = vmatpush1.bf16.msra.mxu1 %v4845_v51  ;;  %v2915_v51 = vld [vmem:[#allocation5 + $0x3f8] sm:$0xff] }
 0x140   : > { %3100 = vmatprep.subr.bf16.mxu1 %v4848_v52  ;;  %v4863_v52 = vcombine.low %v2912_v43, %v2913_v45  ;;  %v4866_v53 = vcombine.high %v2914_v50, %v2915_v51  ;;  %v4865_v54 = vcombine.low %v2914_v50, %v2915_v51 }
 0x142   : > { %2321 = vmatmul.mubr.bf16.gmra.mrb[44].mxu1 %v6251_v1 }
 0x143   : > { %3101 = vmatpush1.bf16.msra.mxu1 %v4847_v57  ;;  %2330 = vmatprep.mubr.bf16.mxu1 %v6253_v3 }
 0x144   : > { %3102 = vmatprep.subr.bf16.mxu1 %v4850_v58 }
 0x147   : > { %3103 = vmatpush1.bf16.msra.mxu1 %v4849_v2 }
 0x148   : > { %3104 = vmatprep.subr.bf16.mxu1 %v4852_v4 }
 0x14a   : > { %2331 = vmatmul.mubr.bf16.gmra.mrb[48].mxu1 %v6263_v21 }
 0x14b   : > { %3105 = vmatpush1.bf16.msra.mxu1 %v4851_v12  ;;  %2340 = vmatprep.mubr.bf16.mxu1 %v6265_v23 }
 0x14c   : > { %3106 = vmatprep.subr.bf16.mxu1 %v4854_v13  ;;  %v6358_v13 = vld [vmem:[#allocation7 + $0x4] sm:$0x3] }
 0x14f   : > { %3107 = vmatpush1.bf16.msra.mxu1 %v4853_v18 }
 0x150   : > { %3108 = vmatprep.subr.bf16.mxu1 %v4856_v19 }
 0x152   : > { %2341 = vmatmul.mubr.bf16.gmra.mrb[52].mxu1 %v6275_v42 }
 0x153   : > { %3109 = vmatpush1.bf16.msra.mxu1 %v4855_v26  ;;  %2350 = vmatprep.mubr.bf16.mxu1 %v6277_v44 }
 0x154   : > { %3110 = vmatprep.subr.bf16.mxu1 %v4858_v27 }
 0x157   : > { %3111 = vmatpush1.bf16.msra.mxu1 %v4857_v34 }
 0x158   : > { %3112 = vmatprep.subr.bf16.mxu1 %v4860_v35 }
 0x15a   : > { %2351 = vmatmul.mubr.bf16.gmra.mrb[56].mxu1 %v6287_v61 }
 0x15b   : > { %3113 = vmatpush1.bf16.msra.mxu1 %v4859_v40  ;;  %2360 = vmatprep.mubr.bf16.mxu1 %v6289_v62 }
 0x15c   : > { %3114 = vmatprep.subr.bf16.mxu1 %v4862_v41 }
 0x15f   : > { %3115 = vmatpush1.bf16.msra.mxu1 %v4861_v46 }
 0x160   : > { %3116 = vmatprep.subr.bf16.mxu1 %v4864_v48 }
 0x162   : > { %2361 = vmatmul.mubr.bf16.gmra.mrb[60].mxu1 %v6297_v9 }
 0x163   : > { %3117 = vmatpush1.bf16.msra.mxu1 %v4863_v52  ;;  %3120 = vmatprep.mubr.bf16.mxu1 %v6209_v36  ;;  %v492_v36 = vlaneseq }
 0x164   : > { %3118 = vmatprep.subr.bf16.mxu1 %v4866_v53 }
 0x167   : > { %3119 = vmatpush1.bf16.msra.mxu1 %v4865_v54 }
 0x16a   : > { %3121 = vmatmul.mubr.bf16.vlgmr.msra.gmra.mrb[64].mxu1 %v6217_v10  ;;  %v493_v10 = vshrl.u32 %v492_v36, 7 }
 0x16b   : > { %3130 = vmatprep.mubr.bf16.mxu1 %v6219_v11 }
 0x16c   : > { %v6335_v11 = vsub.s32 0, %v493_v10 }
 0x16e   : > { %8112 = vst [vmem:[#allocation18_spill] sm:$0xff] %v6335_v11  ;;  %v6367_v24 = vrot.slane %v6358_v13, %v6335_v11 }
 0x170   : > { %8114 = vst [vmem:[#allocation20_spill] sm:$0xff] %v6367_v24 }
 0x172   : > { %3131 = vmatmul.mubr.bf16.gmra.mrb[68].mxu1 %v6227_v28  ;;  %v1015_v28 = vld [vmem:[#allocation7 + $0x2] sm:$0x3] }
 0x173   : > { %3140 = vmatprep.mubr.bf16.mxu1 %v6229_v30  ;;  %v6337_v30 = vsub.s32 1, %v493_v10 }
 0x175   : > { %8113 = vst [vmem:[#allocation19_spill] sm:$0xff] %v6337_v30 }
 0x17a   : > { %3141 = vmatmul.mubr.bf16.gmra.mrb[72].mxu1 %v6239_v47  ;;  %v6340_v47 = vrot.slane %v1015_v28, %v6335_v11 }
 0x17b   : > { %3150 = vmatprep.mubr.bf16.mxu1 %v6241_v49  ;;  %v6343_v49 = vrot.slane %v1015_v28, %v6337_v30 }
 0x182   : > { %3151 = vmatmul.mubr.bf16.gmra.mrb[76].mxu1 %v6251_v1 }
 0x183   : > { %3160 = vmatprep.mubr.bf16.mxu1 %v6253_v3 }
 0x18a   : > { %3161 = vmatmul.mubr.bf16.gmra.mrb[80].mxu1 %v6263_v21 }
 0x18b   : > { %3170 = vmatprep.mubr.bf16.mxu1 %v6265_v23 }
 0x192   : > { %3171 = vmatmul.mubr.bf16.gmra.mrb[84].mxu1 %v6275_v42 }
 0x193   : > { %3180 = vmatprep.mubr.bf16.mxu1 %v6277_v44 }
 0x19a   : > { %3181 = vmatmul.mubr.bf16.gmra.mrb[88].mxu1 %v6287_v61 }
 0x19b   : > { %3190 = vmatprep.mubr.bf16.mxu1 %v6289_v62 }
 0x1a2   : > { %3191 = vmatmul.mubr.bf16.gmra.mrb[92].mxu1 %v6297_v9  ;;  %v490_v9 = vld [vmem:[#allocation7] sm:$0x3] }
 0x1a3   : > { %v6350_v59 = vrot.slane %v490_v9, %v6335_v11  ;;  %v6353_v60 = vrot.slane %v490_v9, %v6337_v30 }
 0x1bd   : > { %v1221_v1 = vpop.f32.mrb[0].mxu1  ;;  %v696_v0 = vpop.f32.mrb[0].mxu0 }
 0x1be   : > { %v1222_v3 = vadd.f32 %v1221_v1, %v6340_v47  ;;  %v1223_v21 = vpop.f32.mrb[1].mxu1  ;;  %v698_v5 = vpop.f32.mrb[1].mxu0  ;;  %v697_v8 = vadd.f32 %v696_v0, %v6350_v59  ;;  %v5180_v0 = vld [vmem:[#allocation8] ss:$8 sps:$4 sm:$0xff]  }
 0x1bf   : > { %v1224_v23 = vadd.f32 %v1223_v21, %v6343_v49  ;;  %v1225_v42 = vpop.f32.mrb[2].mxu1  ;;  %v700_v12 = vpop.f32.mrb[2].mxu0  ;;  %v6362_v17 = vadd.f32 %v698_v5, %v6353_v60 }
 0x1c0   : > { %v1332_v44 = vmul.f32 0.70710677, %v1222_v3  ;;  %v1226_v61 = vadd.f32 %v1225_v42, %v6340_v47  ;;  %v1227_v62 = vpop.f32.mrb[3].mxu1  ;;  %v702_v18 = vpop.f32.mrb[3].mxu0  ;;  %v1300_v25 = vmul.f32 0.5, %v1222_v3  ;;  %v6375_v48 = vmul.f32 0.5, %v697_v8 }
 0x1c1   : > { %v1333_v55 = vmul.f32 0.70710677, %v1224_v23  ;;  %v1228_v56 = vadd.f32 %v1227_v62, %v6343_v49  ;;  %v807_v27 = vmul.f32 0.70710677, %v697_v8  ;;  %v1301_v31 = vmul.f32 0.5, %v1224_v23 }
 0x1c2   : > { %5372 = verf.f32 %v1332_v44  ;;  %v1334_v57 = vmul.f32 0.70710677, %v1226_v61  ;;  %v1302_v32 = vmul.f32 0.5, %v1226_v61  ;;  %v808_v33 = vmul.f32 0.70710677, %v6362_v17 }
 0x1c3   : > { %5374 = verf.f32 %v1333_v55  ;;  %v1335_v58 = vmul.f32 0.70710677, %v1228_v56  ;;  %v1303_v37 = vmul.f32 0.5, %v1228_v56  ;;  %v701_v50 = vadd.f32 %v700_v12, %v6350_v59  ;;  %v5185_v8 = vld [vmem:[#allocation8 + $0x14] ss:$8 sps:$4 sm:$0xff]  }
 0x1c4   : > { %5376 = verf.f32 %v1334_v57 }
 0x1c5   : > { %5378 = verf.f32 %v1335_v58  ;;  %v1231_v63 = vpop.f32.mrb[4].mxu1  ;;  %v809_v57 = vmul.f32 0.70710677, %v701_v50 }
 0x1c6   : > { %v1232_v2 = vadd.f32 %v1231_v63, %v6340_v47  ;;  %v1233_v4 = vpop.f32.mrb[5].mxu1 }
 0x1c7   : > { %v1234_v6 = vadd.f32 %v1233_v4, %v6343_v49  ;;  %v1235_v7 = vpop.f32.mrb[6].mxu1  ;;  %v6372_v40 = vpop.f32.mrb[4].mxu0 }
 0x1c8   : > { %v1336_v14 = vmul.f32 0.70710677, %v1232_v2  ;;  %v1236_v15 = vadd.f32 %v1235_v7, %v6340_v47  ;;  %v1237_v16 = vpop.f32.mrb[7].mxu1  ;;  %v6370_v38 = vmul.f32 0.5, %v1232_v2  ;;  %v6378_v51 = vpop.f32.mrb[5].mxu0  ;;  %v6392_v2 = vadd.f32 %v702_v18, %v6353_v60 }
 0x1c9   : > { %v1337_v19 = vmul.f32 0.70710677, %v1234_v6  ;;  %v1238_v20 = vadd.f32 %v1237_v16, %v6343_v49  ;;  %v6380_v54 = vmul.f32 0.5, %v1234_v6  ;;  %v6383_v28 = vpop.f32.mrb[6].mxu0 }
 0x1ca   : > { %5380 = verf.f32 %v1336_v14  ;;  %v1338_v22 = vmul.f32 0.70710677, %v1236_v15  ;;  %v6385_v42 = vpop.f32.mrb[7].mxu0  ;;  %v1306_v5 = vmul.f32 0.5, %v1236_v15 }
 0x1cb   : > { %5382 = verf.f32 %v1337_v19  ;;  %v1339_v26 = vmul.f32 0.70710677, %v1238_v20  ;;  %v1307_v16 = vmul.f32 0.5, %v1238_v20 }
 0x1cc   : > { %v5373_v29 = vpop.eup %5372  ;;  %5384 = verf.f32 %v1338_v22  ;;  %v6396_v22 = vmul.f32 0.5, %v6362_v17 }
 0x1cd   : > { %v5375_v34 = vpop.eup %5374  ;;  %v1396_v35 = vadd.f32 1.0, %v5373_v29  ;;  %5386 = verf.f32 %v1339_v26  ;;  %v1241_v39 = vpop.f32.mrb[8].mxu1  ;;  %v5183_v29 = vld [vmem:[#allocation8 + $0x10] ss:$8 sps:$4 sm:$0xff]  }
 0x1ce   : > { %v5377_v41 = vpop.eup %5376  ;;  %v1397_v43 = vadd.f32 1.0, %v5375_v34  ;;  %v1242_v45 = vadd.f32 %v1241_v39, %v6340_v47  ;;  %v1243_v46 = vpop.f32.mrb[9].mxu1  ;;  %5388 = verf.f32 %v807_v27 }
 0x1cf   : > { %v5379_v52 = vpop.eup %5378  ;;  %v1398_v53 = vadd.f32 1.0, %v5377_v41  ;;  %v1244_v36 = vadd.f32 %v1243_v46, %v6343_v49  ;;  %v1245_v10 = vpop.f32.mrb[10].mxu1  ;;  %v1428_v1 = vmul.f32 %v1396_v35, %v1300_v25  ;;  %5390 = verf.f32 %v808_v33 }
 0x1d0   : > { %v1399_v3 = vadd.f32 1.0, %v5379_v52  ;;  %v1340_v21 = vmul.f32 0.70710677, %v1242_v45  ;;  %v1247_v23 = vpop.f32.mrb[11].mxu1  ;;  %v1429_v44 = vmul.f32 %v1397_v43, %v1301_v31  ;;  %v1246_v9 = vadd.f32 %v1245_v10, %v6340_v47  ;;  %v6398_v25 = vpop.f32.mrb[8].mxu0 }
 0x1d1   : > { %v1430_v61 = vmul.f32 %v1398_v53, %v1302_v32  ;;  %v1341_v62 = vmul.f32 0.70710677, %v1244_v36  ;;  %v6389_v56 = vadd.f32 %v1247_v23, %v6343_v49  ;;  %v6401_v31 = vmul.f32 0.5, %v701_v50  ;;  %v6403_v32 = vpop.f32.mrb[9].mxu0 }
 0x1d2   : > { %v1431_v55 = vmul.f32 %v1399_v3, %v1303_v37  ;;  %5392 = verf.f32 %v1340_v21  ;;  %v1342_v63 = vmul.f32 0.70710677, %v1246_v9  ;;  %v6405_v34 = vmul.f32 0.5, %v1242_v45  ;;  %v6409_v39 = vpop.f32.mrb[10].mxu0 }
 0x1d3   : > { %v1460_v58 = vpack.c.bf16 %v1430_v61, %v1428_v1  ;;  %5394 = verf.f32 %v1341_v62  ;;  %v1343_v6 = vmul.f32 0.70710677, %v6389_v56  ;;  %v810_v37 = vmul.f32 0.70710677, %v6392_v2  ;;  %v6413_v52 = vpop.f32.mrb[11].mxu0 }
 0x1d4   : > { %v5381_v4 = vpop.eup %5380  ;;  %v1461_v7 = vpack.c.bf16 %v1431_v55, %v1429_v44  ;;  %5396 = verf.f32 %v809_v57  ;;  %v6411_v43 = vmul.f32 0.5, %v1244_v36  ;;  %v6417_v45 = vrot.slane %v6358_v13, %v6337_v30  ;;  %v5188_v36 = vld [vmem:[#allocation8 + $0x24] ss:$8 sps:$4 sm:$0xff]  }
 0x1d5   : > { %v5383_v12 = vpop.eup %5382  ;;  %v1400_v14 = vadd.f32 1.0, %v5381_v4  ;;  %5398 = verf.f32 %v1342_v63  ;;  %v1251_v19 = vpop.f32.mrb[12].mxu1  ;;  %v1310_v13 = vmul.f32 0.5, %v1246_v9  ;;  %v5191_v4 = vld [vmem:[#allocation8 + $0x34] ss:$8 sps:$4 sm:$0xff]   ;;  %v6431_v9 = vmul.f32 0.5, %v6392_v2 }
 0x1d6   : > { %v5385_v26 = vpop.eup %5384  ;;  %v1401_v18 = vadd.f32 1.0, %v5383_v12  ;;  %5400 = verf.f32 %v1343_v6  ;;  %v1252_v15 = vadd.f32 %v1251_v19, %v6340_v47  ;;  %v1253_v27 = vpop.f32.mrb[13].mxu1  ;;  %1700 = vmatprep.mubr.bf16.mxu0 %v1461_v7  ;;  %8115 = vst [vmem:[#allocation21_spill] sm:$0xff] %v6417_v45  ;;  %v1311_v7 = vmul.f32 0.5, %v6389_v56 }
 0x1d7   : > { %v5387_v20 = vpop.eup %5386  ;;  %v1402_v33 = vadd.f32 1.0, %v5385_v26  ;;  %v1254_v17 = vadd.f32 %v1253_v27, %v6343_v49  ;;  %v1255_v35 = vpop.f32.mrb[14].mxu1  ;;  %1701 = vmatmul.mubr.bf16.vlgmr.msra.gmra.mrb[32].mxu0 %v1460_v58  ;;  %v1432_v10 = vmul.f32 %v1400_v14, %v6370_v38  ;;  %v5186_v38 = vld [vmem:[#allocation8 + $0x20] ss:$8 sps:$4 sm:$0xff]   ;;  %v707_v56 = vadd.f32 %v6372_v40, %v6350_v59 }
 0x1d8   : > { %v1403_v41 = vadd.f32 1.0, %v5387_v20  ;;  %v1344_v46 = vmul.f32 0.70710677, %v1252_v15  ;;  %1942 = vmatpush1.bf16.msra.mxu0 %v5180_v0  ;;  %v1257_v50 = vpop.f32.mrb[15].mxu1  ;;  %v5389_v53 = vpop.eup %5388  ;;  %v6421_v21 = vadd.f32 %v1255_v35, %v6340_v47  ;;  %v1433_v44 = vmul.f32 %v1401_v18, %v6380_v54  ;;  %v5189_v18 = vld [vmem:[#allocation8 + $0x30] ss:$8 sps:$4 sm:$0xff]  }
 0x1d9   : > { %v1434_v1 = vmul.f32 %v1402_v33, %v1306_v5  ;;  %v1345_v3 = vmul.f32 0.70710677, %v1254_v17  ;;  %1943 = vmatprep.subr.bf16.mxu0 %v5185_v8  ;;  %v5391_v23 = vpop.eup %5390  ;;  %v6425_v62 = vadd.f32 %v1257_v50, %v6343_v49  ;;  %v871_v5 = vadd.f32 1.0, %v5389_v53  ;;  %v6433_v12 = vpop.f32.mrb[12].mxu0 }
 0x1da   : > { %v1435_v61 = vmul.f32 %v1403_v41, %v1307_v16  ;;  %5402 = verf.f32 %v1344_v46  ;;  %v1346_v55 = vmul.f32 0.70710677, %v6421_v21  ;;  %v6435_v16 = vmul.f32 0.5, %v1252_v15  ;;  %v6440_v27 = vpop.f32.mrb[13].mxu0 }
 0x1db   : > { %5404 = verf.f32 %v1345_v3  ;;  %v1462_v57 = vpack.c.bf16 %v1434_v1, %v1432_v10  ;;  %v1347_v63 = vmul.f32 0.70710677, %v6425_v62  ;;  %v6442_v2 = vmul.f32 0.5, %v1254_v17 }
 0x1dc   : > { %v5393_v58 = vpop.eup %5392  ;;  %1944 = vmatpush1.bf16.msra.mxu0 %v5183_v29  ;;  %v1463_v0 = vpack.c.bf16 %v1435_v61, %v1433_v44  ;;  %5406 = verf.f32 %v810_v37  ;;  %v6445_v37 = vpop.f32.mrb[14].mxu0  ;;  %v6448_v40 = vmul.f32 %v871_v5, %v6375_v48  ;;  %v872_v10 = vadd.f32 1.0, %v5391_v23  ;;  %v5194_v61 = vld [vmem:[#allocation8 + $0x44] ss:$8 sps:$4 sm:$0xff]  }
 0x1dd   : > { %v5395_v54 = vpop.eup %5394  ;;  %v1404_v6 = vadd.f32 1.0, %v5393_v58  ;;  %5408 = verf.f32 %v1346_v55  ;;  %v1261_v8 = vpop.f32.mrb[16].mxu1  ;;  %1945 = vmatprep.subr.bf16.mxu0 %v5188_v36 }
 0x1de   : > { %v5397_v14 = vpop.eup %5396  ;;  %5410 = verf.f32 %v1347_v63  ;;  %v1262_v19 = vadd.f32 %v1261_v8, %v6340_v47  ;;  %v1263_v26 = vpop.f32.mrb[17].mxu1  ;;  %1710 = vmatprep.mubr.bf16.mxu0 %v1463_v0  ;;  %v1405_v20 = vadd.f32 1.0, %v5395_v54  ;;  %v1314_v63 = vmul.f32 0.5, %v6421_v21 }
 0x1df   : > { %v5399_v29 = vpop.eup %5398  ;;  %v1264_v33 = vadd.f32 %v1263_v26, %v6343_v49  ;;  %v1265_v35 = vpop.f32.mrb[18].mxu1  ;;  %1711 = vmatmul.mubr.bf16.gmra.mrb[36].mxu0 %v1462_v57  ;;  %v873_v15 = vadd.f32 1.0, %v5397_v14  ;;  %v1436_v17 = vmul.f32 %v1404_v6, %v6405_v34 }
 0x1e0   : > { %v5401_v41 = vpop.eup %5400  ;;  %v1406_v46 = vadd.f32 1.0, %v5399_v29  ;;  %v1348_v50 = vmul.f32 0.70710677, %v1262_v19  ;;  %1946 = vmatpush1.bf16.msra.mxu0 %v5186_v38  ;;  %v1267_v53 = vpop.f32.mrb[19].mxu1  ;;  %v6454_v44 = vadd.f32 %v1265_v35, %v6340_v47  ;;  %v1437_v48 = vmul.f32 %v1405_v20, %v6411_v43  ;;  %v5197_v29 = vld [vmem:[#allocation8 + $0x54] ss:$8 sps:$4 sm:$0xff]  }
 0x1e1   : > { %v6450_v1 = vpop.f32.mrb[15].mxu0  ;;  %v1407_v3 = vadd.f32 1.0, %v5401_v41  ;;  %v1349_v36 = vmul.f32 0.70710677, %v1264_v33  ;;  %1947 = vmatprep.subr.bf16.mxu0 %v5191_v4  ;;  %v1268_v38 = vadd.f32 %v1267_v53, %v6343_v49  ;;  %v6458_v57 = vmul.f32 %v873_v15, %v6401_v31  ;;  %v5192_v4 = vld [vmem:[#allocation8 + $0x40] ss:$8 sps:$4 sm:$0xff]  }
 0x1e2   : > { %v1438_v55 = vmul.f32 %v1406_v46, %v1310_v13  ;;  %5412 = verf.f32 %v1348_v50  ;;  %v1350_v34 = vmul.f32 0.70710677, %v6454_v44  ;;  %v1315_v31 = vmul.f32 0.5, %v6425_v62  ;;  %v6466_v8 = vpop.f32.mrb[16].mxu0 }
 0x1e3   : > { %v1439_v23 = vmul.f32 %v1407_v3, %v1311_v7  ;;  %5414 = verf.f32 %v1349_v36  ;;  %v1351_v0 = vmul.f32 0.70710677, %v1268_v38  ;;  %v811_v7 = vmul.f32 0.70710677, %v707_v56  ;;  %v6471_v35 = vpop.f32.mrb[17].mxu0 }
 0x1e4   : > { %v5403_v58 = vpop.eup %5402  ;;  %1948 = vmatpush1.bf16.msra.mxu0 %v5189_v18  ;;  %v1464_v5 = vpack.c.bf16 %v1438_v55, %v1436_v17  ;;  %5416 = verf.f32 %v1350_v34  ;;  %v6469_v20 = vmul.f32 0.5, %v707_v56  ;;  %v6473_v41 = vmul.f32 0.5, %v1262_v19  ;;  %v6479_v17 = vpop.f32.mrb[18].mxu0 }
 0x1e5   : > { %v5405_v54 = vpop.eup %5404  ;;  %v1271_v6 = vpop.f32.mrb[20].mxu1  ;;  %v1465_v43 = vpack.c.bf16 %v1439_v23, %v1437_v48  ;;  %1949 = vmatprep.subr.bf16.mxu0 %v5194_v61  ;;  %v1408_v26 = vadd.f32 1.0, %v5403_v58  ;;  %5418 = verf.f32 %v1351_v0  ;;  %v6477_v53 = vmul.f32 %v872_v10, %v6396_v22  ;;  %v5195_v22 = vld [vmem:[#allocation8 + $0x50] ss:$8 sps:$4 sm:$0xff]  }
 0x1e6   : > { %v5407_v14 = vpop.eup %5406  ;;  %v1272_v21 = vadd.f32 %v1271_v6, %v6340_v47  ;;  %v1273_v18 = vpop.f32.mrb[21].mxu1  ;;  %v1409_v62 = vadd.f32 1.0, %v5405_v54  ;;  %v6481_v61 = vmul.f32 0.5, %v1264_v33  ;;  %v709_v19 = vadd.f32 %v6378_v51, %v6353_v60 }
 0x1e7   : > { %v5409_v15 = vpop.eup %5408  ;;  %v1274_v46 = vadd.f32 %v1273_v18, %v6343_v49  ;;  %1720 = vmatprep.mubr.bf16.mxu0 %v1465_v43  ;;  %v1275_v50 = vpop.f32.mrb[22].mxu1  ;;  %5420 = verf.f32 %v811_v7  ;;  %v1440_v10 = vmul.f32 %v1408_v26, %v6435_v16  ;;  %v1318_v18 = vmul.f32 0.5, %v6454_v44 }
 0x1e8   : > { %v5411_v3 = vpop.eup %5410  ;;  %v1410_v36 = vadd.f32 1.0, %v5409_v15  ;;  %v1352_v56 = vmul.f32 0.70710677, %v1272_v21  ;;  %1721 = vmatmul.mubr.bf16.gmra.mrb[40].mxu0 %v1464_v5  ;;  %v1277_v55 = vpop.f32.mrb[23].mxu1  ;;  %v1276_v58 = vadd.f32 %v1275_v50, %v6340_v47  ;;  %v5200_v5 = vld [vmem:[#allocation8 + $0x64] ss:$8 sps:$4 sm:$0xff]   ;;  %v1441_v54 = vmul.f32 %v1409_v62, %v6442_v2 }
 0x1e9   : > { %v6485_v48 = vpop.f32.mrb[19].mxu0  ;;  %v1411_v23 = vadd.f32 1.0, %v5411_v3  ;;  %v1353_v34 = vmul.f32 0.70710677, %v1274_v46  ;;  %1950 = vmatpush1.bf16.msra.mxu0 %v5192_v4  ;;  %v1278_v33 = vadd.f32 %v1277_v55, %v6343_v49  ;;  %v1319_v15 = vmul.f32 0.5, %v1268_v38 }
 0x1ea   : > { %v1442_v0 = vmul.f32 %v1410_v36, %v1314_v63  ;;  %5422 = verf.f32 %v1352_v56  ;;  %1951 = vmatprep.subr.bf16.mxu0 %v5197_v29  ;;  %v1354_v6 = vmul.f32 0.70710677, %v1276_v58  ;;  %v5198_v50 = vld [vmem:[#allocation8 + $0x60] ss:$8 sps:$4 sm:$0xff]   ;;  %v6492_v26 = vadd.f32 1.0, %v5407_v14  ;;  %v6494_v36 = vpop.f32.mrb[20].mxu0 }
 0x1eb   : > { %v1443_v51 = vmul.f32 %v1411_v23, %v1315_v31  ;;  %5424 = verf.f32 %v1353_v34  ;;  %v1355_v4 = vmul.f32 0.70710677, %v1278_v33  ;;  %v812_v29 = vmul.f32 0.70710677, %v709_v19  ;;  %v5203_v62 = vld [vmem:[#allocation8 + $0x74] ss:$8 sps:$4 sm:$0xff]  }
 0x1ec   : > { %v5413_v43 = vpop.eup %5412  ;;  %v1466_v7 = vpack.c.bf16 %v1442_v0, %v1440_v10  ;;  %5426 = verf.f32 %v1354_v6  ;;  %v6496_v31 = vmul.f32 0.5, %v1272_v21  ;;  %v6499_v56 = vpop.f32.mrb[21].mxu0  ;;  %v6501_v34 = vmul.f32 0.5, %v1274_v46 }
 0x1ed   : > { %v5415_v3 = vpop.eup %5414  ;;  %1952 = vmatpush1.bf16.msra.mxu0 %v5195_v22  ;;  %v1281_v16 = vpop.f32.mrb[24].mxu1  ;;  %v1467_v63 = vpack.c.bf16 %v1443_v51, %v1441_v54  ;;  %v1412_v2 = vadd.f32 1.0, %v5413_v43  ;;  %5428 = verf.f32 %v1355_v4  ;;  %v6504_v10 = vmul.f32 0.5, %v709_v19  ;;  %v5201_v19 = vld [vmem:[#allocation8 + $0x70] ss:$8 sps:$4 sm:$0xff]  }
 0x1ee   : > { %v1282_v44 = vadd.f32 %v1281_v16, %v6340_v47  ;;  %v1283_v38 = vpop.f32.mrb[25].mxu1  ;;  %1953 = vmatprep.subr.bf16.mxu0 %v5200_v5  ;;  %v5417_v55 = vpop.eup %5416  ;;  %v1413_v23 = vadd.f32 1.0, %v5415_v3  ;;  %v6508_v51 = vmul.f32 0.5, %v1276_v58  ;;  %v711_v43 = vadd.f32 %v6383_v28, %v6350_v59 }
 0x1ef   : > { %v1284_v14 = vadd.f32 %v1283_v38, %v6343_v49  ;;  %1730 = vmatprep.mubr.bf16.mxu0 %v1467_v63  ;;  %v1285_v22 = vpop.f32.mrb[26].mxu1  ;;  %v6506_v21 = vpop.f32.mrb[22].mxu0  ;;  %v1414_v54 = vadd.f32 1.0, %v5417_v55  ;;  %5430 = verf.f32 %v812_v29  ;;  %v1444_v63 = vmul.f32 %v1412_v2, %v6473_v41 }
 0x1f0   : > { %v5419_v0 = vpop.eup %5418  ;;  %v1356_v5 = vmul.f32 0.70710677, %v1282_v44  ;;  %1731 = vmatmul.mubr.bf16.gmra.mrb[44].mxu0 %v1466_v7  ;;  %v1287_v6 = vpop.f32.mrb[27].mxu1  ;;  %v1286_v16 = vadd.f32 %v1285_v22, %v6340_v47  ;;  %v5206_v7 = vld [vmem:[#allocation8 + $0x84] ss:$8 sps:$4 sm:$0xff]   ;;  %v1445_v28 = vmul.f32 %v1413_v23, %v6481_v61  ;;  %v1323_v11 = vmul.f32 0.5, %v1278_v33 }
 0x1f1   : > { %v6512_v46 = vpop.f32.mrb[23].mxu0  ;;  %v1415_v4 = vadd.f32 1.0, %v5419_v0  ;;  %v1357_v3 = vmul.f32 0.70710677, %v1284_v14  ;;  %1954 = vmatpush1.bf16.msra.mxu0 %v5198_v50  ;;  %v1446_v38 = vmul.f32 %v1414_v54, %v1318_v18  ;;  %v1288_v58 = vadd.f32 %v1287_v6, %v6343_v49  ;;  %v5421_v55 = vpop.eup %5420 }
 0x1f2   : > { %5432 = verf.f32 %v1356_v5  ;;  %1955 = vmatprep.subr.bf16.mxu0 %v5203_v62  ;;  %v1358_v0 = vmul.f32 0.70710677, %v1286_v16  ;;  %v813_v50 = vmul.f32 0.70710677, %v711_v43  ;;  %v713_v29 = vadd.f32 %v6385_v42, %v6353_v60  ;;  %v5204_v62 = vld [vmem:[#allocation8 + $0x80] ss:$8 sps:$4 sm:$0xff]  }
 0x1f3   : > { %v1447_v13 = vmul.f32 %v1415_v4, %v1319_v15  ;;  %5434 = verf.f32 %v1357_v3  ;;  %v1359_v22 = vmul.f32 0.70710677, %v1288_v58  ;;  %v6520_v54 = vmul.f32 0.5, %v711_v43  ;;  %v6522_v61 = vpop.f32.mrb[24].mxu0  ;;  %v5209_v42 = vld [vmem:[#allocation8 + $0x94] ss:$8 sps:$4 sm:$0xff]  }
 0x1f4   : > { %v5423_v30 = vpop.eup %5422  ;;  %5436 = verf.f32 %v1358_v0  ;;  %v1468_v5 = vpack.c.bf16 %v1446_v38, %v1444_v63  ;;  %v6524_v23 = vmul.f32 0.5, %v1282_v44  ;;  %v6527_v4 = vpop.f32.mrb[25].mxu0  ;;  %v6546_v45 = vmul.f32 0.5, %v713_v29 }
 0x1f5   : > { %v5425_v41 = vpop.eup %5424  ;;  %1956 = vmatpush1.bf16.msra.mxu0 %v5201_v19  ;;  %v1291_v18 = vpop.f32.mrb[28].mxu1  ;;  %v1469_v2 = vpack.c.bf16 %v1447_v13, %v1445_v28  ;;  %v1416_v15 = vadd.f32 1.0, %v5423_v30  ;;  %5438 = verf.f32 %v1359_v22  ;;  %v6529_v19 = vmul.f32 0.5, %v1284_v14 }
 0x1f6   : > { %v1292_v33 = vadd.f32 %v1291_v18, %v6340_v47  ;;  %v1293_v6 = vpop.f32.mrb[29].mxu1  ;;  %1957 = vmatprep.subr.bf16.mxu0 %v5206_v7  ;;  %v5427_v3 = vpop.eup %5426  ;;  %v875_v13 = vadd.f32 1.0, %v5421_v55  ;;  %5440 = verf.f32 %v813_v50  ;;  %v1417_v38 = vadd.f32 1.0, %v5425_v41 }
 0x1f7   : > { %v1294_v43 = vadd.f32 %v1293_v6, %v6343_v49  ;;  %1740 = vmatprep.mubr.bf16.mxu0 %v1469_v2  ;;  %v1295_v63 = vpop.f32.mrb[30].mxu1  ;;  %v6532_v30 = vpop.f32.mrb[26].mxu0  ;;  %v6534_v28 = vmul.f32 0.5, %v1286_v16  ;;  %v6538_v7 = vmul.f32 %v6492_v26, %v6431_v9  ;;  %v1418_v55 = vadd.f32 1.0, %v5427_v3  ;;  %v5207_v6 = vld [vmem:[#allocation8 + $0x90] ss:$8 sps:$4 sm:$0xff]  }
 0x1f8   : > { %v5429_v44 = vpop.eup %5428  ;;  %v1360_v0 = vmul.f32 0.70710677, %v1292_v33  ;;  %1741 = vmatmul.mubr.bf16.gmra.mrb[48].mxu0 %v1468_v5  ;;  %v1297_v14 = vpop.f32.mrb[31].mxu1  ;;  %v1296_v50 = vadd.f32 %v1295_v63, %v6340_v47  ;;  %v6544_v41 = vmul.f32 %v1416_v15, %v6496_v31  ;;  %v1327_v16 = vmul.f32 0.5, %v1288_v58  ;;  %v5212_v26 = vld [vmem:[#allocation8 + $0xa4] ss:$8 sps:$4 sm:$0xff]  }
 0x1f9   : > { %v6540_v22 = vpop.f32.mrb[27].mxu0  ;;  %v1419_v18 = vadd.f32 1.0, %v5429_v44  ;;  %v1361_v2 = vmul.f32 0.70710677, %v1294_v43  ;;  %1958 = vmatpush1.bf16.msra.mxu0 %v5204_v62  ;;  %v1298_v9 = vadd.f32 %v1297_v14, %v6343_v49  ;;  %v5431_v5 = vpop.eup %5430  ;;  %v814_v44 = vmul.f32 0.70710677, %v713_v29 }
 0x1fa   : > { %8116 = vst [vmem:[#allocation22_spill] sm:$0xff] %v6540_v22  ;;  %1959 = vmatprep.subr.bf16.mxu0 %v5209_v42  ;;  %v1362_v3 = vmul.f32 0.70710677, %v1296_v50  ;;  %v1449_v47 = vmul.f32 %v1417_v38, %v6501_v34  ;;  %v6550_v62 = vmul.f32 0.5, %v1292_v33  ;;  %v1450_v58 = vmul.f32 %v1418_v55, %v6508_v51  ;;  %v5210_v29 = vld [vmem:[#allocation8 + $0xa0] ss:$8 sps:$4 sm:$0xff]  }
 0x1fb   : > { %v1451_v24 = vmul.f32 %v1419_v18, %v1323_v11  ;;  %5442 = verf.f32 %v1361_v2  ;;  %v1363_v31 = vmul.f32 0.70710677, %v1298_v9  ;;  %v6555_v49 = vadd.f32 %v6398_v25, %v6350_v59  ;;  %v6561_v42 = vpop.f32.mrb[28].mxu0  ;;  %v5215_v63 = vld [vmem:[#allocation8 + $0xb4] ss:$8 sps:$4 sm:$0xff]  }
 0x1fc   : > { %v5433_v22 = vpop.eup %5432  ;;  %5444 = verf.f32 %v1360_v0  ;;  %v6559_v11 = vadd.f32 %v6403_v32, %v6353_v60  ;;  %v876_v34 = vadd.f32 1.0, %v5431_v5  ;;  %v721_v51 = vadd.f32 %v6409_v39, %v6350_v59  ;;  %v6565_v38 = vpop.f32.mrb[29].mxu0 }
 0x1fd   : > { %v5435_v15 = vpop.eup %5434  ;;  %5446 = verf.f32 %v1362_v3  ;;  %1960 = vmatpush1.bf16.msra.mxu0 %v5207_v6  ;;  %v1471_v33 = vpack.c.bf16 %v1451_v24, %v1449_v47  ;;  %v6567_v0 = vpop.f32.mrb[32].mxu1  ;;  %v1420_v14 = vadd.f32 1.0, %v5433_v22  ;;  %v6569_v55 = vmul.f32 0.5, %v1294_v43 }
 0x1fe   : > { %5448 = verf.f32 %v1363_v31  ;;  %1961 = vmatprep.subr.bf16.mxu0 %v5212_v26  ;;  %v5437_v25 = vpop.eup %5436  ;;  %v815_v32 = vmul.f32 0.70710677, %v6555_v49  ;;  %v6572_v18 = vpop.f32.mrb[30].mxu0  ;;  %v1421_v6 = vadd.f32 1.0, %v5435_v15  ;;  %v6577_v39 = vmul.f32 %v875_v13, %v6469_v20 }
 0x1ff   : > { %5450 = verf.f32 %v814_v44  ;;  %v6574_v2 = vpop.f32.mrb[33].mxu1  ;;  %v5439_v24 = vpop.eup %5438  ;;  %v1422_v26 = vadd.f32 1.0, %v5437_v25  ;;  %v816_v5 = vmul.f32 0.70710677, %v6559_v11  ;;  %1750 = vmatprep.mubr.bf16.mxu0 %v1471_v33  ;;  %v817_v47 = vmul.f32 0.70710677, %v721_v51 }
 0x200   : > { %8117 = vst [vmem:[#allocation23_spill] sm:$0xff] %v6574_v2  ;;  %v6580_v3 = vpop.f32.mrb[31].mxu0  ;;  %v6582_v43 = vpop.f32.mrb[34].mxu1  ;;  %v1423_v44 = vadd.f32 1.0, %v5439_v24  ;;  %5452 = verf.f32 %v815_v32  ;;  %v1470_v31 = vpack.c.bf16 %v1450_v58, %v6544_v41  ;;  %v5213_v2 = vld [vmem:[#allocation8 + $0xb0] ss:$8 sps:$4 sm:$0xff]   ;;  %v6588_v20 = vmul.f32 %v876_v34, %v6504_v10 }
 0x201   : > { %8118 = vst [vmem:[#allocation24_spill] sm:$0xff] %v6582_v43  ;;  %v5441_v22 = vpop.eup %5440  ;;  %1962 = vmatpush1.bf16.msra.mxu0 %v5210_v29  ;;  %v6585_v15 = vpop.f32.mrb[35].mxu1  ;;  %v1330_v13 = vmul.f32 0.5, %v1296_v50  ;;  %5454 = verf.f32 %v816_v5  ;;  %v723_v33 = vadd.f32 %v6413_v52, %v6353_v60  ;;  %v5218_v25 = vld [vmem:[#allocation8 + $0xc4] ss:$8 sps:$4 sm:$0xff]   ;;  %v1331_v24 = vmul.f32 0.5, %v1298_v9 }
 0x202   : > { %1963 = vmatprep.subr.bf16.mxu0 %v5215_v63  ;;  %v1455_v43 = vmul.f32 %v1423_v44, %v1327_v16  ;;  %1751 = vmatmul.mubr.bf16.gmra.mrb[52].mxu0 %v1470_v31  ;;  %v727_v41 = vadd.f32 %v6433_v12, %v6350_v59  ;;  %v6596_v58 = vadd.f32 %v6440_v27, %v6353_v60  ;;  %v877_v29 = vadd.f32 1.0, %v5441_v22  ;;  %v5216_v12 = vld [vmem:[#allocation8 + $0xc0] ss:$8 sps:$4 sm:$0xff]  }
 0x203   : > { %v1453_v10 = vmul.f32 %v1421_v6, %v6529_v19  ;;  %v818_v50 = vmul.f32 0.70710677, %v723_v33  ;;  %v731_v34 = vadd.f32 %v6445_v37, %v6350_v59  ;;  %v1452_v63 = vmul.f32 %v1420_v14, %v6524_v23  ;;  %v5221_v6 = vld [vmem:[#allocation8 + $0xd4] ss:$8 sps:$4 sm:$0xff]  }
 0x204   : > { %v1454_v16 = vmul.f32 %v1422_v26, %v6534_v28  ;;  %5456 = verf.f32 %v817_v47  ;;  %v819_v9 = vmul.f32 0.70710677, %v727_v41  ;;  %v820_v27 = vmul.f32 0.70710677, %v6596_v58 }
 0x205   : > { %v5443_v52 = vpop.eup %5442  ;;  %1964 = vmatpush1.bf16.msra.mxu0 %v5213_v2  ;;  %5458 = verf.f32 %v818_v50  ;;  %v1473_v19 = vpack.c.bf16 %v1455_v43, %v1453_v10  ;;  %v6604_v22 = vpop.f32.mrb[36].mxu1  ;;  %v6607_v44 = vmul.f32 0.5, %v6555_v49  ;;  %v6610_v23 = vmul.f32 0.5, %v6559_v11  ;;  %v5219_v50 = vld [vmem:[#allocation8 + $0xd0] ss:$8 sps:$4 sm:$0xff]  }
 0x206   : > { %v5445_v32 = vpop.eup %5444  ;;  %v1425_v5 = vadd.f32 1.0, %v5443_v52  ;;  %1965 = vmatprep.subr.bf16.mxu0 %v5218_v25  ;;  %v6612_v28 = vmul.f32 0.5, %v721_v51  ;;  %5460 = verf.f32 %v819_v9  ;;  %v6614_v14 = vpop.f32.mrb[37].mxu1  ;;  %v6617_v26 = vmul.f32 %v877_v29, %v6520_v54 }
 0x207   : > { %v5447_v37 = vpop.eup %5446  ;;  %5462 = verf.f32 %v820_v27  ;;  %1760 = vmatprep.mubr.bf16.mxu0 %v1473_v19  ;;  %v821_v47 = vmul.f32 0.70710677, %v731_v34  ;;  %v6619_v31 = vpop.f32.mrb[38].mxu1  ;;  %v1424_v25 = vadd.f32 1.0, %v5445_v32  ;;  %v1472_v11 = vpack.c.bf16 %v1454_v16, %v1452_v63  ;;  %v5224_v32 = vld [vmem:[#allocation8 + $0xe4] ss:$8 sps:$4 sm:$0xff]  }
 0x208   : > { %v5449_v2 = vpop.eup %5448  ;;  %v1426_v43 = vadd.f32 1.0, %v5447_v37  ;;  %v733_v51 = vadd.f32 %v6450_v1, %v6353_v60  ;;  %v6623_v52 = vpop.f32.mrb[39].mxu1  ;;  %v1457_v54 = vmul.f32 %v1425_v5, %v6569_v55  ;;  %v737_v29 = vadd.f32 %v6466_v8, %v6350_v59 }
 0x209   : > { %v5451_v49 = vpop.eup %5450  ;;  %v1427_v10 = vadd.f32 1.0, %v5449_v2  ;;  %1966 = vmatpush1.bf16.msra.mxu0 %v5216_v12  ;;  %5464 = verf.f32 %v821_v47  ;;  %v739_v9 = vadd.f32 %v6471_v35, %v6353_v60  ;;  %v741_v1 = vadd.f32 %v6479_v17, %v6350_v59  ;;  %v5227_v17 = vld [vmem:[#allocation8 + $0xf4] ss:$8 sps:$4 sm:$0xff]  }
 0x20a   : > { %1967 = vmatprep.subr.bf16.mxu0 %v5221_v6  ;;  %v5453_v27 = vpop.eup %5452  ;;  %v1458_v63 = vmul.f32 %v1426_v43, %v1330_v13  ;;  %1761 = vmatmul.mubr.bf16.gmra.mrb[56].mxu0 %v1472_v11  ;;  %v822_v12 = vmul.f32 0.70710677, %v733_v51  ;;  %v878_v37 = vadd.f32 1.0, %v5451_v49  ;;  %v6632_v55 = vmul.f32 0.5, %v723_v33  ;;  %v5222_v13 = vld [vmem:[#allocation8 + $0xe0] ss:$8 sps:$4 sm:$0xff]  }
 0x20b   : > { %v1459_v16 = vmul.f32 %v1427_v10, %v1331_v24  ;;  %v5455_v19 = vpop.eup %5454  ;;  %v6634_v5 = vmul.f32 0.5, %v727_v41  ;;  %v823_v6 = vmul.f32 0.70710677, %v737_v29  ;;  %v1456_v8 = vmul.f32 %v1424_v25, %v6550_v62 }
 0x20c   : > { %5466 = verf.f32 %v822_v12  ;;  %v824_v35 = vmul.f32 0.70710677, %v739_v9  ;;  %v879_v24 = vadd.f32 1.0, %v5453_v27  ;;  %v6638_v43 = vmul.f32 0.5, %v6596_v58 }
 0x20d   : > { %1968 = vmatpush1.bf16.msra.mxu0 %v5219_v50  ;;  %v1475_v2 = vpack.c.bf16 %v1459_v16, %v1457_v54  ;;  %v6640_v47 = vmul.f32 0.5, %v731_v34  ;;  %5468 = verf.f32 %v823_v6  ;;  %v6642_v33 = vpop.f32.mrb[40].mxu1  ;;  %v880_v49 = vadd.f32 1.0, %v5455_v19 }
 0x20e   : > { %1969 = vmatprep.subr.bf16.mxu0 %v5224_v32  ;;  %v5457_v41 = vpop.eup %5456  ;;  %5470 = verf.f32 %v824_v35  ;;  %v825_v62 = vmul.f32 0.70710677, %v741_v1  ;;  %v1474_v25 = vpack.c.bf16 %v1458_v63, %v1456_v8  ;;  %v6644_v10 = vpop.f32.mrb[41].mxu1  ;;  %v6647_v50 = vmul.f32 %v878_v37, %v6546_v45  ;;  %v5225_v63 = vld [vmem:[#allocation8 + $0xf0] ss:$8 sps:$4 sm:$0xff]  }
 0x20f   : > { %1770 = vmatprep.mubr.bf16.mxu0 %v1475_v2  ;;  %v5459_v11 = vpop.eup %5458  ;;  %v743_v58 = vadd.f32 %v6485_v48, %v6353_v60  ;;  %v936_v34 = vpack.c.bf16 %v6538_v7, %v6477_v53  ;;  %v747_v54 = vadd.f32 %v6494_v36, %v6350_v59  ;;  %v6655_v32 = vpop.f32.mrb[42].mxu1  ;;  %v6657_v16 = vmul.f32 0.5, %v733_v51  ;;  %v5230_v37 = vld [vmem:[#allocation8 + $0x204] ss:$8 sps:$4 sm:$0xff]  }
 0x210   : > { %v5461_v27 = vpop.eup %5460  ;;  %5472 = verf.f32 %v825_v62  ;;  %v749_v45 = vadd.f32 %v6499_v56, %v6353_v60  ;;  %v751_v48 = vadd.f32 %v6506_v21, %v6350_v59  ;;  %v6663_v12 = vpop.f32.mrb[43].mxu1  ;;  %v6666_v7 = vmul.f32 %v879_v24, %v6607_v44 }
 0x211   : > { %1970 = vmatpush1.bf16.msra.mxu0 %v5222_v13  ;;  %v5463_v53 = vpop.eup %5462  ;;  %v6668_v36 = vmul.f32 0.5, %v737_v29  ;;  %v6670_v19 = vmul.f32 0.5, %v739_v9  ;;  %v826_v51 = vmul.f32 0.70710677, %v743_v58  ;;  %v6673_v6 = vmul.f32 %v880_v49, %v6610_v23 }
 0x212   : > { %1971 = vmatprep.subr.bf16.mxu0 %v5227_v17  ;;  %v881_v56 = vadd.f32 1.0, %v5457_v41  ;;  %v6675_v8 = vmul.f32 0.5, %v741_v1  ;;  %1771 = vmatmul.mubr.bf16.gmra.mrb[60].mxu0 %v1474_v25  ;;  %v827_v21 = vmul.f32 0.70710677, %v747_v54  ;;  %v882_v2 = vadd.f32 1.0, %v5459_v11 }
 0x213   : > { %v5465_v35 = vpop.eup %5464  ;;  %v883_v13 = vadd.f32 1.0, %v5461_v27  ;;  %5474 = verf.f32 %v826_v51  ;;  %1973 = vmatprep.mubr.bf16.mxu0 %v936_v34  ;;  %v828_v44 = vmul.f32 0.70710677, %v749_v45  ;;  %v884_v29 = vadd.f32 1.0, %v5463_v53  ;;  %v5228_v25 = vld [vmem:[#allocation8 + $0x200] ss:$8 sps:$4 sm:$0xff]  }
 0x214   : > { %v885_v9 = vadd.f32 1.0, %v5465_v35  ;;  %5476 = verf.f32 %v827_v21  ;;  %v829_v24 = vmul.f32 0.70710677, %v751_v48  ;;  %v753_v23 = vadd.f32 %v6512_v46, %v6353_v60  ;;  %v5233_v11 = vld [vmem:[#allocation8 + $0x214] ss:$8 sps:$4 sm:$0xff]  }
 0x215   : > { %1972 = vmatpush1.bf16.msra.mxu0 %v5225_v63  ;;  %5478 = verf.f32 %v828_v44  ;;  %v938_v1 = vpack.c.bf16 %v6647_v50, %v6588_v20  ;;  %v757_v17 = vadd.f32 %v6522_v61, %v6350_v59  ;;  %v6683_v41 = vpop.f32.mrb[44].mxu1  ;;  %v6686_v62 = vmul.f32 %v881_v56, %v6612_v28 }
 0x216   : > { %2739 = vmatprep.subr.bf16.mxu0 %v5230_v37  ;;  %v5467_v49 = vpop.eup %5466  ;;  %5480 = verf.f32 %v829_v24  ;;  %v759_v34 = vadd.f32 %v6527_v4, %v6353_v60  ;;  %v761_v46 = vadd.f32 %v6532_v30, %v6350_v59  ;;  %v6692_v27 = vpop.f32.mrb[45].mxu1  ;;  %v6695_v61 = vmul.f32 %v882_v2, %v6632_v55 }
 0x217   : > { %v5469_v20 = vpop.eup %5468  ;;  %v6697_v50 = vmul.f32 0.5, %v743_v58  ;;  %v6699_v63 = vmul.f32 0.5, %v747_v54  ;;  %v830_v28 = vmul.f32 0.70710677, %v753_v23  ;;  %v6701_v53 = vpop.f32.mrb[46].mxu1  ;;  %v6704_v37 = vmul.f32 %v883_v13, %v6634_v5 }
 0x218   : > { %v5471_v51 = vpop.eup %5470  ;;  %v6706_v4 = vmul.f32 0.5, %v749_v45  ;;  %v831_v30 = vmul.f32 0.70710677, %v757_v17  ;;  %v832_v56 = vmul.f32 0.70710677, %v759_v34  ;;  %v6709_v21 = vmul.f32 %v884_v29, %v6638_v43  ;;  %v6716_v54 = vpop.f32.mrb[47].mxu1 }
 0x219   : > { %v6712_v55 = vmul.f32 %v885_v9, %v6640_v47  ;;  %v6714_v58 = vmul.f32 0.5, %v751_v48  ;;  %5482 = verf.f32 %v830_v28  ;;  %v886_v2 = vadd.f32 1.0, %v5467_v49  ;;  %v5231_v47 = vld [vmem:[#allocation8 + $0x210] ss:$8 sps:$4 sm:$0xff]   ;;  %v8120_v48 = vld [vmem:[#allocation22_spill] sm:$0xff] }
 0x21a   : > { %v5473_v35 = vpop.eup %5472  ;;  %v8119_v5 = vpack.c.bf16 %v6458_v57, %v6448_v40  ;;  %5484 = verf.f32 %v831_v30  ;;  %v833_v45 = vmul.f32 0.70710677, %v761_v46  ;;  %v937_v43 = vpack.c.bf16 %v6617_v26, %v6577_v39  ;;  %v5236_v9 = vld [vmem:[#allocation8 + $0x224] ss:$8 sps:$4 sm:$0xff]   ;;  %v5234_v30 = vld [vmem:[#allocation8 + $0x220] ss:$8 sps:$4 sm:$0xff]  }
 0x21b   : > { %v887_v13 = vadd.f32 1.0, %v5469_v20  ;;  %v888_v44 = vadd.f32 1.0, %v5471_v51  ;;  %5486 = verf.f32 %v832_v56  ;;  %v763_v29 = vadd.f32 %v8120_v48, %v6353_v60 }
 0x21c   : > { %1974 = vmatmul.mubr.bf16.vlgmr.msra.gmra.mrb[32].mxu0 %v8119_v5  ;;  %5488 = verf.f32 %v833_v45  ;;  %v940_v40 = vpack.c.bf16 %v6695_v61, %v6673_v6  ;;  %v767_v57 = vadd.f32 %v6561_v42, %v6350_v59  ;;  %v769_v39 = vadd.f32 %v6565_v38, %v6353_v60 }
 0x21d   : > { %2740 = vmatpush1.bf16.msra.mxu0 %v5228_v25  ;;  %1983 = vmatprep.mubr.bf16.mxu0 %v938_v1  ;;  %v5475_v26 = vpop.eup %5474  ;;  %v889_v24 = vadd.f32 1.0, %v5473_v35  ;;  %v6731_v1 = vmul.f32 0.5, %v753_v23  ;;  %v834_v49 = vmul.f32 0.70710677, %v763_v29  ;;  %v771_v25 = vadd.f32 %v6572_v18, %v6350_v59  ;;  %v5239_v35 = vld [vmem:[#allocation8 + $0x234] ss:$8 sps:$4 sm:$0xff]  }
 0x21e   : > { %2741 = vmatprep.subr.bf16.mxu0 %v5233_v11  ;;  %v6735_v11 = vpop.f32.mrb[48].mxu1  ;;  %v5477_v20 = vpop.eup %5476  ;;  %v6738_v28 = vmul.f32 %v886_v2, %v6657_v16  ;;  %v6740_v6 = vmul.f32 0.5, %v757_v17  ;;  %v6742_v42 = vmul.f32 0.5, %v759_v34  ;;  %v835_v61 = vmul.f32 0.70710677, %v767_v57 }
 0x21f   : > { %v6744_v38 = vpop.f32.mrb[49].mxu1  ;;  %v5479_v51 = vpop.eup %5478  ;;  %v6747_v23 = vmul.f32 %v887_v13, %v6668_v36  ;;  %v6749_v59 = vmul.f32 0.5, %v761_v46  ;;  %5490 = verf.f32 %v834_v49  ;;  %v836_v18 = vmul.f32 0.70710677, %v769_v39 }
 0x220   : > { %v6751_v56 = vpop.f32.mrb[50].mxu1  ;;  %v5481_v16 = vpop.eup %5480  ;;  %v6754_v17 = vmul.f32 %v888_v44, %v6670_v19  ;;  %v890_v34 = vadd.f32 1.0, %v5475_v26  ;;  %5492 = verf.f32 %v835_v61  ;;  %v837_v2 = vmul.f32 0.70710677, %v771_v25 }
 0x221   : > { %2742 = vmatpush1.bf16.msra.mxu0 %v5231_v47  ;;  %v6756_v5 = vpop.f32.mrb[51].mxu1  ;;  %v6759_v36 = vmul.f32 %v889_v24, %v6675_v8  ;;  %v891_v46 = vadd.f32 1.0, %v5477_v20  ;;  %v6761_v45 = vmul.f32 0.5, %v763_v29  ;;  %v939_v13 = vpack.c.bf16 %v6686_v62, %v6666_v7  ;;  %v5237_v8 = vld [vmem:[#allocation8 + $0x230] ss:$8 sps:$4 sm:$0xff]   ;;  %v8123_v7 = vld [vmem:[#allocation23_spill] sm:$0xff] }
 0x222   : > { %2743 = vmatprep.subr.bf16.mxu0 %v5236_v9  ;;  %v892_v47 = vadd.f32 1.0, %v5479_v51  ;;  %5494 = verf.f32 %v836_v18  ;;  %v773_v19 = vadd.f32 %v6580_v3, %v6353_v60  ;;  %v942_v44 = vpack.c.bf16 %v6738_v28, %v6709_v21  ;;  %v8121_v29 = vld [vmem:[#allocation20_spill] sm:$0xff]  ;;  %v8122_v24 = vld [vmem:[#allocation21_spill] sm:$0xff]  ;;  %v5242_v3 = vld [vmem:[#allocation8 + $0x244] ss:$8 sps:$4 sm:$0xff]  }
 0x223   : > { %v5483_v48 = vpop.eup %5482  ;;  %v893_v9 = vadd.f32 1.0, %v5481_v16  ;;  %5496 = verf.f32 %v837_v2  ;;  %v2293_v26 = vadd.f32 %v6567_v0, %v8121_v29  ;;  %v2295_v62 = vadd.f32 %v8123_v7, %v8122_v24  ;;  %v8124_v2 = vld [vmem:[#allocation24_spill] sm:$0xff] }
 0x224   : > { %1984 = vmatmul.mubr.bf16.gmra.mrb[36].mxu0 %v937_v43  ;;  %v5485_v43 = vpop.eup %5484  ;;  %v6774_v49 = vmul.f32 %v890_v34, %v6697_v50  ;;  %v6776_v60 = vmul.f32 0.5, %v767_v57  ;;  %v838_v21 = vmul.f32 0.70710677, %v773_v19  ;;  %v894_v28 = vadd.f32 1.0, %v5483_v48 }
 0x225   : > { %2744 = vmatpush1.bf16.msra.mxu0 %v5234_v30  ;;  %1993 = vmatprep.mubr.bf16.mxu0 %v940_v40  ;;  %v5487_v20 = vpop.eup %5486  ;;  %v6780_v61 = vmul.f32 0.5, %v769_v39  ;;  %v6782_v0 = vmul.f32 0.5, %v771_v25  ;;  %v2403_v51 = vmul.f32 0.70710677, %v2293_v26  ;;  %v6784_v30 = vpop.f32.mrb[52].mxu1  ;;  %v6787_v50 = vmul.f32 %v891_v46, %v6699_v63 }
 0x226   : > { %2745 = vmatprep.subr.bf16.mxu0 %v5239_v35  ;;  %v5489_v18 = vpop.eup %5488  ;;  %v6790_v57 = vmul.f32 %v892_v47, %v6706_v4  ;;  %5498 = verf.f32 %v838_v21  ;;  %v2404_v16 = vmul.f32 0.70710677, %v2295_v62  ;;  %v6792_v34 = vpop.f32.mrb[53].mxu1  ;;  %v6795_v35 = vmul.f32 %v893_v9, %v6714_v58  ;;  %v5240_v25 = vld [vmem:[#allocation8 + $0x240] ss:$8 sps:$4 sm:$0xff]  }
 0x227   : > { %v895_v39 = vadd.f32 1.0, %v5485_v43  ;;  %5500 = verf.f32 %v2403_v51  ;;  %v2297_v48 = vadd.f32 %v8124_v2, %v8121_v29  ;;  %v6799_v7 = vpop.f32.mrb[54].mxu1  ;;  %v896_v63 = vadd.f32 1.0, %v5487_v20  ;;  %v5245_v4 = vld [vmem:[#allocation8 + $0x254] ss:$8 sps:$4 sm:$0xff]  }
 0x228   : > { %v897_v46 = vadd.f32 1.0, %v5489_v18  ;;  %v2299_v58 = vadd.f32 %v6585_v15, %v8122_v24  ;;  %v6805_v9 = vpop.f32.mrb[55].mxu1  ;;  %v6808_v43 = vmul.f32 %v894_v28, %v6731_v1  ;;  %v6810_v21 = vmul.f32 0.5, %v773_v19  ;;  %v5243_v47 = vld [vmem:[#allocation8 + $0x250] ss:$8 sps:$4 sm:$0xff]  }
 0x229   : > { %2746 = vmatpush1.bf16.msra.mxu0 %v5237_v8  ;;  %v5491_v8 = vpop.eup %5490  ;;  %v2405_v51 = vmul.f32 0.70710677, %v2297_v48  ;;  %v2303_v20 = vadd.f32 %v6604_v22, %v8121_v29  ;;  %5502 = verf.f32 %v2404_v16  ;;  %v2305_v15 = vadd.f32 %v6614_v14, %v8122_v24  ;;  %v5248_v14 = vld [vmem:[#allocation8 + $0x264] ss:$8 sps:$4 sm:$0xff]  }
 0x22a   : > { %2747 = vmatprep.subr.bf16.mxu0 %v5242_v3  ;;  %v5493_v3 = vpop.eup %5492  ;;  %v898_v18 = vadd.f32 1.0, %v5491_v8  ;;  %v2406_v2 = vmul.f32 0.70710677, %v2299_v58  ;;  %v6816_v40 = vmul.f32 0.5, %v2293_v26  ;;  %v6818_v1 = vmul.f32 0.5, %v2295_v62 }
 0x22b   : > { %5504 = verf.f32 %v2405_v51  ;;  %v2407_v19 = vmul.f32 0.70710677, %v2303_v20  ;;  %v6821_v22 = vmul.f32 %v895_v39, %v6740_v6  ;;  %v6827_v16 = vmul.f32 %v897_v46, %v6749_v59  ;;  %v5246_v46 = vld [vmem:[#allocation8 + $0x260] ss:$8 sps:$4 sm:$0xff]  }
 0x22c   : > { %1994 = vmatmul.mubr.bf16.gmra.mrb[40].mxu0 %v939_v13  ;;  %v5495_v28 = vpop.eup %5494  ;;  %v6824_v13 = vmul.f32 %v896_v63, %v6742_v42  ;;  %5506 = verf.f32 %v2406_v2  ;;  %v899_v26 = vadd.f32 1.0, %v5493_v3  ;;  %v2408_v62 = vmul.f32 0.70710677, %v2305_v15 }
 0x22d   : > { %2748 = vmatpush1.bf16.msra.mxu0 %v5240_v25  ;;  %2003 = vmatprep.mubr.bf16.mxu0 %v942_v44  ;;  %v5497_v44 = vpop.eup %5496  ;;  %v6829_v25 = vmul.f32 0.5, %v2297_v48  ;;  %5508 = verf.f32 %v2407_v19  ;;  %v6831_v8 = vpop.f32.mrb[56].mxu1  ;;  %v6834_v6 = vmul.f32 %v898_v18, %v6761_v45  ;;  %v2307_v59 = vadd.f32 %v6619_v31, %v8121_v29  ;;  %v5251_v31 = vld [vmem:[#allocation8 + $0x274] ss:$8 sps:$4 sm:$0xff]  }
 0x22e   : > { %2749 = vmatprep.subr.bf16.mxu0 %v5245_v4  ;;  %v6842_v63 = vpop.f32.mrb[57].mxu1  ;;  %v900_v48 = vadd.f32 1.0, %v5495_v28  ;;  %5510 = verf.f32 %v2408_v62  ;;  %v2309_v4 = vadd.f32 %v6623_v52, %v8122_v24  ;;  %v2313_v45 = vadd.f32 %v6642_v33, %v8121_v29 }
 0x22f   : > { %v6848_v51 = vpop.f32.mrb[58].mxu1  ;;  %v901_v18 = vadd.f32 1.0, %v5497_v44  ;;  %v2409_v2 = vmul.f32 0.70710677, %v2307_v59  ;;  %v2315_v19 = vadd.f32 %v6644_v10, %v8122_v24  ;;  %v6856_v52 = vmul.f32 0.5, %v2299_v58 }
 0x230   : > { %v5499_v3 = vpop.eup %5498  ;;  %v6854_v28 = vpop.f32.mrb[59].mxu1  ;;  %v6858_v39 = vmul.f32 0.5, %v2303_v20  ;;  %v6860_v33 = vmul.f32 0.5, %v2305_v15  ;;  %v2410_v42 = vmul.f32 0.70710677, %v2309_v4  ;;  %v8126_v10 = vpack.c.bf16 %v6712_v55, %v6704_v37 }
 0x231   : > { %2750 = vmatpush1.bf16.msra.mxu0 %v5243_v47  ;;  %8125 = vst [vmem:[#allocation22_spill] sm:$0xff] %v6854_v28  ;;  %v5501_v62 = vpop.eup %5500  ;;  %5512 = verf.f32 %v2409_v2  ;;  %v2411_v47 = vmul.f32 0.70710677, %v2313_v45  ;;  %v6869_v28 = vmul.f32 %v900_v48, %v6780_v61  ;;  %v902_v58 = vadd.f32 1.0, %v5499_v3  ;;  %v5249_v15 = vld [vmem:[#allocation8 + $0x270] ss:$8 sps:$4 sm:$0xff]  }
 0x232   : > { %2751 = vmatprep.subr.bf16.mxu0 %v5248_v14  ;;  %v6863_v14 = vmul.f32 %v899_v26, %v6776_v60  ;;  %v2467_v44 = vadd.f32 1.0, %v5501_v62  ;;  %v8127_v20 = vpack.c.bf16 %v6774_v49, %v6754_v17  ;;  %5514 = verf.f32 %v2410_v42  ;;  %v5254_v37 = vld [vmem:[#allocation8 + $0x284] ss:$8 sps:$4 sm:$0xff]  }
 0x233   : > { %v2412_v60 = vmul.f32 0.70710677, %v2315_v19  ;;  %v5503_v26 = vpop.eup %5502  ;;  %v6875_v62 = vmul.f32 %v901_v18, %v6782_v0  ;;  %5516 = verf.f32 %v2411_v47  ;;  %v2317_v55 = vadd.f32 %v6655_v32, %v8121_v29  ;;  %v5252_v18 = vld [vmem:[#allocation8 + $0x280] ss:$8 sps:$4 sm:$0xff]  }
 0x234   : > { %2004 = vmatmul.mubr.bf16.gmra.mrb[44].mxu0 %v8126_v10  ;;  %v2319_v17 = vadd.f32 %v6663_v12, %v8122_v24  ;;  %v2323_v49 = vadd.f32 %v6683_v41, %v8121_v29  ;;  %v6890_v3 = vmul.f32 %v2467_v44, %v6816_v40  ;;  %v6897_v12 = vmul.f32 %v902_v58, %v6810_v21 }
 0x235   : > { %2752 = vmatpush1.bf16.msra.mxu0 %v5246_v46  ;;  %2013 = vmatprep.mubr.bf16.mxu0 %v8127_v20  ;;  %v5505_v48 = vpop.eup %5504  ;;  %v6881_v46 = vmul.f32 0.5, %v2307_v59  ;;  %5518 = verf.f32 %v2412_v60  ;;  %v6887_v0 = vpop.f32.mrb[60].mxu1  ;;  %v2325_v59 = vadd.f32 %v6692_v27, %v8122_v24  ;;  %v6899_v41 = vmul.f32 0.5, %v2309_v4  ;;  %v5257_v27 = vld [vmem:[#allocation8 + $0x294] ss:$8 sps:$4 sm:$0xff]  }
 0x236   : > { %2753 = vmatprep.subr.bf16.mxu0 %v5251_v31  ;;  %v5507_v42 = vpop.eup %5506  ;;  %v2469_v32 = vadd.f32 1.0, %v5505_v48  ;;  %v2413_v31 = vmul.f32 0.70710677, %v2317_v55  ;;  %v6894_v2 = vpop.f32.mrb[61].mxu1  ;;  %v6901_v10 = vmul.f32 0.5, %v2313_v45  ;;  %v2468_v44 = vadd.f32 1.0, %v5503_v26 }
 0x237   : > { %v5509_v47 = vpop.eup %5508  ;;  %v2414_v20 = vmul.f32 0.70710677, %v2319_v17  ;;  %v6903_v40 = vpop.f32.mrb[62].mxu1  ;;  %v2415_v48 = vmul.f32 0.70710677, %v2323_v49  ;;  %v2470_v58 = vadd.f32 1.0, %v5507_v42 }
 0x238   : > { %8128 = vst [vmem:[#allocation20_spill] sm:$0xff] %v6903_v40  ;;  %v6906_v60 = vmul.f32 %v2469_v32, %v6829_v25  ;;  %5520 = verf.f32 %v2413_v31  ;;  %v6908_v61 = vpop.f32.mrb[63].mxu1  ;;  %v5511_v21 = vpop.eup %5510  ;;  %v2416_v4 = vmul.f32 0.70710677, %v2325_v59  ;;  %v2471_v40 = vadd.f32 1.0, %v5509_v47 }
 0x239   : > { %2754 = vmatpush1.bf16.msra.mxu0 %v5249_v15  ;;  %v6910_v15 = vmul.f32 0.5, %v2315_v19  ;;  %5522 = verf.f32 %v2414_v20  ;;  %v2472_v26 = vadd.f32 1.0, %v5511_v21  ;;  %v8129_v25 = vpack.c.bf16 %v6759_v36, %v6747_v23  ;;  %v5255_v42 = vld [vmem:[#allocation8 + $0x290] ss:$8 sps:$4 sm:$0xff]   ;;  %v5260_v36 = vld [vmem:[#allocation8 + $0x2a4] ss:$8 sps:$4 sm:$0xff]  }
 0x23a   : > { %2755 = vmatprep.subr.bf16.mxu0 %v5254_v37  ;;  %5524 = verf.f32 %v2415_v48  ;;  %v8130_v37 = vpack.c.bf16 %v6808_v43, %v6790_v57  ;;  %v2327_v32 = vadd.f32 %v6701_v53, %v8121_v29  ;;  %v6927_v23 = vmul.f32 %v2468_v44, %v6818_v1  ;;  %v5258_v45 = vld [vmem:[#allocation8 + $0x2a0] ss:$8 sps:$4 sm:$0xff]   ;;  %v5263_v31 = vld [vmem:[#allocation8 + $0x2b4] ss:$8 sps:$4 sm:$0xff]  }
 0x23b   : > { %5526 = verf.f32 %v2416_v4  ;;  %v5513_v47 = vpop.eup %5512  ;;  %v2329_v57 = vadd.f32 %v6716_v54, %v8122_v24  ;;  %v2333_v43 = vadd.f32 %v6735_v11, %v8121_v29  ;;  %v6935_v48 = vmul.f32 0.5, %v2319_v17 }
 0x23c   : > { %2014 = vmatmul.mubr.bf16.gmra.mrb[48].mxu0 %v8129_v25  ;;  %v5515_v20 = vpop.eup %5514  ;;  %v2417_v53 = vmul.f32 0.70710677, %v2327_v32  ;;  %v2335_v21 = vadd.f32 %v6744_v38, %v8122_v24  ;;  %v6946_v54 = vmul.f32 0.5, %v2323_v49  ;;  %v6948_v4 = vmul.f32 0.5, %v2325_v59 }
 0x23d   : > { %2756 = vmatpush1.bf16.msra.mxu0 %v5252_v18  ;;  %2023 = vmatprep.mubr.bf16.mxu0 %v8130_v37  ;;  %v6929_v18 = vmul.f32 0.5, %v2317_v55  ;;  %v6941_v44 = vpop.f32.mrb[64].mxu1  ;;  %v5517_v55 = vpop.eup %5516  ;;  %v2418_v11 = vmul.f32 0.70710677, %v2329_v57  ;;  %v6953_v37 = vmul.f32 %v2471_v40, %v6858_v39  ;;  %v6956_v38 = vmul.f32 %v2472_v26, %v6860_v33 }
 0x23e   : > { %2757 = vmatprep.subr.bf16.mxu0 %v5257_v27  ;;  %v6944_v27 = vmul.f32 %v2470_v58, %v6856_v52  ;;  %v6950_v17 = vpop.f32.mrb[65].mxu1  ;;  %5528 = verf.f32 %v2417_v53  ;;  %v2419_v1 = vmul.f32 0.70710677, %v2333_v43  ;;  %v2473_v49 = vadd.f32 1.0, %v5513_v47 }
 0x23f   : > { %8131 = vst [vmem:[#allocation21_spill] sm:$0xff] %v6950_v17  ;;  %v5519_v25 = vpop.eup %5518  ;;  %v6958_v52 = vpop.f32.mrb[66].mxu1  ;;  %v2474_v58 = vadd.f32 1.0, %v5515_v20  ;;  %v2475_v59 = vadd.f32 1.0, %v5517_v55  ;;  %5530 = verf.f32 %v2418_v11  ;;  %v2420_v39 = vmul.f32 0.70710677, %v2335_v21 }
 0x240   : > { %v6960_v19 = vpop.f32.mrb[67].mxu1  ;;  %v2476_v17 = vadd.f32 1.0, %v5519_v25  ;;  %5532 = verf.f32 %v2419_v1  ;;  %v2337_v33 = vadd.f32 %v6751_v56, %v8121_v29  ;;  %v8132_v26 = vpack.c.bf16 %v6795_v35, %v6787_v50  ;;  %v5261_v1 = vld [vmem:[#allocation8 + $0x2b0] ss:$8 sps:$4 sm:$0xff]  }
 0x241   : > { %2758 = vmatpush1.bf16.msra.mxu0 %v5255_v42  ;;  %v6967_v42 = vmul.f32 0.5, %v2327_v32  ;;  %v2339_v47 = vadd.f32 %v6756_v5, %v8122_v24  ;;  %v2343_v20 = vadd.f32 %v6784_v30, %v8121_v29  ;;  %v8133_v56 = vpack.c.bf16 %v6834_v6, %v6824_v13  ;;  %v5266_v30 = vld [vmem:[#allocation8 + $0x2c4] ss:$8 sps:$4 sm:$0xff]  }
 0x242   : > { %2759 = vmatprep.subr.bf16.mxu0 %v5260_v36  ;;  %v5521_v40 = vpop.eup %5520  ;;  %v6978_v50 = vmul.f32 0.5, %v2329_v57  ;;  %v6980_v35 = vmul.f32 0.5, %v2333_v43  ;;  %5534 = verf.f32 %v2420_v39  ;;  %v2421_v32 = vmul.f32 0.70710677, %v2337_v33 }
 0x243   : > { %v5523_v53 = vpop.eup %5522  ;;  %v6983_v55 = vmul.f32 %v2473_v49, %v6881_v46  ;;  %v6986_v11 = vmul.f32 %v2474_v58, %v6899_v41  ;;  %v2422_v13 = vmul.f32 0.70710677, %v2339_v47  ;;  %v6991_v57 = vmul.f32 %v2475_v59, %v6901_v10  ;;  %v5264_v49 = vld [vmem:[#allocation8 + $0x2c0] ss:$8 sps:$4 sm:$0xff]   ;;  %v5269_v10 = vld [vmem:[#allocation8 + $0x2d4] ss:$8 sps:$4 sm:$0xff]  }
 0x244   : > { %2024 = vmatmul.mubr.bf16.gmra.mrb[52].mxu0 %v8132_v26  ;;  %v5525_v5 = vpop.eup %5524  ;;  %v6994_v43 = vmul.f32 %v2476_v17, %v6910_v15  ;;  %5536 = verf.f32 %v2421_v32  ;;  %v2423_v25 = vmul.f32 0.70710677, %v2343_v20  ;;  %v2477_v46 = vadd.f32 1.0, %v5521_v40 }
 0x245   : > { %2760 = vmatpush1.bf16.msra.mxu0 %v5258_v45  ;;  %2033 = vmatprep.mubr.bf16.mxu0 %v8133_v56  ;;  %v6988_v45 = vmul.f32 0.5, %v2335_v21  ;;  %v5527_v6 = vpop.eup %5526  ;;  %v6996_v39 = vpop.f32.mrb[68].mxu1  ;;  %v6998_v41 = vmul.f32 0.5, %v2337_v33  ;;  %5538 = verf.f32 %v2422_v13  ;;  %v2478_v58 = vadd.f32 1.0, %v5523_v53 }
 0x246   : > { %2761 = vmatprep.subr.bf16.mxu0 %v5263_v31  ;;  %v2345_v31 = vadd.f32 %v6792_v34, %v8122_v24  ;;  %v7002_v21 = vpop.f32.mrb[69].mxu1  ;;  %v7004_v59 = vmul.f32 0.5, %v2339_v47  ;;  %v2347_v15 = vadd.f32 %v6799_v7, %v8121_v29  ;;  %v2349_v17 = vadd.f32 %v6805_v9, %v8122_v24 }
 0x247   : > { %v7010_v40 = vpop.f32.mrb[70].mxu1  ;;  %v2479_v33 = vadd.f32 1.0, %v5525_v5  ;;  %v2480_v26 = vadd.f32 1.0, %v5527_v6  ;;  %v7016_v47 = vmul.f32 0.5, %v2343_v20  ;;  %5540 = verf.f32 %v2423_v25 }
 0x248   : > { %v2424_v56 = vmul.f32 0.70710677, %v2345_v31  ;;  %v7014_v53 = vpop.f32.mrb[71].mxu1  ;;  %v2425_v32 = vmul.f32 0.70710677, %v2347_v15  ;;  %v7019_v9 = vmul.f32 %v2477_v46, %v6929_v18  ;;  %v8134_v5 = vpack.c.bf16 %v6827_v16, %v6821_v22 }
 0x249   : > { %2762 = vmatpush1.bf16.msra.mxu0 %v5261_v1  ;;  %v5529_v1 = vpop.eup %5528  ;;  %v2426_v7 = vmul.f32 0.70710677, %v2349_v17  ;;  %v2355_v6 = vadd.f32 %v6842_v63, %v8122_v24  ;;  %v7029_v25 = vmul.f32 %v2478_v58, %v6935_v48  ;;  %v8135_v18 = vpack.c.bf16 %v6897_v12, %v6869_v28  ;;  %v5267_v46 = vld [vmem:[#allocation8 + $0x2d0] ss:$8 sps:$4 sm:$0xff]  }
 0x24a   : > { %2763 = vmatprep.subr.bf16.mxu0 %v5266_v30  ;;  %v5531_v13 = vpop.eup %5530  ;;  %5542 = verf.f32 %v2424_v56  ;;  %v2353_v30 = vadd.f32 %v6831_v8, %v8121_v29  ;;  %v2357_v22 = vadd.f32 %v6848_v51, %v8121_v29  ;;  %v7039_v8 = vmul.f32 %v2479_v33, %v6946_v54 }
 0x24b   : > { %v5533_v20 = vpop.eup %5532  ;;  %5544 = verf.f32 %v2425_v32  ;;  %v7042_v63 = vmul.f32 %v2480_v26, %v6948_v4  ;;  %v2481_v48 = vadd.f32 1.0, %v5529_v1  ;;  %v7044_v58 = vmul.f32 0.5, %v2345_v31  ;;  %v8136_v31 = vld [vmem:[#allocation22_spill] sm:$0xff] }
 0x24c   : > { %2034 = vmatmul.mubr.bf16.gmra.mrb[56].mxu0 %v8134_v5  ;;  %v5535_v28 = vpop.eup %5534  ;;  %v2482_v12 = vadd.f32 1.0, %v5531_v13  ;;  %5546 = verf.f32 %v2426_v7  ;;  %v2427_v56 = vmul.f32 0.70710677, %v2353_v30  ;;  %v2428_v32 = vmul.f32 0.70710677, %v2355_v6 }
 0x24d   : > { %2764 = vmatpush1.bf16.msra.mxu0 %v5264_v49  ;;  %2043 = vmatprep.mubr.bf16.mxu0 %v8135_v18  ;;  %v5272_v49 = vld [vmem:[#allocation8 + $0x2e4] ss:$8 sps:$4 sm:$0xff]   ;;  %v7046_v51 = vpop.f32.mrb[72].mxu1  ;;  %v2483_v5 = vadd.f32 1.0, %v5533_v20  ;;  %v7048_v18 = vmul.f32 0.5, %v2347_v15  ;;  %v7050_v54 = vmul.f32 0.5, %v2349_v17  ;;  %v2359_v1 = vadd.f32 %v8136_v31, %v8122_v24 }
 0x24e   : > { %2765 = vmatprep.subr.bf16.mxu0 %v5269_v10  ;;  %v2429_v33 = vmul.f32 0.70710677, %v2357_v22  ;;  %v7052_v4 = vpop.f32.mrb[73].mxu1  ;;  %v5537_v26 = vpop.eup %5536  ;;  %v5270_v10 = vld [vmem:[#allocation8 + $0x2e0] ss:$8 sps:$4 sm:$0xff]   ;;  %5548 = verf.f32 %v2427_v56  ;;  %v2363_v13 = vadd.f32 %v6887_v0, %v8121_v29  ;;  %v7063_v20 = vmul.f32 %v2481_v48, %v6967_v42 }
 0x24f   : > { %v7060_v15 = vpop.f32.mrb[74].mxu1  ;;  %v5539_v17 = vpop.eup %5538  ;;  %v2484_v16 = vadd.f32 1.0, %v5535_v28  ;;  %5550 = verf.f32 %v2428_v32  ;;  %v2365_v56 = vadd.f32 %v6894_v2, %v8122_v24  ;;  %v7070_v7 = vmul.f32 %v2482_v12, %v6978_v50  ;;  %v5273_v48 = vld [vmem:[#allocation8 + $0x2f0] ss:$8 sps:$4 sm:$0xff]   ;;  %v2916_v28 = vld [vmem:[#allocation7 + $0x6] sm:$0x3] }
 0x250   : > { %8137 = vst [vmem:[#allocation23_spill] sm:$0xff] %v7060_v15  ;;  %v7067_v31 = vpop.f32.mrb[75].mxu1  ;;  %v2485_v34 = vadd.f32 1.0, %v5537_v26  ;;  %v7072_v0 = vmul.f32 0.5, %v2353_v30  ;;  %v2430_v36 = vmul.f32 0.70710677, %v2359_v1  ;;  %v7075_v15 = vmul.f32 %v2483_v5, %v6980_v35 }
 0x251   : > { %2766 = vmatpush1.bf16.msra.mxu0 %v5267_v46  ;;  %v5275_v46 = vld [vmem:[#allocation8 + $0x2f4] ss:$8 sps:$4 sm:$0xff]   ;;  %v8138_v42 = vpack.c.bf16 %v6875_v62, %v6863_v14  ;;  %v7082_v2 = vmul.f32 0.5, %v2357_v22  ;;  %5552 = verf.f32 %v2429_v33  ;;  %v5541_v50 = vpop.eup %5540  ;;  %v2486_v12 = vadd.f32 1.0, %v5539_v17  ;;  %v5278_v62 = vld [vmem:[#allocation8 + $0x304] ss:$8 sps:$4 sm:$0xff]  }
 0x252   : > { %2767 = vmatprep.subr.bf16.mxu0 %v5272_v49  ;;  %v7080_v49 = vmul.f32 0.5, %v2355_v6  ;;  %v8139_v30 = vpack.c.bf16 %v6944_v27, %v6927_v23  ;;  %5554 = verf.f32 %v2430_v36  ;;  %v2431_v35 = vmul.f32 0.70710677, %v2363_v13  ;;  %v8140_v22 = vld [vmem:[#allocation20_spill] sm:$0xff]  ;;  %v8141_v17 = vld [vmem:[#allocation18_spill] sm:$0xff]  ;;  %v8142_v36 = vld [vmem:[#allocation19_spill] sm:$0xff] }
 0x253   : > { %v2432_v32 = vmul.f32 0.70710677, %v2365_v56  ;;  %v7088_v14 = vmul.f32 %v2484_v16, %v6988_v45  ;;  %v7090_v6 = vmul.f32 0.5, %v2359_v1  ;;  %v2367_v33 = vadd.f32 %v8140_v22, %v8121_v29 }
 0x254   : > { %2044 = vmatmul.mubr.bf16.gmra.mrb[60].mxu0 %v8138_v42  ;;  %v5543_v5 = vpop.eup %5542  ;;  %v7097_v23 = vmul.f32 %v2485_v34, %v6998_v41  ;;  %v2369_v27 = vadd.f32 %v6908_v61, %v8122_v24  ;;  %v2487_v16 = vadd.f32 1.0, %v5541_v50  ;;  %v7105_v1 = vmul.f32 0.5, %v2363_v13  ;;  %v5276_v61 = vld [vmem:[#allocation8 + $0x300] ss:$8 sps:$4 sm:$0xff]   ;;  %v5281_v50 = vld [vmem:[#allocation8 + $0x314] ss:$8 sps:$4 sm:$0xff]  }
 0x255   : > { %2768 = vmatpush1.bf16.msra.mxu0 %v5270_v10  ;;  %2771 = vmatprep.mubr.bf16.mxu0 %v8139_v30  ;;  %v5545_v10 = vpop.eup %5544  ;;  %5556 = verf.f32 %v2432_v32  ;;  %v7103_v45 = vpop.f32.mrb[76].mxu1  ;;  %v2433_v29 = vmul.f32 0.70710677, %v2367_v33  ;;  %v7113_v34 = vmul.f32 %v2486_v12, %v7004_v59  ;;  %v2488_v24 = vadd.f32 1.0, %v5543_v5  ;;  %v5279_v12 = vld [vmem:[#allocation8 + $0x310] ss:$8 sps:$4 sm:$0xff]  }
 0x256   : > { %2769 = vmatprep.subr.bf16.mxu0 %v5275_v46  ;;  %v7108_v46 = vrot.slane %v2916_v28, %v8141_v17  ;;  %v7110_v42 = vpop.f32.mrb[77].mxu1  ;;  %v5547_v41 = vpop.eup %5546  ;;  %5558 = verf.f32 %v2431_v35  ;;  %v2434_v30 = vmul.f32 0.70710677, %v2369_v27  ;;  %v2489_v13 = vadd.f32 1.0, %v5545_v10 }
 0x257   : > { %v7115_v32 = vpop.f32.mrb[78].mxu1  ;;  %5560 = verf.f32 %v2433_v29  ;;  %v7120_v26 = vrot.slane %v2916_v28, %v8142_v36  ;;  %v2490_v28 = vadd.f32 1.0, %v5547_v41 }
 0x258   : > { %v3123_v22 = vadd.f32 %v6941_v44, %v7108_v46  ;;  %v7122_v17 = vpop.f32.mrb[79].mxu1  ;;  %v5549_v59 = vpop.eup %5548  ;;  %5562 = verf.f32 %v2434_v30  ;;  %v3127_v35 = vadd.f32 %v6958_v52, %v7108_v46  ;;  %v8143_v44 = vpack.c.bf16 %v6906_v60, %v6890_v3 }
 0x259   : > { %2770 = vmatpush1.bf16.msra.mxu0 %v5273_v48  ;;  %v7124_v48 = vmul.f32 0.5, %v2365_v56  ;;  %v5551_v5 = vpop.eup %5550  ;;  %v8144_v56 = vld [vmem:[#allocation21_spill] sm:$0xff]  ;;  %v7139_v30 = vmul.f32 %v2488_v24, %v7044_v58  ;;  %v8145_v52 = vpack.c.bf16 %v6986_v11, %v6956_v38  ;;  %v7149_v41 = vmul.f32 %v2489_v13, %v7048_v18  ;;  %v5284_v58 = vld [vmem:[#allocation8 + $0x324] ss:$8 sps:$4 sm:$0xff]   ;;  %v5282_v18 = vld [vmem:[#allocation8 + $0x320] ss:$8 sps:$4 sm:$0xff]  }
 0x25a   : > { %3569 = vmatprep.subr.bf16.mxu0 %v5278_v62  ;;  %v7131_v62 = vmul.f32 %v2487_v16, %v7016_v47  ;;  %v3233_v10 = vmul.f32 0.70710677, %v3123_v22  ;;  %v3125_v29 = vadd.f32 %v8144_v56, %v7120_v26  ;;  %v7144_v47 = vmul.f32 0.5, %v2367_v33 }
 0x25b   : > { %v3235_v16 = vmul.f32 0.70710677, %v3127_v35  ;;  %v5553_v60 = vpop.eup %5552  ;;  %v7151_v24 = vmul.f32 0.5, %v2369_v27  ;;  %v2492_v38 = vadd.f32 1.0, %v5551_v5  ;;  %v3129_v33 = vadd.f32 %v6960_v19, %v7120_v26 }
 0x25c   : > { %2772 = vmatmul.mubr.bf16.vlgmr.msra.gmra.mrb[32].mxu0 %v8143_v44  ;;  %v2491_v44 = vadd.f32 1.0, %v5549_v59  ;;  %5564 = verf.f32 %v3233_v10  ;;  %v3234_v11 = vmul.f32 0.70710677, %v3125_v29  ;;  %v3133_v27 = vadd.f32 %v6996_v39, %v7108_v46 }
 0x25d   : > { %3570 = vmatpush1.bf16.msra.mxu0 %v5276_v61  ;;  %2781 = vmatprep.mubr.bf16.mxu0 %v8145_v52  ;;  %v5555_v61 = vpop.eup %5554  ;;  %5566 = verf.f32 %v3235_v16  ;;  %v7155_v56 = vpop.f32.mrb[80].mxu1  ;;  %v7158_v52 = vmul.f32 %v2490_v28, %v7050_v54  ;;  %v7164_v59 = vadd.f32 %v7002_v21, %v7120_v26  ;;  %v2493_v19 = vadd.f32 1.0, %v5553_v60 }
 0x25e   : > { %3571 = vmatprep.subr.bf16.mxu0 %v5281_v50  ;;  %v2494_v13 = vadd.f32 1.0, %v5555_v61  ;;  %v5287_v50 = vld [vmem:[#allocation8 + $0x334] ss:$8 sps:$4 sm:$0xff]   ;;  %v7166_v5 = vpop.f32.mrb[81].mxu1  ;;  %v3201_v16 = vmul.f32 0.5, %v3123_v22  ;;  %5568 = verf.f32 %v3234_v11  ;;  %v7171_v28 = vmul.f32 %v2491_v44, %v7072_v0 }
 0x25f   : > { %8146 = vst [vmem:[#allocation24_spill] sm:$0xff] %v7166_v5  ;;  %v5557_v10 = vpop.eup %5556  ;;  %v3236_v3 = vmul.f32 0.70710677, %v3129_v33  ;;  %v7168_v54 = vpop.f32.mrb[82].mxu1  ;;  %v7173_v61 = vmul.f32 0.5, %v3125_v29  ;;  %v7175_v39 = vmul.f32 0.5, %v3127_v35  ;;  %v8147_v29 = vpack.c.bf16 %v6983_v55, %v6953_v37 }
 0x260   : > { %v3237_v21 = vmul.f32 0.70710677, %v3133_v27  ;;  %v7177_v36 = vpop.f32.mrb[83].mxu1  ;;  %v5559_v5 = vpop.eup %5558  ;;  %v7183_v22 = vmul.f32 %v2494_v13, %v7090_v6  ;;  %v3238_v60 = vmul.f32 0.70710677, %v7164_v59  ;;  %v2496_v35 = vadd.f32 1.0, %v5557_v10 }
 0x261   : > { %3572 = vmatpush1.bf16.msra.mxu0 %v5279_v12  ;;  %v7180_v12 = vmul.f32 %v2492_v38, %v7080_v49  ;;  %5570 = verf.f32 %v3236_v3  ;;  %v5561_v0 = vpop.eup %5560  ;;  %v7193_v49 = vadd.f32 %v7010_v40, %v7108_v46  ;;  %v7196_v6 = vmul.f32 %v2493_v19, %v7082_v2  ;;  %v5285_v37 = vld [vmem:[#allocation8 + $0x330] ss:$8 sps:$4 sm:$0xff]   ;;  %v5290_v11 = vld [vmem:[#allocation8 + $0x344] ss:$8 sps:$4 sm:$0xff]  }
 0x262   : > { %3573 = vmatprep.subr.bf16.mxu0 %v5284_v58  ;;  %5572 = verf.f32 %v3237_v21  ;;  %v5563_v58 = vpop.eup %5562  ;;  %v8148_v3 = vpack.c.bf16 %v7029_v25, %v6994_v43  ;;  %v3139_v38 = vadd.f32 %v7014_v53, %v7120_v26  ;;  %v2495_v40 = vadd.f32 1.0, %v5559_v5 }
 0x263   : > { %5574 = verf.f32 %v3238_v60  ;;  %v2498_v13 = vadd.f32 1.0, %v5563_v58  ;;  %v3239_v2 = vmul.f32 0.70710677, %v7193_v49  ;;  %v3204_v10 = vmul.f32 0.5, %v3129_v33 }
 0x264   : > { %2782 = vmatmul.mubr.bf16.gmra.mrb[36].mxu0 %v8147_v29  ;;  %v7208_v43 = vmul.f32 0.5, %v3133_v27  ;;  %v3240_v25 = vmul.f32 0.70710677, %v3139_v38  ;;  %v7212_v19 = vadd.f32 %v7046_v51, %v7108_v46  ;;  %v2497_v5 = vadd.f32 1.0, %v5561_v0  ;;  %v5288_v51 = vld [vmem:[#allocation8 + $0x340] ss:$8 sps:$4 sm:$0xff]  }
 0x265   : > { %3574 = vmatpush1.bf16.msra.mxu0 %v5282_v18  ;;  %2791 = vmatprep.mubr.bf16.mxu0 %v8148_v3  ;;  %v7214_v21 = vpop.f32.mrb[84].mxu1  ;;  %v7223_v33 = vadd.f32 %v7052_v4, %v7120_v26  ;;  %v7228_v58 = vmul.f32 %v2498_v13, %v7151_v24  ;;  %v8149_v18 = vld [vmem:[#allocation23_spill] sm:$0xff]  ;;  %v3149_v13 = vadd.f32 %v7067_v31, %v7120_v26 }
 0x266   : > { %3575 = vmatprep.subr.bf16.mxu0 %v5287_v50  ;;  %v5565_v53 = vpop.eup %5564  ;;  %v7217_v50 = vmul.f32 %v2496_v35, %v7124_v48  ;;  %v7225_v27 = vpop.f32.mrb[85].mxu1  ;;  %5576 = verf.f32 %v3240_v25  ;;  %v3241_v48 = vmul.f32 0.70710677, %v7212_v19  ;;  %v5293_v35 = vld [vmem:[#allocation8 + $0x354] ss:$8 sps:$4 sm:$0xff]   ;;  %v3147_v55 = vadd.f32 %v8149_v18, %v7108_v46 }
 0x267   : > { %v5567_v29 = vpop.eup %5566  ;;  %v3297_v3 = vadd.f32 1.0, %v5565_v53  ;;  %v7231_v0 = vpop.f32.mrb[86].mxu1  ;;  %5578 = verf.f32 %v3239_v2  ;;  %v3242_v4 = vmul.f32 0.70710677, %v7223_v33  ;;  %v7245_v25 = vmul.f32 %v2495_v40, %v7105_v1  ;;  %v5291_v18 = vld [vmem:[#allocation8 + $0x350] ss:$8 sps:$4 sm:$0xff]  }
 0x268   : > { %v3299_v60 = vadd.f32 1.0, %v5567_v29  ;;  %v5569_v44 = vpop.eup %5568  ;;  %5580 = verf.f32 %v3241_v48  ;;  %v8150_v2 = vpack.c.bf16 %v7019_v9, %v6991_v57  ;;  %v8151_v31 = vpack.c.bf16 %v7070_v7, %v7042_v63 }
 0x269   : > { %3576 = vmatpush1.bf16.msra.mxu0 %v5285_v37  ;;  %v7236_v37 = vpop.f32.mrb[87].mxu1  ;;  %v7238_v24 = vmul.f32 %v3297_v3, %v3201_v16  ;;  %v3298_v53 = vadd.f32 1.0, %v5569_v44  ;;  %5582 = verf.f32 %v3242_v4  ;;  %v3206_v3 = vmul.f32 0.5, %v7164_v59 }
 0x26a   : > { %3577 = vmatprep.subr.bf16.mxu0 %v5290_v11  ;;  %v7251_v29 = vmul.f32 %v3299_v60, %v7175_v39  ;;  %v3243_v1 = vmul.f32 0.70710677, %v3147_v55  ;;  %v3244_v40 = vmul.f32 0.70710677, %v3149_v13  ;;  %v3153_v57 = vadd.f32 %v7103_v45, %v7108_v46  ;;  %v5296_v39 = vld [vmem:[#allocation8 + $0x364] ss:$8 sps:$4 sm:$0xff]  }
 0x26b   : > { %v5571_v16 = vpop.eup %5570  ;;  %v7260_v44 = vmul.f32 %v2497_v5, %v7144_v47  ;;  %v7267_v59 = vmul.f32 0.5, %v7193_v49  ;;  %v3208_v48 = vmul.f32 0.5, %v3139_v38  ;;  %v7272_v47 = vmul.f32 %v3298_v53, %v7173_v61  ;;  %v5299_v49 = vld [vmem:[#allocation8 + $0x374] ss:$8 sps:$4 sm:$0xff]  }
 0x26c   : > { %2792 = vmatmul.mubr.bf16.gmra.mrb[40].mxu0 %v8150_v2  ;;  %v5573_v9 = vpop.eup %5572  ;;  %5584 = verf.f32 %v3243_v1  ;;  %v3245_v45 = vmul.f32 0.70710677, %v3153_v57  ;;  %v3157_v38 = vadd.f32 %v7115_v32, %v7108_v46  ;;  %v3159_v61 = vadd.f32 %v7122_v17, %v7120_v26 }
 0x26d   : > { %3578 = vmatpush1.bf16.msra.mxu0 %v5288_v51  ;;  %2801 = vmatprep.mubr.bf16.mxu0 %v8151_v31  ;;  %v3300_v51 = vadd.f32 1.0, %v5571_v16  ;;  %v5575_v7 = vpop.eup %5574  ;;  %v7269_v4 = vpop.f32.mrb[88].mxu1  ;;  %5586 = verf.f32 %v3244_v40  ;;  %v5294_v16 = vld [vmem:[#allocation8 + $0x360] ss:$8 sps:$4 sm:$0xff]   ;;  %v3209_v1 = vmul.f32 0.5, %v7212_v19  ;;  %v7294_v32 = vmul.f32 0.5, %v3147_v55 }
 0x26e   : > { %3579 = vmatprep.subr.bf16.mxu0 %v5293_v35  ;;  %v3155_v35 = vadd.f32 %v7110_v42, %v7120_v26  ;;  %v7278_v2 = vpop.f32.mrb[89].mxu1  ;;  %v3302_v31 = vadd.f32 1.0, %v5575_v7  ;;  %5588 = verf.f32 %v3245_v45  ;;  %v7292_v7 = vmul.f32 0.5, %v7223_v33  ;;  %v5297_v33 = vld [vmem:[#allocation8 + $0x370] ss:$8 sps:$4 sm:$0xff]  }
 0x26f   : > { %v7274_v5 = vmul.f32 %v3300_v51, %v3204_v10  ;;  %v7284_v53 = vpop.f32.mrb[90].mxu1  ;;  %v3301_v10 = vadd.f32 1.0, %v5573_v9  ;;  %v7296_v45 = vmul.f32 0.5, %v3149_v13  ;;  %v3247_v17 = vmul.f32 0.70710677, %v3157_v38 }
 0x270   : > { %v3246_v42 = vmul.f32 0.70710677, %v3155_v35  ;;  %v7289_v40 = vpop.f32.mrb[91].mxu1  ;;  %v5577_v51 = vpop.eup %5576  ;;  %v8152_v9 = vpack.c.bf16 %v7063_v20, %v7039_v8  ;;  %v8153_v55 = vpack.c.bf16 %v7113_v34, %v7088_v14  ;;  %v7306_v13 = vmul.f32 %v3302_v31, %v3206_v3  ;;  %v8155_v8 = vld [vmem:[#allocation24_spill] sm:$0xff] }
 0x271   : > { %3580 = vmatpush1.bf16.msra.mxu0 %v5291_v18  ;;  %v5579_v60 = vpop.eup %5578  ;;  %v3304_v19 = vadd.f32 1.0, %v5577_v51  ;;  %v3163_v18 = vadd.f32 %v7155_v56, %v7108_v46  ;;  %v7308_v11 = vmul.f32 0.5, %v3153_v57  ;;  %v3165_v20 = vadd.f32 %v8155_v8, %v7120_v26 }
 0x272   : > { %3581 = vmatprep.subr.bf16.mxu0 %v5296_v39  ;;  %5590 = verf.f32 %v3246_v42  ;;  %v3248_v39 = vmul.f32 0.70710677, %v3159_v61  ;;  %v5581_v63 = vpop.eup %5580  ;;  %8154 = vst [vmem:[#allocation22_spill] sm:$0xff] %v7306_v13  ;;  %v7315_v56 = vmul.f32 %v3301_v10, %v7208_v43  ;;  %v7319_v14 = vmul.f32 0.5, %v3155_v35  ;;  %v5300_v35 = vld [vmem:[#allocation8 + $0x380] ss:$8 sps:$4 sm:$0xff]  }
 0x273   : > { %v5583_v51 = vpop.eup %5582  ;;  %v3303_v34 = vadd.f32 1.0, %v5579_v60  ;;  %v3249_v3 = vmul.f32 0.70710677, %v3163_v18  ;;  %v3250_v57 = vmul.f32 0.70710677, %v3165_v20  ;;  %v3305_v31 = vadd.f32 1.0, %v5581_v63 }
 0x274   : > { %2802 = vmatmul.mubr.bf16.gmra.mrb[44].mxu0 %v8152_v9  ;;  %v7317_v9 = vmul.f32 %v3304_v19, %v3208_v48  ;;  %5592 = verf.f32 %v3248_v39  ;;  %v3173_v43 = vadd.f32 %v7214_v21, %v7108_v46  ;;  %v5305_v19 = vld [vmem:[#allocation8 + $0x394] ss:$8 sps:$4 sm:$0xff]   ;;  %v3306_v60 = vadd.f32 1.0, %v5583_v51 }
 0x275   : > { %3582 = vmatpush1.bf16.msra.mxu0 %v5294_v16  ;;  %2811 = vmatprep.mubr.bf16.mxu0 %v8153_v55  ;;  %v5302_v16 = vld [vmem:[#allocation8 + $0x384] ss:$8 sps:$4 sm:$0xff]   ;;  %5594 = verf.f32 %v3247_v17  ;;  %v3167_v55 = vadd.f32 %v7168_v54, %v7108_v46  ;;  %v7327_v10 = vpop.f32.mrb[92].mxu1  ;;  %v3175_v63 = vadd.f32 %v7225_v27, %v7120_v26  ;;  %v7335_v39 = vmul.f32 0.5, %v3157_v38 }
 0x276   : > { %3583 = vmatprep.subr.bf16.mxu0 %v5299_v49  ;;  %8156 = vst [vmem:[#allocation20_spill] sm:$0xff] %v7317_v9  ;;  %v3169_v49 = vadd.f32 %v7177_v36, %v7120_v26  ;;  %v5585_v48 = vpop.eup %5584  ;;  %5596 = verf.f32 %v3249_v3  ;;  %v7333_v17 = vpop.f32.mrb[93].mxu1  ;;  %v7337_v21 = vmul.f32 0.5, %v3159_v61  ;;  %v7342_v3 = vmul.f32 %v3303_v34, %v7267_v59 }
 0x277   : > { %v5587_v36 = vpop.eup %5586  ;;  %5598 = verf.f32 %v3250_v57  ;;  %v7339_v8 = vpop.f32.mrb[94].mxu1  ;;  %v7344_v42 = vmul.f32 0.5, %v3163_v18  ;;  %v8157_v38 = vpack.c.bf16 %v7097_v23, %v7075_v15  ;;  %v7351_v61 = vmul.f32 %v3305_v31, %v3209_v1  ;;  %v5303_v18 = vld [vmem:[#allocation8 + $0x390] ss:$8 sps:$4 sm:$0xff]   ;;  %v5308_v23 = vld [vmem:[#allocation8 + $0x3a4] ss:$8 sps:$4 sm:$0xff]  }
 0x278   : > { %v5589_v51 = vpop.eup %5588  ;;  %v3308_v27 = vadd.f32 1.0, %v5587_v36  ;;  %v3252_v54 = vmul.f32 0.70710677, %v3169_v49  ;;  %v7346_v13 = vpop.f32.mrb[95].mxu1  ;;  %v3253_v57 = vmul.f32 0.70710677, %v3173_v43  ;;  %v8158_v59 = vpack.c.bf16 %v7158_v52, %v7139_v30 }
 0x279   : > { %3584 = vmatpush1.bf16.msra.mxu0 %v5297_v33  ;;  %v3251_v33 = vmul.f32 0.70710677, %v3167_v55  ;;  %v7359_v34 = vmul.f32 %v3306_v60, %v7292_v7  ;;  %v3307_v36 = vadd.f32 1.0, %v5585_v48  ;;  %v3254_v9 = vmul.f32 0.70710677, %v3175_v63 }
 0x27a   : > { %3585 = vmatprep.subr.bf16.mxu0 %v5302_v16  ;;  %v7353_v16 = vmul.f32 0.5, %v3165_v20  ;;  %v3309_v1 = vadd.f32 1.0, %v5589_v51  ;;  %v3177_v20 = vadd.f32 %v7231_v0, %v7108_v46  ;;  %v3179_v31 = vadd.f32 %v7236_v37, %v7120_v26  ;;  %v5306_v37 = vld [vmem:[#allocation8 + $0x3a0] ss:$8 sps:$4 sm:$0xff]  }
 0x27b   : > { %5600 = verf.f32 %v3251_v33  ;;  %v7366_v30 = vmul.f32 %v3308_v27, %v7296_v45  ;;  %v7370_v52 = vadd.f32 %v7269_v4, %v7108_v46  ;;  %v3363_v7 = vpack.c.bf16 %v7342_v3, %v7315_v56  ;;  %v5311_v4 = vld [vmem:[#allocation8 + $0x3b4] ss:$8 sps:$4 sm:$0xff]   ;;  %v8170_v3 = vld [vmem:[#allocation19_spill] sm:$0xff] }
 0x27c   : > { %2812 = vmatmul.mubr.bf16.gmra.mrb[48].mxu0 %v8157_v38  ;;  %5602 = verf.f32 %v3252_v54  ;;  %v5591_v15 = vpop.eup %5590  ;;  %v3220_v60 = vmul.f32 0.5, %v3169_v49  ;;  %v3255_v0 = vmul.f32 0.70710677, %v3177_v20  ;;  %v7377_v45 = vmul.f32 %v3307_v36, %v7294_v32 }
 0x27d   : > { %3586 = vmatpush1.bf16.msra.mxu0 %v5300_v35  ;;  %2821 = vmatprep.mubr.bf16.mxu0 %v8158_v59  ;;  %5604 = verf.f32 %v3253_v57  ;;  %v3310_v35 = vadd.f32 1.0, %v5591_v15  ;;  %v3221_v33 = vmul.f32 0.5, %v3173_v43  ;;  %v3256_v51 = vmul.f32 0.70710677, %v3179_v31  ;;  %v5309_v15 = vld [vmem:[#allocation8 + $0x3b0] ss:$8 sps:$4 sm:$0xff]  }
 0x27e   : > { %3587 = vmatprep.subr.bf16.mxu0 %v5305_v19  ;;  %5606 = verf.f32 %v3254_v9  ;;  %v5593_v48 = vpop.eup %5592  ;;  %v7374_v19 = vmul.f32 0.5, %v3167_v55  ;;  %v7379_v27 = vmul.f32 0.5, %v3175_v63  ;;  %v3257_v38 = vmul.f32 0.70710677, %v7370_v52 }
 0x27f   : > { %v5595_v54 = vpop.eup %5594  ;;  %v3312_v9 = vadd.f32 1.0, %v5593_v48  ;;  %5608 = verf.f32 %v3255_v0  ;;  %v7384_v55 = vadd.f32 %v7278_v2, %v7120_v26  ;;  %v7387_v57 = vmul.f32 %v3309_v1, %v7308_v11  ;;  %v5314_v1 = vld [vmem:[#allocation8 + $0x3c4] ss:$8 sps:$4 sm:$0xff]  }
 0x280   : > { %v5597_v49 = vpop.eup %5596  ;;  %5610 = verf.f32 %v3256_v51  ;;  %v3366_v32 = vpack.c.bf16 %v7366_v30, %v7359_v34  ;;  %v7393_v43 = vadd.f32 %v7284_v53, %v7108_v46  ;;  %v8159_v59 = vpack.c.bf16 %v7149_v41, %v7131_v62 }
 0x281   : > { %3588 = vmatpush1.bf16.msra.mxu0 %v5303_v18  ;;  %v5599_v63 = vpop.eup %5598  ;;  %v7399_v2 = vmul.f32 %v3310_v35, %v7319_v14  ;;  %v3311_v18 = vadd.f32 1.0, %v5595_v54  ;;  %5612 = verf.f32 %v3257_v38  ;;  %v3258_v11 = vmul.f32 0.70710677, %v7384_v55 }
 0x282   : > { %3589 = vmatprep.subr.bf16.mxu0 %v5308_v23  ;;  %v8160_v36 = vpack.c.bf16 %v7183_v22, %v7180_v12  ;;  %v7406_v53 = vmul.f32 %v3312_v9, %v7337_v21  ;;  %v3314_v23 = vadd.f32 1.0, %v5599_v63  ;;  %v3259_v62 = vmul.f32 0.70710677, %v7393_v43 }
 0x283   : > { %v7411_v41 = vadd.f32 %v7289_v40, %v7120_v26  ;;  %v3223_v48 = vmul.f32 0.5, %v3177_v20  ;;  %5614 = verf.f32 %v3258_v11  ;;  %v7415_v12 = vadd.f32 %v7327_v10, %v7108_v46  ;;  %v5312_v10 = vld [vmem:[#allocation8 + $0x3c0] ss:$8 sps:$4 sm:$0xff]  }
 0x284   : > { %2822 = vmatmul.mubr.bf16.gmra.mrb[52].mxu0 %v8159_v59  ;;  %v3365_v22 = vpack.c.bf16 %v7377_v45, %v7351_v61  ;;  %v3313_v35 = vadd.f32 1.0, %v5597_v49  ;;  %v3224_v54 = vmul.f32 0.5, %v3179_v31  ;;  %5616 = verf.f32 %v3259_v62  ;;  %v5317_v49 = vld [vmem:[#allocation8 + $0x3d4] ss:$8 sps:$4 sm:$0xff]  }
 0x285   : > { %3590 = vmatpush1.bf16.msra.mxu0 %v5306_v37  ;;  %2831 = vmatprep.mubr.bf16.mxu0 %v8160_v36  ;;  %v5601_v14 = vpop.eup %5600  ;;  %v7420_v40 = vmul.f32 %v3311_v18, %v7335_v39  ;;  %v3260_v20 = vmul.f32 0.70710677, %v7411_v41  ;;  %v3261_v51 = vmul.f32 0.70710677, %v7415_v12  ;;  %v7425_v38 = vmul.f32 %v3314_v23, %v7353_v16 }
 0x286   : > { %3591 = vmatprep.subr.bf16.mxu0 %v5311_v4  ;;  %v5603_v21 = vpop.eup %5602  ;;  %v3315_v0 = vadd.f32 1.0, %v5601_v14  ;;  %v7429_v31 = vadd.f32 %v7333_v17, %v7120_v26  ;;  %v3368_v39 = vpack.c.bf16 %v7406_v53, %v7399_v2  ;;  %v3197_v11 = vadd.f32 %v7339_v8, %v7108_v46  ;;  %v5660_v53 = vld [vmem:[%s6193_s14] sm:$0xff] }
 0x287   : > { %v5605_v37 = vpop.eup %5604  ;;  %v3316_v9 = vadd.f32 1.0, %v5603_v21  ;;  %5618 = verf.f32 %v3260_v20  ;;  %v7438_v16 = vmul.f32 %v3313_v35, %v7344_v42  ;;  %v8161_v23 = vpack.c.bf16 %v7196_v6, %v7171_v28 }
 0x288   : > { %v5607_v4 = vpop.eup %5606  ;;  %v3317_v63 = vadd.f32 1.0, %v5605_v37  ;;  %v7441_v36 = vmul.f32 %v3315_v0, %v7374_v19  ;;  %5620 = verf.f32 %v3261_v51  ;;  %v3262_v17 = vmul.f32 0.70710677, %v7429_v31  ;;  %v5315_v19 = vld [vmem:[#allocation8 + $0x3d0] ss:$8 sps:$4 sm:$0xff]  }
 0x289   : > { %3592 = vmatpush1.bf16.msra.mxu0 %v5309_v15  ;;  %v7433_v59 = vmul.f32 %v3316_v9, %v3220_v60  ;;  %v3318_v18 = vadd.f32 1.0, %v5607_v4  ;;  %v5609_v15 = vpop.eup %5608  ;;  %v3225_v62 = vmul.f32 0.5, %v7370_v52  ;;  %v3263_v14 = vmul.f32 0.70710677, %v3197_v11  ;;  %v5318_v51 = vld [vmem:[#allocation8 + $0x3e0] ss:$8 sps:$4 sm:$0xff]  }
 0x28a   : > { %3593 = vmatprep.subr.bf16.mxu0 %v5314_v1  ;;  %v7447_v60 = vmul.f32 %v3317_v63, %v3221_v33  ;;  %v3199_v46 = vadd.f32 %v7346_v13, %v7120_v26  ;;  %v5611_v42 = vpop.eup %5610  ;;  %v8162_v8 = vpack.c.bf16 %v7228_v58, %v7217_v50  ;;  %v3319_v1 = vadd.f32 1.0, %v5609_v15  ;;  %v5320_v33 = vld [vmem:[#allocation8 + $0x3e4] ss:$8 sps:$4 sm:$0xff]   ;;  %v5323_v63 = vld [vmem:[#allocation8 + $0x3f4] ss:$8 sps:$4 sm:$0xff]  }
 0x28b   : > { %5622 = verf.f32 %v3262_v17  ;;  %v3367_v28 = vpack.c.bf16 %v7420_v40, %v7387_v57  ;;  %v3370_v6 = vpack.c.bf16 %v7433_v59, %v7425_v38  ;;  %v5613_v52 = vpop.eup %5612  ;;  %v7460_v26 = vmul.f32 %v3318_v18, %v7379_v27  ;;  %v5321_v15 = vld [vmem:[#allocation8 + $0x3f0] ss:$8 sps:$4 sm:$0xff]   ;;  %v5661_v38 = vld [vmem:[%s6193_s14 + $0x8] sm:$0xff]  ;;  %v5662_v59 = vld [vmem:[%s6193_s14 + $0x10] sm:$0xff] }
 0x28c   : > { %2832 = vmatmul.mubr.bf16.gmra.mrb[56].mxu0 %v8161_v23  ;;  %v3320_v13 = vadd.f32 1.0, %v5611_v42  ;;  %5624 = verf.f32 %v3263_v14  ;;  %v3264_v21 = vmul.f32 0.70710677, %v3199_v46  ;;  %v3351_v50 = vmul.f32 %v3319_v1, %v3223_v48 }
 0x28d   : > { %3594 = vmatpush1.bf16.msra.mxu0 %v5312_v10  ;;  %2841 = vmatprep.mubr.bf16.mxu0 %v8162_v8  ;;  %v3321_v58 = vadd.f32 1.0, %v5613_v52  ;;  %v3369_v35 = vpack.c.bf16 %v7441_v36, %v7438_v16  ;;  %v5615_v0 = vpop.eup %5614  ;;  %v3227_v9 = vmul.f32 0.5, %v7393_v43  ;;  %v3226_v4 = vmul.f32 0.5, %v7384_v55 }
 0x28e   : > { %3595 = vmatprep.subr.bf16.mxu0 %v5317_v49  ;;  %v3352_v37 = vmul.f32 %v3320_v13, %v3224_v54  ;;  %5626 = verf.f32 %v3264_v21  ;;  %v5617_v20 = vpop.eup %5616  ;;  %v3322_v27 = vadd.f32 1.0, %v5615_v0  ;;  %v3371_v10 = vpack.c.bf16 %v3351_v50, %v7447_v60  ;;  %v8167_v0 = vld [vmem:[#allocation22_spill] sm:$0xff] }
 0x28f   : > { %v3353_v48 = vmul.f32 %v3321_v58, %v3225_v62  ;;  %v3323_v49 = vadd.f32 1.0, %v5617_v20  ;;  %v3228_v16 = vmul.f32 0.5, %v7411_v41  ;;  %v8163_v43 = vpack.c.bf16 %v7260_v44, %v7245_v25  ;;  %v8166_v58 = vld [vmem:[#allocation20_spill] sm:$0xff] }
 0x290   : > { %v3372_v18 = vpack.c.bf16 %v3352_v37, %v7460_v26  ;;  %v8164_v55 = vpack.c.bf16 %v7274_v5, %v7272_v47  ;;  %v3354_v23 = vmul.f32 %v3322_v27, %v3226_v4  ;;  %v3229_v62 = vmul.f32 0.5, %v7415_v12 }
 0x291   : > { %3596 = vmatpush1.bf16.msra.mxu0 %v5315_v19  ;;  %v5619_v54 = vpop.eup %5618  ;;  %v3355_v36 = vmul.f32 %v3323_v49, %v3227_v9  ;;  %v3230_v25 = vmul.f32 0.5, %v7429_v31  ;;  %v3231_v44 = vmul.f32 0.5, %v3197_v11  ;;  %v3232_v47 = vmul.f32 0.5, %v3199_v46 }
 0x292   : > { %3597 = vmatprep.subr.bf16.mxu0 %v5320_v33  ;;  %v5621_v17 = vpop.eup %5620  ;;  %v3324_v60 = vadd.f32 1.0, %v5619_v54  ;;  %v8165_v12 = vpack.c.bf16 %v7251_v29, %v7238_v24  ;;  %v8168_v37 = vpack.c.bf16 %v8166_v58, %v8167_v0  ;;  %v3714_v24 = vld [vmem:[%s8075_s4] sm:$0x3]  ;;  %v8169_v29 = vld [vmem:[#allocation18_spill] sm:$0xff] }
 0x293   : > { %v3325_v14 = vadd.f32 1.0, %v5621_v17  ;;  %v3373_v41 = vpack.c.bf16 %v3355_v36, %v3353_v48  ;;  %v7505_v56 = vrot.slane %v3714_v24, %v8169_v29  ;;  %v7508_v61 = vrot.slane %v3714_v24, %v8170_v3  ;;  %v5666_v17 = vld [vmem:[%s6193_s14 + $0x30] sm:$0xff]  ;;  %v5672_v24 = vld [vmem:[%s6193_s14 + $0x60] sm:$0xff] }
 0x294   : > { %2842 = vmatmul.mubr.bf16.gmra.mrb[60].mxu0 %v8163_v43  ;;  %v3356_v8 = vmul.f32 %v3324_v60, %v3228_v16  ;;  %v5665_v43 = vld [vmem:[%s6193_s14 + $0x28] sm:$0xff] }
 0x295   : > { %3598 = vmatpush1.bf16.msra.mxu0 %v5318_v51  ;;  %3601 = vmatprep.mubr.bf16.mxu0 %v8164_v55  ;;  %v5623_v42 = vpop.eup %5622  ;;  %v3357_v52 = vmul.f32 %v3325_v14, %v3229_v62 }
 0x296   : > { %3599 = vmatprep.subr.bf16.mxu0 %v5323_v63  ;;  %v5625_v19 = vpop.eup %5624  ;;  %v3326_v1 = vadd.f32 1.0, %v5623_v42  ;;  %v3374_v5 = vpack.c.bf16 %v3356_v8, %v3354_v23 }
 0x297   : > { %v3327_v33 = vadd.f32 1.0, %v5625_v19 }
 0x298   : > { %v5627_v26 = vpop.eup %5626  ;;  %v3358_v13 = vmul.f32 %v3326_v1, %v3230_v25 }
 0x299   : > { %3600 = vmatpush1.bf16.msra.mxu0 %v5321_v15  ;;  %v3359_v21 = vmul.f32 %v3327_v33, %v3231_v44  ;;  %v3328_v50 = vadd.f32 1.0, %v5627_v26  ;;  %v5667_v15 = vld [vmem:[%s6193_s14 + $0x38] sm:$0xff]  ;;  %v5668_v44 = vld [vmem:[%s6193_s14 + $0x40] sm:$0xff]  ;;  %v5669_v33 = vld [vmem:[%s6193_s14 + $0x48] sm:$0xff] }
 0x29a   : > { %v5670_v26 = vld [vmem:[%s6193_s14 + $0x50] sm:$0xff] }
 0x29b   : > { %v3360_v31 = vmul.f32 %v3328_v50, %v3232_v47  ;;  %v3375_v11 = vpack.c.bf16 %v3359_v21, %v3357_v52  ;;  %v5671_v21 = vld [vmem:[%s6193_s14 + $0x58] sm:$0xff] }
 0x29c   : > { %3602 = vmatmul.mubr.bf16.vlgmr.msra.gmra.mrb[32].mxu0 %v8165_v12 }
 0x29d   : > { %3611 = vmatprep.mubr.bf16.mxu0 %v8168_v37  ;;  %v3376_v9 = vpack.c.bf16 %v3360_v31, %v3358_v13 }
 0x2a4   : > { %3612 = vmatmul.mubr.bf16.gmra.mrb[36].mxu0 %v3363_v7 }
 0x2a5   : > { %3621 = vmatprep.mubr.bf16.mxu0 %v3366_v32 }
 0x2ac   : > { %3622 = vmatmul.mubr.bf16.gmra.mrb[40].mxu0 %v3365_v22 }
 0x2ad   : > { %3631 = vmatprep.mubr.bf16.mxu0 %v3368_v39 }
 0x2b4   : > { %3632 = vmatmul.mubr.bf16.gmra.mrb[44].mxu0 %v3367_v28  ;;  %v5663_v28 = vld [vmem:[%s6193_s14 + $0x18] sm:$0xff] }
 0x2b5   : > { %3641 = vmatprep.mubr.bf16.mxu0 %v3370_v6 }
 0x2bc   : > { %3642 = vmatmul.mubr.bf16.gmra.mrb[48].mxu0 %v3369_v35 }
 0x2bd   : > { %3651 = vmatprep.mubr.bf16.mxu0 %v3372_v18  ;;  %v5664_v18 = vld [vmem:[%s6193_s14 + $0x20] sm:$0xff] }
 0x2c4   : > { %3652 = vmatmul.mubr.bf16.gmra.mrb[52].mxu0 %v3371_v10 }
 0x2c5   : > { %3661 = vmatprep.mubr.bf16.mxu0 %v3374_v5 }
 0x2cc   : > { %3662 = vmatmul.mubr.bf16.gmra.mrb[56].mxu0 %v3373_v41 }
 0x2cd   : > { %3671 = vmatprep.mubr.bf16.mxu0 %v3376_v9 }
 0x2d4   : > { %3672 = vmatmul.mubr.bf16.gmra.mrb[60].mxu0 %v3375_v11 }
 0x36f   : > { %v3603_v34 = vpop.f32.mrb[32].mxu0 }
 0x370   : > { %v3726_v30 = vadd.f32 %v7505_v56, %v3603_v34  ;;  %v3605_v7 = vpop.f32.mrb[33].mxu0 }
 0x371   : > { %v3727_v45 = vadd.f32 %v7508_v61, %v3605_v7  ;;  %v3607_v57 = vpop.f32.mrb[34].mxu0 }
 0x372   : > { %v3728_v32 = vadd.f32 %v7505_v56, %v3607_v57  ;;  %v3609_v2 = vpop.f32.mrb[35].mxu0  ;;  %v7514_v22 = vadd.f32 %v5660_v53, %v3726_v30 }
 0x373   : > { %v3729_v40 = vadd.f32 %v7508_v61, %v3609_v2  ;;  %v7518_v39 = vadd.f32 %v5661_v38, %v3727_v45  ;;  %v5673_v45 = vld [vmem:[%s6193_s14 + $0x68] sm:$0xff]  ;;  %v5674_v2 = vld [vmem:[%s6193_s14 + $0x70] sm:$0xff] }
 0x374   : > { %v7521_v46 = vadd.f32 %v5662_v59, %v3728_v32 }
 0x375   : > { %v7524_v6 = vadd.f32 %v5663_v28, %v3729_v40  ;;  %v3790_v35 = vadd.f32 %v7518_v39, %v7514_v22  ;;  %v5675_v40 = vld [vmem:[%s6193_s14 + $0x78] sm:$0xff] }
 0x377   : > { %3791 = vadd.xlane.f32.xlu0 %v3790_v35  ;;  %v3613_v20 = vpop.f32.mrb[36].mxu0  ;;  %v3793_v63 = vadd.f32 %v7524_v6, %v7521_v46 }
 0x378   : > { %v3730_v51 = vadd.f32 %v7505_v56, %v3613_v20  ;;  %v3615_v4 = vpop.f32.mrb[37].mxu0 }
 0x379   : > { %v3731_v27 = vadd.f32 %v7508_v61, %v3615_v4  ;;  %v3617_v10 = vpop.f32.mrb[38].mxu0 }
 0x37a   : > { %v3732_v48 = vadd.f32 %v7505_v56, %v3617_v10  ;;  %v3619_v49 = vpop.f32.mrb[39].mxu0  ;;  %v7534_v16 = vadd.f32 %v5664_v18, %v3730_v51  ;;  %v5676_v10 = vld [vmem:[%s6193_s14 + $0x80] sm:$0xff]  ;;  %v5677_v18 = vld [vmem:[%s6193_s14 + $0x88] sm:$0xff] }
 0x37b   : > { %v3733_v54 = vadd.f32 %v7508_v61, %v3619_v49  ;;  %3794 = vadd.xlane.f32.xlu0 %v3793_v63  ;;  %v7538_v36 = vadd.f32 %v5665_v43, %v3731_v27 }
 0x37c   : > { %v7541_v55 = vadd.f32 %v5666_v17, %v3732_v48  ;;  %v5678_v17 = vld [vmem:[%s6193_s14 + $0x90] sm:$0xff] }
 0x37d   : > { %v7544_v23 = vadd.f32 %v5667_v15, %v3733_v54  ;;  %v3796_v60 = vadd.f32 %v7538_v36, %v7534_v16 }
 0x37f   : > { %3797 = vadd.xlane.f32.xlu1 %v3796_v60  ;;  %v3623_v62 = vpop.f32.mrb[40].mxu0  ;;  %v3799_v25 = vadd.f32 %v7544_v23, %v7541_v55  ;;  %v5679_v60 = vld [vmem:[%s6193_s14 + $0x98] sm:$0xff] }
 0x380   : > { %v3734_v14 = vadd.f32 %v7505_v56, %v3623_v62  ;;  %v3625_v41 = vpop.f32.mrb[41].mxu0 }
 0x381   : > { %v3735_v42 = vadd.f32 %v7508_v61, %v3625_v41  ;;  %v3627_v8 = vpop.f32.mrb[42].mxu0 }
 0x382   : > { %v7553_v19 = vadd.f32 %v5668_v44, %v3734_v14  ;;  %v3736_v1 = vadd.f32 %v7505_v56, %v3627_v8  ;;  %v3629_v52 = vpop.f32.mrb[43].mxu0 }
 0x383   : > { %v7557_v47 = vadd.f32 %v5669_v33, %v3735_v42  ;;  %v3737_v5 = vadd.f32 %v7508_v61, %v3629_v52  ;;  %3800 = vadd.xlane.f32.xlu1 %v3799_v25  ;;  %v5680_v52 = vld [vmem:[%s6193_s14 + $0xa0] sm:$0xff] }
 0x384   : > { %v7561_v13 = vadd.f32 %v5670_v26, %v3736_v1 }
 0x385   : > { %v7564_v50 = vadd.f32 %v5671_v21, %v3737_v5  ;;  %v3802_v12 = vadd.f32 %v7557_v47, %v7553_v19  ;;  %v5681_v21 = vld [vmem:[%s6193_s14 + $0xa8] sm:$0xff] }
 0x387   : > { %3803 = vadd.xlane.f32.xlu0 %v3802_v12  ;;  %v3633_v58 = vpop.f32.mrb[44].mxu0  ;;  %v3805_v0 = vadd.f32 %v7564_v50, %v7561_v13 }
 0x388   : > { %v3738_v37 = vadd.f32 %v7505_v56, %v3633_v58  ;;  %v3635_v31 = vpop.f32.mrb[45].mxu0 }
 0x389   : > { %v3739_v11 = vadd.f32 %v7508_v61, %v3635_v31  ;;  %3806 = vadd.xlane.f32.xlu1 %v3805_v0  ;;  %v3637_v9 = vpop.f32.mrb[46].mxu0  ;;  %v5682_v0 = vld [vmem:[%s6193_s14 + $0xb0] sm:$0xff]  ;;  %v5683_v31 = vld [vmem:[%s6193_s14 + $0xb8] sm:$0xff] }
 0x38a   : > { %v7573_v34 = vadd.f32 %v5672_v24, %v3738_v37  ;;  %v3740_v30 = vadd.f32 %v7505_v56, %v3637_v9  ;;  %v3639_v7 = vpop.f32.mrb[47].mxu0 }
 0x38b   : > { %v7577_v57 = vadd.f32 %v5673_v45, %v3739_v11  ;;  %v3741_v32 = vadd.f32 %v7508_v61, %v3639_v7 }
 0x38c   : > { %v7581_v53 = vadd.f32 %v5674_v2, %v3740_v30 }
 0x38d   : > { %v7584_v38 = vadd.f32 %v5675_v40, %v3741_v32  ;;  %v3808_v59 = vadd.f32 %v7577_v57, %v7573_v34  ;;  %v5684_v40 = vld [vmem:[%s6193_s14 + $0xc0] sm:$0xff] }
 0x38f   : > { %3809 = vadd.xlane.f32.xlu0 %v3808_v59  ;;  %v3643_v28 = vpop.f32.mrb[48].mxu0  ;;  %v3811_v35 = vadd.f32 %v7584_v38, %v7581_v53 }
 0x390   : > { %v3742_v20 = vadd.f32 %v7505_v56, %v3643_v28  ;;  %v3645_v51 = vpop.f32.mrb[49].mxu0 }
 0x391   : > { %v3743_v4 = vadd.f32 %v7508_v61, %v3645_v51  ;;  %3812 = vadd.xlane.f32.xlu1 %v3811_v35  ;;  %v3647_v27 = vpop.f32.mrb[50].mxu0 }
 0x392   : > { %v7593_v63 = vadd.f32 %v5676_v10, %v3742_v20  ;;  %v3744_v48 = vadd.f32 %v7505_v56, %v3647_v27  ;;  %v3649_v49 = vpop.f32.mrb[51].mxu0  ;;  %v5685_v20 = vld [vmem:[%s6193_s14 + $0xc8] sm:$0xff]  ;;  %v5686_v27 = vld [vmem:[%s6193_s14 + $0xd0] sm:$0xff] }
 0x393   : > { %v7597_v54 = vadd.f32 %v5677_v18, %v3743_v4  ;;  %v3745_v43 = vadd.f32 %v7508_v61, %v3649_v49 }
 0x394   : > { %v7601_v15 = vadd.f32 %v5678_v17, %v3744_v48  ;;  %v5687_v48 = vld [vmem:[%s6193_s14 + $0xd8] sm:$0xff] }
 0x395   : > { %v7604_v62 = vadd.f32 %v5679_v60, %v3745_v43  ;;  %v3814_v14 = vadd.f32 %v7597_v54, %v7593_v63 }
 0x397   : > { %3815 = vadd.xlane.f32.xlu0 %v3814_v14  ;;  %v3653_v41 = vpop.f32.mrb[52].mxu0  ;;  %v3817_v42 = vadd.f32 %v7604_v62, %v7601_v15 }
 0x398   : > { %v3746_v8 = vadd.f32 %v7505_v56, %v3653_v41  ;;  %v3655_v25 = vpop.f32.mrb[53].mxu0 }
 0x399   : > { %v3747_v44 = vadd.f32 %v7508_v61, %v3655_v25  ;;  %3818 = vadd.xlane.f32.xlu1 %v3817_v42  ;;  %v3657_v1 = vpop.f32.mrb[54].mxu0 }
 0x39a   : > { %v7613_v33 = vadd.f32 %v5680_v52, %v3746_v8  ;;  %v3748_v5 = vadd.f32 %v7505_v56, %v3657_v1  ;;  %v3659_v26 = vpop.f32.mrb[55].mxu0  ;;  %v5688_v8 = vld [vmem:[%s6193_s14 + $0xe0] sm:$0xff]  ;;  %v5689_v52 = vld [vmem:[%s6193_s14 + $0xe8] sm:$0xff] }
 0x39b   : > { %v7617_v12 = vadd.f32 %v5681_v21, %v3747_v44  ;;  %v3749_v58 = vadd.f32 %v7508_v61, %v3659_v26  ;;  %v5690_v21 = vld [vmem:[%s6193_s14 + $0xf0] sm:$0xff] }
 0x39c   : > { %v7621_v37 = vadd.f32 %v5682_v0, %v3748_v5  ;;  %v5691_v0 = vld [vmem:[%s6193_s14 + $0xf8] sm:$0xff]  ;;  %s8022_s14 = scalar_lea.hbm %s8080_s9, %s4940_s1 }
 0x39d   : > { %v7624_v11 = vadd.f32 %v5683_v31, %v3749_v58  ;;  %v3820_v9 = vadd.f32 %v7617_v12, %v7613_v33 }
 0x39f   : > { %3821 = vadd.xlane.f32.xlu0 %v3820_v9  ;;  %v3663_v24 = vpop.f32.mrb[56].mxu0  ;;  %v3823_v30 = vadd.f32 %v7624_v11, %v7621_v37 }
 0x3a0   : > { %v3750_v7 = vadd.f32 %v7505_v56, %v3663_v24  ;;  %v3665_v45 = vpop.f32.mrb[57].mxu0 }
 0x3a1   : > { %v3751_v32 = vadd.f32 %v7508_v61, %v3665_v45  ;;  %3824 = vadd.xlane.f32.xlu1 %v3823_v30  ;;  %v3667_v2 = vpop.f32.mrb[58].mxu0  ;;  %v5326_v30 = vld [vmem:[#allocation10 + $0x4] ss:$8 sps:$4 sm:$0xff]  }
 0x3a2   : > { %v7633_v59 = vadd.f32 %v5684_v40, %v3750_v7  ;;  %v3752_v28 = vadd.f32 %v7505_v56, %v3667_v2  ;;  %v3669_v35 = vpop.f32.mrb[59].mxu0  ;;  %v5329_v7 = vld [vmem:[#allocation10 + $0x14] ss:$8 sps:$4 sm:$0xff]   ;;  %4354 = vmatprep.subr.bf16.mxu1 %v5326_v30  ;;  %v5332_v45 = vld [vmem:[#allocation10 + $0x24] ss:$8 sps:$4 sm:$0xff]  }
 0x3a3   : > { %v7637_v51 = vadd.f32 %v5685_v20, %v3751_v32  ;;  %v3753_v4 = vadd.f32 %v7508_v61, %v3669_v35  ;;  %v5330_v32 = vld [vmem:[#allocation10 + $0x20] ss:$8 sps:$4 sm:$0xff]   ;;  %v5335_v2 = vld [vmem:[#allocation10 + $0x34] ss:$8 sps:$4 sm:$0xff]   ;;  %v5333_v40 = vld [vmem:[#allocation10 + $0x30] ss:$8 sps:$4 sm:$0xff]  }
 0x3a4   : > { %v7641_v10 = vadd.f32 %v5686_v27, %v3752_v28  ;;  %v5338_v28 = vld [vmem:[#allocation10 + $0x44] ss:$8 sps:$4 sm:$0xff]   ;;  %v5336_v35 = vld [vmem:[#allocation10 + $0x40] ss:$8 sps:$4 sm:$0xff]   ;;  %v5341_v20 = vld [vmem:[#allocation10 + $0x54] ss:$8 sps:$4 sm:$0xff]  }
 0x3a5   : > { %v7644_v49 = vadd.f32 %v5687_v48, %v3753_v4  ;;  %v3826_v18 = vadd.f32 %v7637_v51, %v7633_v59  ;;  %v5339_v4 = vld [vmem:[#allocation10 + $0x50] ss:$8 sps:$4 sm:$0xff]   ;;  %v5344_v27 = vld [vmem:[#allocation10 + $0x64] ss:$8 sps:$4 sm:$0xff]   ;;  %v5342_v48 = vld [vmem:[#allocation10 + $0x60] ss:$8 sps:$4 sm:$0xff]  }
 0x3a7   : > { %3827 = vadd.xlane.f32.xlu0 %v3826_v18  ;;  %v3673_v43 = vpop.f32.mrb[60].mxu0  ;;  %v3829_v17 = vadd.f32 %v7644_v49, %v7641_v10  ;;  %v5347_v18 = vld [vmem:[#allocation10 + $0x74] ss:$8 sps:$4 sm:$0xff]  }
 0x3a8   : > { %v3754_v60 = vadd.f32 %v7505_v56, %v3673_v43  ;;  %v3675_v14 = vpop.f32.mrb[61].mxu0  ;;  %v5345_v43 = vld [vmem:[#allocation10 + $0x70] ss:$8 sps:$4 sm:$0xff]  }
 0x3a9   : > { %v3755_v41 = vadd.f32 %v7508_v61, %v3675_v14  ;;  %3830 = vadd.xlane.f32.xlu1 %v3829_v17  ;;  %v3677_v42 = vpop.f32.mrb[62].mxu0  ;;  %v5350_v17 = vld [vmem:[#allocation10 + $0x84] ss:$8 sps:$4 sm:$0xff]   ;;  %v5353_v14 = vld [vmem:[#allocation10 + $0x94] ss:$8 sps:$4 sm:$0xff]  }
 0x3aa   : > { %v7653_v25 = vadd.f32 %v5688_v8, %v3754_v60  ;;  %v3756_v44 = vadd.f32 %v7505_v56, %v3677_v42  ;;  %v3679_v1 = vpop.f32.mrb[63].mxu0  ;;  %v5324_v56 = vld [vmem:[#allocation10] ss:$8 sps:$4 sm:$0xff]  }
 0x3ab   : > { %v7657_v5 = vadd.f32 %v5689_v52, %v3755_v41  ;;  %v3757_v26 = vadd.f32 %v7508_v61, %v3679_v1  ;;  %4355 = vmatpush1.bf16.msra.mxu1 %v5324_v56  ;;  %v5327_v61 = vld [vmem:[#allocation10 + $0x10] ss:$8 sps:$4 sm:$0xff]   ;;  %v5348_v60 = vld [vmem:[#allocation10 + $0x80] ss:$8 sps:$4 sm:$0xff]  }
 0x3ac   : > { %v7661_v58 = vadd.f32 %v5690_v21, %v3756_v44  ;;  %4356 = vmatprep.subr.bf16.mxu1 %v5329_v7  ;;  %v5351_v41 = vld [vmem:[#allocation10 + $0x90] ss:$8 sps:$4 sm:$0xff]  }
 0x3ad   : > { %v7664_v31 = vadd.f32 %v5691_v0, %v3757_v26  ;;  %v3832_v9 = vadd.f32 %v7657_v5, %v7653_v25 }
 0x3af   : > { %3833 = vadd.xlane.f32.xlu0 %v3832_v9  ;;  %v3835_v24 = vadd.f32 %v7664_v31, %v7661_v58  ;;  %4357 = vmatpush1.bf16.msra.mxu1 %v5327_v61 }
 0x3b0   : > { %4358 = vmatprep.subr.bf16.mxu1 %v5332_v45 }
 0x3b1   : > { %3836 = vadd.xlane.f32.xlu1 %v3835_v24 }
 0x3b3   : > { %4359 = vmatpush1.bf16.msra.mxu1 %v5330_v32 }
 0x3b4   : > { %4360 = vmatprep.subr.bf16.mxu1 %v5335_v2 }
 0x3b7   : > { %4361 = vmatpush1.bf16.msra.mxu1 %v5333_v40 }
 0x3b8   : > { %4362 = vmatprep.subr.bf16.mxu1 %v5338_v28 }
 0x3bb   : > { %4363 = vmatpush1.bf16.msra.mxu1 %v5336_v35 }
 0x3bc   : > { %4364 = vmatprep.subr.bf16.mxu1 %v5341_v20 }
 0x3bf   : > { %4365 = vmatpush1.bf16.msra.mxu1 %v5339_v4 }
 0x3c0   : > { %4366 = vmatprep.subr.bf16.mxu1 %v5344_v27 }
 0x3c3   : > { %4367 = vmatpush1.bf16.msra.mxu1 %v5342_v48 }
 0x3c4   : > { %4368 = vmatprep.subr.bf16.mxu1 %v5347_v18 }
 0x3c7   : > { %4369 = vmatpush1.bf16.msra.mxu1 %v5345_v43 }
 0x3c8   : > { %4370 = vmatprep.subr.bf16.mxu1 %v5350_v17 }
 0x3cb   : > { %4371 = vmatpush1.bf16.msra.mxu1 %v5348_v60 }
 0x3cc   : > { %4372 = vmatprep.subr.bf16.mxu1 %v5353_v14 }
 0x3cf   : > { %4373 = vmatpush1.bf16.msra.mxu1 %v5351_v41 }
 0x404   : > { %v3792_v42 = vpop.xlane.xlu0 %3791 }
 0x405   : > { %v3838_v8 = vmul.f32 0.00390625, %v3792_v42 }
 0x407   : > { %v7671_v44 = vsub.f32 %v7514_v22, %v3838_v8  ;;  %v7674_v1 = vsub.f32 %v7518_v39, %v3838_v8 }
 0x408   : > { %v3795_v52 = vpop.xlane.xlu0 %3794 }
 0x409   : > { %v3839_v26 = vmul.f32 0.00390625, %v3795_v52  ;;  %v3886_v21 = vmul.f32 %v7671_v44, %v7671_v44  ;;  %v3887_v0 = vmul.f32 %v7674_v1, %v7674_v1 }
 0x40b   : > { %v7681_v9 = vsub.f32 %v7521_v46, %v3839_v26  ;;  %v7684_v24 = vsub.f32 %v7524_v6, %v3839_v26  ;;  %v3918_v56 = vadd.f32 %v3887_v0, %v3886_v21 }
 0x40c   : > { %v3798_v22 = vpop.xlane.xlu1 %3797 }
 0x40d   : > { %v3840_v30 = vmul.f32 0.00390625, %v3798_v22  ;;  %3919 = vadd.xlane.f32.xlu0 %v3918_v56  ;;  %v3888_v39 = vmul.f32 %v7681_v9, %v7681_v9  ;;  %v3889_v7 = vmul.f32 %v7684_v24, %v7684_v24 }
 0x40f   : > { %v7691_v61 = vsub.f32 %v7534_v16, %v3840_v30  ;;  %v7694_v45 = vsub.f32 %v7538_v36, %v3840_v30  ;;  %v3921_v46 = vadd.f32 %v3889_v7, %v3888_v39 }
 0x410   : > { %v3801_v32 = vpop.xlane.xlu1 %3800 }
 0x411   : > { %v3841_v6 = vmul.f32 0.00390625, %v3801_v32  ;;  %3922 = vadd.xlane.f32.xlu1 %v3921_v46  ;;  %v3890_v2 = vmul.f32 %v7691_v61, %v7691_v61  ;;  %v3891_v40 = vmul.f32 %v7694_v45, %v7694_v45 }
 0x413   : > { %v7701_v28 = vsub.f32 %v7541_v55, %v3841_v6  ;;  %v7704_v35 = vsub.f32 %v7544_v23, %v3841_v6  ;;  %v3924_v16 = vadd.f32 %v3891_v40, %v3890_v2 }
 0x414   : > { %v3804_v20 = vpop.xlane.xlu0 %3803 }
 0x415   : > { %v3842_v36 = vmul.f32 0.00390625, %v3804_v20  ;;  %3925 = vadd.xlane.f32.xlu0 %v3924_v16  ;;  %v3892_v4 = vmul.f32 %v7701_v28, %v7701_v28  ;;  %v3893_v27 = vmul.f32 %v7704_v35, %v7704_v35  ;;  %v5356_v16 = vld [vmem:[#allocation10 + $0xa4] ss:$8 sps:$4 sm:$0xff]  }
 0x416   : > { %v3807_v48 = vpop.xlane.xlu1 %3806  ;;  %4374 = vmatprep.subr.bf16.mxu1 %v5356_v16 }
 0x417   : > { %v7711_v18 = vsub.f32 %v7553_v19, %v3842_v36  ;;  %v7714_v55 = vsub.f32 %v7557_v47, %v3842_v36  ;;  %v3843_v43 = vmul.f32 0.00390625, %v3807_v48  ;;  %v3927_v23 = vadd.f32 %v3893_v27, %v3892_v4 }
 0x419   : > { %v7717_v17 = vsub.f32 %v7561_v13, %v3843_v43  ;;  %v7720_v60 = vsub.f32 %v7564_v50, %v3843_v43  ;;  %3928 = vadd.xlane.f32.xlu1 %v3927_v23  ;;  %v3894_v14 = vmul.f32 %v7711_v18, %v7711_v18  ;;  %v3895_v41 = vmul.f32 %v7714_v55, %v7714_v55  ;;  %v5359_v23 = vld [vmem:[#allocation10 + $0xb4] ss:$8 sps:$4 sm:$0xff]  }
 0x41b   : > { %v3930_v19 = vadd.f32 %v3895_v41, %v3894_v14  ;;  %v3896_v47 = vmul.f32 %v7717_v17, %v7717_v17  ;;  %v3897_v42 = vmul.f32 %v7720_v60, %v7720_v60  ;;  %v5357_v41 = vld [vmem:[#allocation10 + $0xb0] ss:$8 sps:$4 sm:$0xff]  }
 0x41c   : > { %v3810_v8 = vpop.xlane.xlu0 %3809 }
 0x41d   : > { %v3844_v13 = vmul.f32 0.00390625, %v3810_v8  ;;  %3931 = vadd.xlane.f32.xlu0 %v3930_v19  ;;  %v3933_v52 = vadd.f32 %v3897_v42, %v3896_v47 }
 0x41e   : > { %v3813_v50 = vpop.xlane.xlu1 %3812 }
 0x41f   : > { %v7731_v26 = vsub.f32 %v7573_v34, %v3844_v13  ;;  %v7734_v21 = vsub.f32 %v7577_v57, %v3844_v13  ;;  %v3845_v0 = vmul.f32 0.00390625, %v3813_v50  ;;  %3934 = vadd.xlane.f32.xlu1 %v3933_v52  ;;  %v5360_v13 = vld [vmem:[#allocation10 + $0xc0] ss:$8 sps:$4 sm:$0xff]   ;;  %v5362_v52 = vld [vmem:[#allocation10 + $0xc4] ss:$8 sps:$4 sm:$0xff]  }
 0x421   : > { %v7737_v56 = vsub.f32 %v7581_v53, %v3845_v0  ;;  %v7740_v22 = vsub.f32 %v7584_v38, %v3845_v0  ;;  %v3898_v30 = vmul.f32 %v7731_v26, %v7731_v26  ;;  %v3899_v39 = vmul.f32 %v7734_v21, %v7734_v21 }
 0x423   : > { %v3936_v7 = vadd.f32 %v3899_v39, %v3898_v30  ;;  %v3900_v34 = vmul.f32 %v7737_v56, %v7737_v56  ;;  %v3901_v57 = vmul.f32 %v7740_v22, %v7740_v22  ;;  %v5365_v39 = vld [vmem:[#allocation10 + $0xd4] ss:$8 sps:$4 sm:$0xff]  }
 0x424   : > { %v3816_v46 = vpop.xlane.xlu0 %3815 }
 0x425   : > { %v3846_v32 = vmul.f32 0.00390625, %v3816_v46  ;;  %3937 = vadd.xlane.f32.xlu0 %v3936_v7  ;;  %v3939_v53 = vadd.f32 %v3901_v57, %v3900_v34 }
 0x426   : > { %v3819_v6 = vpop.xlane.xlu1 %3818 }
 0x427   : > { %v7751_v38 = vsub.f32 %v7593_v63, %v3846_v32  ;;  %v7754_v2 = vsub.f32 %v7597_v54, %v3846_v32  ;;  %v3847_v40 = vmul.f32 0.00390625, %v3819_v6  ;;  %3940 = vadd.xlane.f32.xlu1 %v3939_v53  ;;  %v5354_v63 = vld [vmem:[#allocation10 + $0xa0] ss:$8 sps:$4 sm:$0xff]  }
 0x428   : > { %4375 = vmatpush1.bf16.msra.mxu1 %v5354_v63 }
 0x429   : > { %v7757_v20 = vsub.f32 %v7601_v15, %v3847_v40  ;;  %v7760_v36 = vsub.f32 %v7604_v62, %v3847_v40  ;;  %v3902_v4 = vmul.f32 %v7751_v38, %v7751_v38  ;;  %v3903_v27 = vmul.f32 %v7754_v2, %v7754_v2  ;;  %4376 = vmatprep.subr.bf16.mxu1 %v5359_v23  ;;  %v5369_v23 = vld [vmem:[#allocation10 + $0xf0] ss:$8 sps:$4 sm:$0xff]  }
 0x42b   : > { %v3942_v48 = vadd.f32 %v3903_v27, %v3902_v4  ;;  %v3904_v54 = vmul.f32 %v7757_v20, %v7757_v20  ;;  %v3905_v43 = vmul.f32 %v7760_v36, %v7760_v36  ;;  %v5366_v4 = vld [vmem:[#allocation10 + $0xe0] ss:$8 sps:$4 sm:$0xff]   ;;  %v5371_v27 = vld [vmem:[#allocation10 + $0xf4] ss:$8 sps:$4 sm:$0xff]  }
 0x42c   : > { %v3822_v15 = vpop.xlane.xlu0 %3821  ;;  %4377 = vmatpush1.bf16.msra.mxu1 %v5357_v41 }
 0x42d   : > { %v3848_v62 = vmul.f32 0.00390625, %v3822_v15  ;;  %3943 = vadd.xlane.f32.xlu0 %v3942_v48  ;;  %v3945_v14 = vadd.f32 %v3905_v43, %v3904_v54  ;;  %4378 = vmatprep.subr.bf16.mxu1 %v5362_v52 }
 0x42e   : > { %v3825_v19 = vpop.xlane.xlu1 %3824 }
 0x42f   : > { %v7771_v47 = vsub.f32 %v7613_v33, %v3848_v62  ;;  %v7774_v42 = vsub.f32 %v7617_v12, %v3848_v62  ;;  %v3849_v8 = vmul.f32 0.00390625, %v3825_v19  ;;  %3946 = vadd.xlane.f32.xlu1 %v3945_v14 }
 0x430   : > { %4379 = vmatpush1.bf16.msra.mxu1 %v5360_v13 }
 0x431   : > { %v7777_v50 = vsub.f32 %v7621_v37, %v3849_v8  ;;  %v7780_v0 = vsub.f32 %v7624_v11, %v3849_v8  ;;  %v3906_v30 = vmul.f32 %v7771_v47, %v7771_v47  ;;  %v3907_v33 = vmul.f32 %v7774_v42, %v7774_v42  ;;  %v5363_v37 = vld [vmem:[#allocation10 + $0xd0] ss:$8 sps:$4 sm:$0xff]   ;;  %4380 = vmatprep.subr.bf16.mxu1 %v5365_v39  ;;  %v5368_v11 = vld [vmem:[#allocation10 + $0xe4] ss:$8 sps:$4 sm:$0xff]  }
 0x433   : > { %v3948_v12 = vadd.f32 %v3907_v33, %v3906_v30  ;;  %v3908_v7 = vmul.f32 %v7777_v50, %v7777_v50  ;;  %v3909_v34 = vmul.f32 %v7780_v0, %v7780_v0 }
 0x434   : > { %v3828_v57 = vpop.xlane.xlu0 %3827  ;;  %4381 = vmatpush1.bf16.msra.mxu1 %v5363_v37 }
 0x435   : > { %v3850_v46 = vmul.f32 0.00390625, %v3828_v57  ;;  %3949 = vadd.xlane.f32.xlu0 %v3948_v12  ;;  %v3951_v32 = vadd.f32 %v3909_v34, %v3908_v7  ;;  %4382 = vmatprep.subr.bf16.mxu1 %v5368_v11 }
 0x436   : > { %v3831_v53 = vpop.xlane.xlu1 %3830 }
 0x437   : > { %v7791_v6 = vsub.f32 %v7633_v59, %v3850_v46  ;;  %v7794_v40 = vsub.f32 %v7637_v51, %v3850_v46  ;;  %v3851_v16 = vmul.f32 0.00390625, %v3831_v53  ;;  %3952 = vadd.xlane.f32.xlu1 %v3951_v32  ;;  %v3982_v46 = vld [vmem:[%s8076_s5] sm:$0x3] }
 0x438   : > { %4383 = vmatpush1.bf16.msra.mxu1 %v5366_v4 }
 0x439   : > { %v7797_v63 = vsub.f32 %v7641_v10, %v3851_v16  ;;  %v7800_v48 = vsub.f32 %v7644_v49, %v3851_v16  ;;  %v3910_v54 = vmul.f32 %v7791_v6, %v7791_v6  ;;  %v3911_v59 = vmul.f32 %v7794_v40, %v7794_v40  ;;  %4384 = vmatprep.subr.bf16.mxu1 %v5371_v27 }
 0x43a   : > { %v7834_v16 = vrot.slane %v3982_v46, %v8169_v29  ;;  %v7837_v27 = vrot.slane %v3982_v46, %v8170_v3 }
 0x43b   : > { %v3954_v51 = vadd.f32 %v3911_v59, %v3910_v54  ;;  %v3912_v43 = vmul.f32 %v7797_v63, %v7797_v63  ;;  %v3913_v15 = vmul.f32 %v7800_v48, %v7800_v48 }
 0x43c   : > { %v3834_v10 = vpop.xlane.xlu0 %3833  ;;  %4385 = vmatpush1.bf16.msra.mxu1 %v5369_v23 }
 0x43d   : > { %v3852_v62 = vmul.f32 0.00390625, %v3834_v10  ;;  %3955 = vadd.xlane.f32.xlu0 %v3954_v51  ;;  %v3957_v49 = vadd.f32 %v3913_v15, %v3912_v43  ;;  %v4090_v43 = vld [vmem:[%s8077_s6] sm:$0x3] }
 0x43e   : > { %v3837_v14 = vpop.xlane.xlu1 %3836 }
 0x43f   : > { %v7811_v41 = vsub.f32 %v7653_v25, %v3852_v62  ;;  %v7814_v19 = vsub.f32 %v7657_v5, %v3852_v62  ;;  %v3853_v8 = vmul.f32 0.00390625, %v3837_v14  ;;  %3958 = vadd.xlane.f32.xlu1 %v3957_v49  ;;  %v7845_v14 = vrot.slane %v4090_v43, %v8169_v29 }
 0x441   : > { %v7817_v13 = vsub.f32 %v7661_v58, %v3853_v8  ;;  %v7820_v52 = vsub.f32 %v7664_v31, %v3853_v8  ;;  %v3914_v30 = vmul.f32 %v7811_v41, %v7811_v41  ;;  %v3915_v33 = vmul.f32 %v7814_v19, %v7814_v19 }
 0x442   : > { %v7848_v8 = vrot.slane %v4090_v43, %v8170_v3 }
 0x443   : > { %v3960_v25 = vadd.f32 %v3915_v33, %v3914_v30  ;;  %v3916_v5 = vmul.f32 %v7817_v13, %v7817_v13  ;;  %v3917_v39 = vmul.f32 %v7820_v52, %v7820_v52 }
 0x445   : > { %3961 = vadd.xlane.f32.xlu0 %v3960_v25  ;;  %v3963_v12 = vadd.f32 %v3917_v39, %v3916_v5 }
 0x447   : > { %3964 = vadd.xlane.f32.xlu1 %v3963_v12 }
 0x49a   : > { %v3920_v58 = vpop.xlane.xlu0 %3919 }
 0x49b   : > { %v3966_v7 = vmul.f32 0.00390625, %v3920_v58 }
 0x49d   : > { %v3983_v31 = vadd.f32 1e-12, %v3966_v7 }
 0x49e   : > { %v3923_v34 = vpop.xlane.xlu1 %3922 }
 0x49f   : > { %5628 = vrsqrt.f32 %v3983_v31  ;;  %v3967_v37 = vmul.f32 0.00390625, %v3923_v34 }
 0x4a1   : > { %v3984_v57 = vadd.f32 1e-12, %v3967_v37 }
 0x4a2   : > { %v3926_v11 = vpop.xlane.xlu0 %3925 }
 0x4a3   : > { %5630 = vrsqrt.f32 %v3984_v57  ;;  %v3968_v32 = vmul.f32 0.00390625, %v3926_v11 }
 0x4a5   : > { %v3985_v53 = vadd.f32 1e-12, %v3968_v32 }
 0x4a6   : > { %v3929_v4 = vpop.xlane.xlu1 %3928 }
 0x4a7   : > { %5632 = vrsqrt.f32 %v3985_v53  ;;  %v3969_v54 = vmul.f32 0.00390625, %v3929_v4 }
 0x4a9   : > { %v5629_v59 = vpop.eup %5628  ;;  %v3986_v51 = vadd.f32 1e-12, %v3969_v54 }
 0x4aa   : > { %v4026_v15 = vmul.f32 %v5629_v59, %v7834_v16  ;;  %v3932_v23 = vpop.xlane.xlu0 %3931  ;;  %v4027_v10 = vmul.f32 %v5629_v59, %v7837_v27 }
 0x4ab   : > { %5634 = vrsqrt.f32 %v3986_v51  ;;  %v3970_v62 = vmul.f32 0.00390625, %v3932_v23 }
 0x4ac   : > { %v3935_v49 = vpop.xlane.xlu1 %3934  ;;  %v4058_v33 = vmul.f32 %v4026_v15, %v7671_v44  ;;  %v4059_v39 = vmul.f32 %v4027_v10, %v7674_v1 }
 0x4ad   : > { %v5631_v30 = vpop.eup %5630  ;;  %v3987_v25 = vadd.f32 1e-12, %v3970_v62  ;;  %v3971_v5 = vmul.f32 0.00390625, %v3935_v49 }
 0x4ae   : > { %v4028_v12 = vmul.f32 %v5631_v30, %v7834_v16  ;;  %v4029_v58 = vmul.f32 %v5631_v30, %v7837_v27  ;;  %v4103_v57 = vadd.f32 %v7848_v8, %v4059_v39  ;;  %v4102_v44 = vadd.f32 %v7845_v14, %v4058_v33 }
 0x4af   : > { %5636 = vrsqrt.f32 %v3987_v25  ;;  %v3988_v7 = vadd.f32 1e-12, %v3971_v5 }
 0x4b0   : > { %v4060_v31 = vmul.f32 %v4028_v12, %v7681_v9  ;;  %v4061_v34 = vmul.f32 %v4029_v58, %v7684_v24 }
 0x4b1   : > { %v5633_v37 = vpop.eup %5632  ;;  %5638 = vrsqrt.f32 %v3988_v7 }
 0x4b2   : > { %v3938_v11 = vpop.xlane.xlu0 %3937  ;;  %v4105_v46 = vadd.f32 %v7848_v8, %v4061_v34  ;;  %v4104_v1 = vadd.f32 %v7845_v14, %v4060_v31  ;;  %v4031_v32 = vmul.f32 %v5633_v37, %v7837_v27  ;;  %v4030_v53 = vmul.f32 %v5633_v37, %v7834_v16 }
 0x4b3   : > { %v3972_v4 = vmul.f32 0.00390625, %v3938_v11 }
 0x4b4   : > { %v3941_v54 = vpop.xlane.xlu1 %3940  ;;  %v4135_v9 = vpack.c.bf16 %v4105_v46, %v4103_v57  ;;  %v4134_v59 = vpack.c.bf16 %v4104_v1, %v4102_v44  ;;  %v4063_v15 = vmul.f32 %v4031_v32, %v7694_v45  ;;  %v4062_v62 = vmul.f32 %v4030_v53, %v7691_v61 }
 0x4b5   : > { %v5635_v24 = vpop.eup %5634  ;;  %v3989_v51 = vadd.f32 1e-12, %v3972_v4  ;;  %v3973_v43 = vmul.f32 0.00390625, %v3941_v54 }
 0x4b6   : > { %4386 = vmatprep.mubr.bf16.mxu1 %v4135_v9  ;;  %v4033_v23 = vmul.f32 %v5635_v24, %v7837_v27  ;;  %v4032_v10 = vmul.f32 %v5635_v24, %v7834_v16  ;;  %v4107_v5 = vadd.f32 %v7848_v8, %v4063_v15  ;;  %v4106_v12 = vadd.f32 %v7845_v14, %v4062_v62 }
 0x4b7   : > { %5640 = vrsqrt.f32 %v3989_v51  ;;  %v3990_v49 = vadd.f32 1e-12, %v3973_v43  ;;  %4387 = vmatmul.mubr.bf16.vlgmr.msra.gmra.mrb[96].mxu1 %v4134_v59 }
 0x4b8   : > { %v4065_v30 = vmul.f32 %v4033_v23, %v7704_v35  ;;  %v4064_v33 = vmul.f32 %v4032_v10, %v7701_v28 }
 0x4b9   : > { %v5637_v25 = vpop.eup %5636  ;;  %5642 = vrsqrt.f32 %v3990_v49 }
 0x4ba   : > { %v3944_v39 = vpop.xlane.xlu0 %3943  ;;  %v4109_v45 = vadd.f32 %v7848_v8, %v4065_v30  ;;  %v4108_v58 = vadd.f32 %v7845_v14, %v4064_v33  ;;  %v4035_v61 = vmul.f32 %v5637_v25, %v7837_v27  ;;  %v4034_v34 = vmul.f32 %v5637_v25, %v7834_v16 }
 0x4bb   : > { %v5639_v7 = vpop.eup %5638  ;;  %v3974_v31 = vmul.f32 0.00390625, %v3944_v39 }
 0x4bc   : > { %v3947_v35 = vpop.xlane.xlu1 %3946  ;;  %v4137_v37 = vpack.c.bf16 %v4109_v45, %v4107_v5  ;;  %v4136_v28 = vpack.c.bf16 %v4108_v58, %v4106_v12  ;;  %v4037_v57 = vmul.f32 %v5639_v7, %v7837_v27  ;;  %v4067_v44 = vmul.f32 %v4035_v61, %v7714_v55 }
 0x4bd   : > { %v3991_v11 = vadd.f32 1e-12, %v3974_v31  ;;  %v3975_v46 = vmul.f32 0.00390625, %v3947_v35  ;;  %v4036_v1 = vmul.f32 %v5639_v7, %v7834_v16  ;;  %v4066_v4 = vmul.f32 %v4034_v34, %v7711_v18 }
 0x4be   : > { %4396 = vmatprep.mubr.bf16.mxu1 %v4137_v37  ;;  %v4069_v32 = vmul.f32 %v4037_v57, %v7720_v60  ;;  %v4111_v9 = vadd.f32 %v7848_v8, %v4067_v44 }
 0x4bf   : > { %5644 = vrsqrt.f32 %v3991_v11  ;;  %v3992_v53 = vadd.f32 1e-12, %v3975_v46  ;;  %4397 = vmatmul.mubr.bf16.gmra.mrb[100].mxu1 %v4136_v28  ;;  %v4068_v54 = vmul.f32 %v4036_v1, %v7717_v17  ;;  %v4110_v10 = vadd.f32 %v7845_v14, %v4066_v4 }
 0x4c0   : > { %v4113_v59 = vadd.f32 %v7848_v8, %v4069_v32 }
 0x4c1   : > { %v5641_v24 = vpop.eup %5640  ;;  %5646 = vrsqrt.f32 %v3992_v53  ;;  %v4112_v55 = vadd.f32 %v7845_v14, %v4068_v54 }
 0x4c2   : > { %v3950_v51 = vpop.xlane.xlu0 %3949  ;;  %v4139_v43 = vpack.c.bf16 %v4113_v59, %v4111_v9  ;;  %v4039_v15 = vmul.f32 %v5641_v24, %v7837_v27  ;;  %v4038_v18 = vmul.f32 %v5641_v24, %v7834_v16 }
 0x4c3   : > { %v5643_v60 = vpop.eup %5642  ;;  %v3976_v23 = vmul.f32 0.00390625, %v3950_v51  ;;  %v4138_v5 = vpack.c.bf16 %v4112_v55, %v4110_v10 }
 0x4c4   : > { %4406 = vmatprep.mubr.bf16.mxu1 %v4139_v43  ;;  %v3953_v17 = vpop.xlane.xlu1 %3952  ;;  %v4041_v62 = vmul.f32 %v5643_v60, %v7837_v27  ;;  %v4071_v49 = vmul.f32 %v4039_v15, %v7734_v21  ;;  %v4040_v30 = vmul.f32 %v5643_v60, %v7834_v16  ;;  %v4070_v58 = vmul.f32 %v4038_v18, %v7731_v26 }
 0x4c5   : > { %v3993_v33 = vadd.f32 1e-12, %v3976_v23  ;;  %v3977_v25 = vmul.f32 0.00390625, %v3953_v17 }
 0x4c6   : > { %v4073_v39 = vmul.f32 %v4041_v62, %v7740_v22  ;;  %v4072_v45 = vmul.f32 %v4040_v30, %v7737_v56  ;;  %v4115_v61 = vadd.f32 %v7848_v8, %v4071_v49  ;;  %v4114_v56 = vadd.f32 %v7845_v14, %v4070_v58 }
 0x4c7   : > { %5648 = vrsqrt.f32 %v3993_v33  ;;  %v3994_v12 = vadd.f32 1e-12, %v3977_v25  ;;  %4407 = vmatmul.mubr.bf16.gmra.mrb[104].mxu1 %v4138_v5 }
 0x4c8   : > { %v4117_v7 = vadd.f32 %v7848_v8, %v4073_v39  ;;  %v4116_v21 = vadd.f32 %v7845_v14, %v4072_v45 }
 0x4c9   : > { %v5645_v31 = vpop.eup %5644  ;;  %5650 = vrsqrt.f32 %v3994_v12 }
 0x4ca   : > { %v3956_v34 = vpop.xlane.xlu0 %3955  ;;  %v4141_v35 = vpack.c.bf16 %v4117_v7, %v4115_v61  ;;  %v4043_v37 = vmul.f32 %v5645_v31, %v7837_v27  ;;  %v4042_v57 = vmul.f32 %v5645_v31, %v7834_v16  ;;  %v4140_v53 = vpack.c.bf16 %v4116_v21, %v4114_v56 }
 0x4cb   : > { %v5647_v22 = vpop.eup %5646  ;;  %v3978_v28 = vmul.f32 0.00390625, %v3956_v34 }
 0x4cc   : > { %4416 = vmatprep.mubr.bf16.mxu1 %v4141_v35  ;;  %v3959_v26 = vpop.xlane.xlu1 %3958  ;;  %v4045_v44 = vmul.f32 %v5647_v22, %v7837_v27  ;;  %v4075_v11 = vmul.f32 %v4043_v37, %v7754_v2  ;;  %v4044_v46 = vmul.f32 %v5647_v22, %v7834_v16  ;;  %v4074_v59 = vmul.f32 %v4042_v57, %v7751_v38 }
 0x4cd   : > { %v3995_v1 = vadd.f32 1e-12, %v3978_v28  ;;  %v3979_v32 = vmul.f32 0.00390625, %v3959_v26 }
 0x4ce   : > { %v4077_v4 = vmul.f32 %v4045_v44, %v7760_v36  ;;  %v4076_v54 = vmul.f32 %v4044_v46, %v7757_v20  ;;  %v4119_v24 = vadd.f32 %v7848_v8, %v4075_v11  ;;  %v4118_v20 = vadd.f32 %v7845_v14, %v4074_v59 }
 0x4cf   : > { %5652 = vrsqrt.f32 %v3995_v1  ;;  %v3996_v9 = vadd.f32 1e-12, %v3979_v32  ;;  %4417 = vmatmul.mubr.bf16.gmra.mrb[108].mxu1 %v4140_v53 }
 0x4d0   : > { %v4121_v55 = vadd.f32 %v7848_v8, %v4077_v4  ;;  %v4120_v2 = vadd.f32 %v7845_v14, %v4076_v54 }
 0x4d1   : > { %v5649_v51 = vpop.eup %5648  ;;  %5654 = vrsqrt.f32 %v3996_v9 }
 0x4d2   : > { %v3962_v43 = vpop.xlane.xlu0 %3961  ;;  %v4143_v15 = vpack.c.bf16 %v4121_v55, %v4119_v24  ;;  %v4047_v60 = vmul.f32 %v5649_v51, %v7837_v27  ;;  %v4046_v10 = vmul.f32 %v5649_v51, %v7834_v16  ;;  %v4142_v33 = vpack.c.bf16 %v4120_v2, %v4118_v20 }
 0x4d3   : > { %v5651_v36 = vpop.eup %5650  ;;  %v3980_v23 = vmul.f32 0.00390625, %v3962_v43 }
 0x4d4   : > { %4426 = vmatprep.mubr.bf16.mxu1 %v4143_v15  ;;  %v3965_v38 = vpop.xlane.xlu1 %3964  ;;  %v4049_v18 = vmul.f32 %v5651_v36, %v7837_v27  ;;  %v4079_v17 = vmul.f32 %v4047_v60, %v7774_v42  ;;  %v4048_v62 = vmul.f32 %v5651_v36, %v7834_v16  ;;  %v4078_v45 = vmul.f32 %v4046_v10, %v7771_v47 }
 0x4d5   : > { %v3997_v49 = vadd.f32 1e-12, %v3980_v23  ;;  %v3981_v30 = vmul.f32 0.00390625, %v3965_v38 }
 0x4d6   : > { %v4081_v25 = vmul.f32 %v4049_v18, %v7780_v0  ;;  %v4080_v5 = vmul.f32 %v4048_v62, %v7777_v50  ;;  %v4123_v12 = vadd.f32 %v7848_v8, %v4079_v17  ;;  %v4122_v0 = vadd.f32 %v7845_v14, %v4078_v45 }
 0x4d7   : > { %5656 = vrsqrt.f32 %v3997_v49  ;;  %v3998_v39 = vadd.f32 1e-12, %v3981_v30  ;;  %4427 = vmatmul.mubr.bf16.gmra.mrb[112].mxu1 %v4142_v33 }
 0x4d8   : > { %v4125_v58 = vadd.f32 %v7848_v8, %v4081_v25  ;;  %v4124_v42 = vadd.f32 %v7845_v14, %v4080_v5 }
 0x4d9   : > { %v5653_v61 = vpop.eup %5652  ;;  %5658 = vrsqrt.f32 %v3998_v39 }
 0x4da   : > { %v4145_v7 = vpack.c.bf16 %v4125_v58, %v4123_v12  ;;  %v4051_v31 = vmul.f32 %v5653_v61, %v7837_v27  ;;  %v4050_v50 = vmul.f32 %v5653_v61, %v7834_v16  ;;  %v4144_v37 = vpack.c.bf16 %v4124_v42, %v4122_v0 }
 0x4db   : > { %v5655_v21 = vpop.eup %5654 }
 0x4dc   : > { %4436 = vmatprep.mubr.bf16.mxu1 %v4145_v7  ;;  %v4053_v34 = vmul.f32 %v5655_v21, %v7837_v27  ;;  %v4083_v47 = vmul.f32 %v4051_v31, %v7794_v40  ;;  %v4052_v35 = vmul.f32 %v5655_v21, %v7834_v16  ;;  %v4082_v56 = vmul.f32 %v4050_v50, %v7791_v6 }
 0x4de   : > { %v4085_v22 = vmul.f32 %v4053_v34, %v7800_v48  ;;  %v4084_v28 = vmul.f32 %v4052_v35, %v7797_v63  ;;  %v4127_v57 = vadd.f32 %v7848_v8, %v4083_v47  ;;  %v4126_v32 = vadd.f32 %v7845_v14, %v4082_v56 }
 0x4df   : > { %4437 = vmatmul.mubr.bf16.gmra.mrb[116].mxu1 %v4144_v37 }
 0x4e0   : > { %v4129_v26 = vadd.f32 %v7848_v8, %v4085_v22  ;;  %v4128_v11 = vadd.f32 %v7845_v14, %v4084_v28 }
 0x4e1   : > { %v5657_v44 = vpop.eup %5656 }
 0x4e2   : > { %v4147_v46 = vpack.c.bf16 %v4129_v26, %v4127_v57  ;;  %v4055_v40 = vmul.f32 %v5657_v44, %v7837_v27  ;;  %v4054_v48 = vmul.f32 %v5657_v44, %v7834_v16  ;;  %v4146_v4 = vpack.c.bf16 %v4128_v11, %v4126_v32 }
 0x4e3   : > { %v5659_v1 = vpop.eup %5658 }
 0x4e4   : > { %4446 = vmatprep.mubr.bf16.mxu1 %v4147_v46  ;;  %v4057_v63 = vmul.f32 %v5659_v1, %v7837_v27  ;;  %v4087_v6 = vmul.f32 %v4055_v40, %v7814_v19  ;;  %v4056_v53 = vmul.f32 %v5659_v1, %v7834_v16  ;;  %v4086_v59 = vmul.f32 %v4054_v48, %v7811_v41 }
 0x4e6   : > { %v4089_v54 = vmul.f32 %v4057_v63, %v7820_v52  ;;  %v4088_v9 = vmul.f32 %v4056_v53, %v7817_v13  ;;  %v4131_v24 = vadd.f32 %v7848_v8, %v4087_v6  ;;  %v4130_v19 = vadd.f32 %v7845_v14, %v4086_v59  ;;  %v4182_v13 = vld [vmem:[%s8079_s8] sm:$0x3] }
 0x4e7   : > { %4447 = vmatmul.mubr.bf16.gmra.mrb[120].mxu1 %v4146_v4  ;;  %v7948_v52 = vrot.slane %v4182_v13, %v8169_v29  ;;  %v7951_v41 = vrot.slane %v4182_v13, %v8170_v3 }
 0x4e8   : > { %v4133_v55 = vadd.f32 %v7848_v8, %v4089_v54  ;;  %v4132_v51 = vadd.f32 %v7845_v14, %v4088_v9 }
 0x4ea   : > { %v4149_v27 = vpack.c.bf16 %v4133_v55, %v4131_v24  ;;  %v4148_v16 = vpack.c.bf16 %v4132_v51, %v4130_v19 }
 0x4ec   : > { %4456 = vmatprep.mubr.bf16.mxu1 %v4149_v27 }
 0x4ef   : > { %4457 = vmatmul.mubr.bf16.gmra.mrb[124].mxu1 %v4148_v16 }
 0x58a   : > { %v4388_v2 = vpop.f32.mrb[96].mxu1 }
 0x58b   : > { %v4389_v8 = vadd.f32 %v4388_v2, %v7948_v52  ;;  %v4390_v43 = vpop.f32.mrb[97].mxu1 }
 0x58c   : > { %v4391_v15 = vadd.f32 %v4390_v43, %v7951_v41  ;;  %v4392_v14 = vpop.f32.mrb[98].mxu1 }
 0x58d   : > { %4467 = vst [vmem:[%s7957_s28] sm:$0xff] %v4389_v8  ;;  %v4393_v29 = vadd.f32 %v4392_v14, %v7948_v52  ;;  %v4394_v3 = vpop.f32.mrb[99].mxu1 }
 0x58e   : > { %4468 = vst [vmem:[%s7957_s28 + $0x8] sm:$0xff] %v4391_v15  ;;  %v4395_v60 = vadd.f32 %v4394_v3, %v7951_v41 }
 0x58f   : > { %4469 = vst [vmem:[%s7957_s28 + $0x10] sm:$0xff] %v4393_v29 }
 0x590   : > { %4470 = vst [vmem:[%s7957_s28 + $0x18] sm:$0xff] %v4395_v60 }
 0x592   : > { %v4398_v36 = vpop.f32.mrb[100].mxu1 }
 0x593   : > { %v4399_v23 = vadd.f32 %v4398_v36, %v7948_v52  ;;  %v4400_v20 = vpop.f32.mrb[101].mxu1 }
 0x594   : > { %v4401_v10 = vadd.f32 %v4400_v20, %v7951_v41  ;;  %v4402_v38 = vpop.f32.mrb[102].mxu1 }
 0x595   : > { %4471 = vst [vmem:[%s7957_s28 + $0x20] sm:$0xff] %v4399_v23  ;;  %v4403_v18 = vadd.f32 %v4402_v38, %v7948_v52  ;;  %v4404_v17 = vpop.f32.mrb[103].mxu1 }
 0x596   : > { %4472 = vst [vmem:[%s7957_s28 + $0x28] sm:$0xff] %v4401_v10  ;;  %v4405_v62 = vadd.f32 %v4404_v17, %v7951_v41 }
 0x597   : > { %4473 = vst [vmem:[%s7957_s28 + $0x30] sm:$0xff] %v4403_v18 }
 0x598   : > { %4474 = vst [vmem:[%s7957_s28 + $0x38] sm:$0xff] %v4405_v62 }
 0x59a   : > { %v4408_v49 = vpop.f32.mrb[104].mxu1 }
 0x59b   : > { %v4409_v30 = vadd.f32 %v4408_v49, %v7948_v52  ;;  %v4410_v33 = vpop.f32.mrb[105].mxu1 }
 0x59c   : > { %v4411_v25 = vadd.f32 %v4410_v33, %v7951_v41  ;;  %v4412_v5 = vpop.f32.mrb[106].mxu1 }
 0x59d   : > { %4475 = vst [vmem:[%s7957_s28 + $0x40] sm:$0xff] %v4409_v30  ;;  %v4413_v39 = vadd.f32 %v4412_v5, %v7948_v52  ;;  %v4414_v45 = vpop.f32.mrb[107].mxu1 }
 0x59e   : > { %4476 = vst [vmem:[%s7957_s28 + $0x48] sm:$0xff] %v4411_v25  ;;  %v4415_v12 = vadd.f32 %v4414_v45, %v7951_v41 }
 0x59f   : > { %4477 = vst [vmem:[%s7957_s28 + $0x50] sm:$0xff] %v4413_v39 }
 0x5a0   : > { %4478 = vst [vmem:[%s7957_s28 + $0x58] sm:$0xff] %v4415_v12 }
 0x5a2   : > { %v4418_v58 = vpop.f32.mrb[108].mxu1 }
 0x5a3   : > { %v4419_v61 = vadd.f32 %v4418_v58, %v7948_v52  ;;  %v4420_v42 = vpop.f32.mrb[109].mxu1 }
 0x5a4   : > { %v4421_v7 = vadd.f32 %v4420_v42, %v7951_v41  ;;  %v4422_v31 = vpop.f32.mrb[110].mxu1 }
 0x5a5   : > { %4479 = vst [vmem:[%s7957_s28 + $0x60] sm:$0xff] %v4419_v61  ;;  %v4423_v21 = vadd.f32 %v4422_v31, %v7948_v52  ;;  %v4424_v0 = vpop.f32.mrb[111].mxu1 }
 0x5a6   : > { %4480 = vst [vmem:[%s7957_s28 + $0x68] sm:$0xff] %v4421_v7  ;;  %v4425_v50 = vadd.f32 %v4424_v0, %v7951_v41 }
 0x5a7   : > { %4481 = vst [vmem:[%s7957_s28 + $0x70] sm:$0xff] %v4423_v21 }
 0x5a8   : > { %4482 = vst [vmem:[%s7957_s28 + $0x78] sm:$0xff] %v4425_v50 }
 0x5aa   : > { %v4428_v34 = vpop.f32.mrb[112].mxu1 }
 0x5ab   : > { %v4429_v47 = vadd.f32 %v4428_v34, %v7948_v52  ;;  %v4430_v35 = vpop.f32.mrb[113].mxu1 }
 0x5ac   : > { %v4431_v37 = vadd.f32 %v4430_v35, %v7951_v41  ;;  %v4432_v22 = vpop.f32.mrb[114].mxu1 }
 0x5ad   : > { %4483 = vst [vmem:[%s7957_s28 + $0x80] sm:$0xff] %v4429_v47  ;;  %v4433_v28 = vadd.f32 %v4432_v22, %v7948_v52  ;;  %v4434_v56 = vpop.f32.mrb[115].mxu1 }
 0x5ae   : > { %4484 = vst [vmem:[%s7957_s28 + $0x88] sm:$0xff] %v4431_v37  ;;  %v4435_v57 = vadd.f32 %v4434_v56, %v7951_v41 }
 0x5af   : > { %4485 = vst [vmem:[%s7957_s28 + $0x90] sm:$0xff] %v4433_v28 }
 0x5b0   : > { %4486 = vst [vmem:[%s7957_s28 + $0x98] sm:$0xff] %v4435_v57 }
 0x5b2   : > { %v4438_v26 = vpop.f32.mrb[116].mxu1 }
 0x5b3   : > { %v4439_v44 = vadd.f32 %v4438_v26, %v7948_v52  ;;  %v4440_v11 = vpop.f32.mrb[117].mxu1 }
 0x5b4   : > { %v4441_v46 = vadd.f32 %v4440_v11, %v7951_v41  ;;  %v4442_v40 = vpop.f32.mrb[118].mxu1 }
 0x5b5   : > { %4487 = vst [vmem:[%s7957_s28 + $0xa0] sm:$0xff] %v4439_v44  ;;  %v4443_v1 = vadd.f32 %v4442_v40, %v7948_v52  ;;  %v4444_v32 = vpop.f32.mrb[119].mxu1 }
 0x5b6   : > { %4488 = vst [vmem:[%s7957_s28 + $0xa8] sm:$0xff] %v4441_v46  ;;  %v4445_v48 = vadd.f32 %v4444_v32, %v7951_v41 }
 0x5b7   : > { %4489 = vst [vmem:[%s7957_s28 + $0xb0] sm:$0xff] %v4443_v1 }
 0x5b8   : > { %4490 = vst [vmem:[%s7957_s28 + $0xb8] sm:$0xff] %v4445_v48 }
 0x5ba   : > { %v4448_v63 = vpop.f32.mrb[120].mxu1 }
 0x5bb   : > { %v4449_v6 = vadd.f32 %v4448_v63, %v7948_v52  ;;  %v4450_v53 = vpop.f32.mrb[121].mxu1 }
 0x5bc   : > { %v4451_v4 = vadd.f32 %v4450_v53, %v7951_v41  ;;  %v4452_v54 = vpop.f32.mrb[122].mxu1 }
 0x5bd   : > { %4491 = vst [vmem:[%s7957_s28 + $0xc0] sm:$0xff] %v4449_v6  ;;  %v4453_v9 = vadd.f32 %v4452_v54, %v7948_v52  ;;  %v4454_v59 = vpop.f32.mrb[123].mxu1 }
 0x5be   : > { %4492 = vst [vmem:[%s7957_s28 + $0xc8] sm:$0xff] %v4451_v4  ;;  %v4455_v24 = vadd.f32 %v4454_v59, %v7951_v41 }
 0x5bf   : > { %4493 = vst [vmem:[%s7957_s28 + $0xd0] sm:$0xff] %v4453_v9 }
 0x5c0   : > { %4494 = vst [vmem:[%s7957_s28 + $0xd8] sm:$0xff] %v4455_v24 }
 0x5c2   : > { %v4458_v55 = vpop.f32.mrb[124].mxu1 }
 0x5c3   : > { %v4459_v51 = vadd.f32 %v4458_v55, %v7948_v52  ;;  %v4460_v27 = vpop.f32.mrb[125].mxu1 }
 0x5c4   : > { %v4461_v19 = vadd.f32 %v4460_v27, %v7951_v41  ;;  %v4462_v16 = vpop.f32.mrb[126].mxu1 }
 0x5c5   : > { %4495 = vst [vmem:[%s7957_s28 + $0xe0] sm:$0xff] %v4459_v51  ;;  %v4463_v13 = vadd.f32 %v4462_v16, %v7948_v52  ;;  %v4464_v2 = vpop.f32.mrb[127].mxu1 }
 0x5c6   : > { %4496 = vst [vmem:[%s7957_s28 + $0xe8] sm:$0xff] %v4461_v19  ;;  %v4465_v8 = vadd.f32 %v4464_v2, %v7951_v41 }
 0x5c7   : > { %4497 = vst [vmem:[%s7957_s28 + $0xf0] sm:$0xff] %v4463_v13 }
 0x5c8   : > { %4498 = vst [vmem:[%s7957_s28 + $0xf8] sm:$0xff] %v4465_v8 }
 0x5c9   : > { %5847 = shalt.err (!%p5844_p12)
}
 0x5ca   : > { %s5848_s25 = scalar_lea.hbm %s8022_s14, 4096  ;;  %s5852_s21 = scalar_lea.hbm %s8080_s9, 12288 }
 0x5cb   : > { %p5849_p0 = scmp.ne.s32.totalorder %s8022_s14, %s5848_s25  ;;  %p5853_p11 = scmp.lt.u32.totalorder %s8022_s14, %s8080_s9 }
 0x5cc   : > { %p5854_p1 = scmp.lt.u32.totalorder %s5852_s21, %s5848_s25  ;;  %p5856_p4 = scmp.lt.u32.totalorder %s5848_s25, %s8022_s14 }
 0x5cd   : > { %p5850_p5 = pnand %p5849_p0, %p6138_p6 }
 0x5ce   : > { %p5855_p2 = por %p5854_p1, %p5853_p11 }
 0x5cf   : > { %p5851_p10 = pneg %p5850_p5 }
 0x5d0   : > { %p5857_p8 = por %p5856_p4, %p5855_p2 }
 0x5d2   : > { %p5858_p13 = pnand %p5857_p8, %p5851_p10 }
 0x5d4   : > { %5861 = shalt.err (!%p5858_p13)
}
 0x5d5   : > { %s5922_s16 = smov 256   ;;  %s5923_s30 = smov 16  }
 0x5d6   : > { %5055 = dma.vmem_to_hbm [thread:$0]  (%p6138_p6), %s8024_s24, 4096, %s8022_s14, %s4500_s13, %s5922_s16, %s5922_s16, %s5923_s30  }
 0x5d7 PF: > { %s8171_s15 = sld [smem:[#allocation16_spill]]  ;;  %s8172_s17 = sld [smem:[#allocation17_spill]] }
 0x5d8   : > { %p5087_p3 = scmp.ge.s32.totalorder %s5908_s12, 2 }
 0x5dd   : > { %s4529_s19 = sand.u32 1, %s8171_s15   ;;  %p8173_p7 = scmp.ne.s32.totalorder %s8172_s17, 0 }
 0x5de   : > { %s4530_s22 = scalar_lea.sflag [#allocation4], %s4529_s19 }
 0x5df   : > { %p5075_p9 = pnand %p5087_p3, %p8173_p7 }
 0x5e1   : > { %5891 = dma.done.wait (!%p5075_p9), %s4530_s22, 4096  }
 0x5e2   : > { %5893 = vsyncadd (!%p5075_p9), %s4530_s22, 4294963200  ;;  %p24_p12 = scmp.ge.s32.totalorder %s6125_s20, 5   ;;  %s8174_s30 = smov %s5900_s10 }
 0x5e3   : > { %s8175_s10 = smov %s5904_s11  ;;  %s8176_s11 = smov %s6134_s26 }
 0x5e4   : > { %s8177_s12 = smov %s6125_s20  ;;  %26 = sbr.rel (!%p24_p12) target bundleno = 9 (0x9), region = 117 }
 0x5eb   :  { %4535 = vsyncpa [#allocation3], 1 }
 0x5ec   :  { %4537 = vsyncpa [#allocation3 + $0x1], 1 }
 0x5ed   :  { %4538 = vsyncpa [#allocation6], 1 }
 0x5ee   :  { %4539 = vsyncpa [#allocation9], 1 }
 0x5ef   :  { %4540 = vsyncpa [#allocation4], 1 }
 0x5f0   :  { %4542 = vsyncpa [#allocation4 + $0x1], 1 }

</bundles_post_ra>
